<compile_context>
chip_gen: v7x
topology: tpu7x:2x2x1
jax: 0.10.0
libtpu: 0.0.40
codegen_flags: <defaults>
</compile_context>

<pallas_src>
import functools

import jax
import jax.numpy as jnp
from jax.experimental import pallas as pl
from jax.experimental.pallas import tpu as pltpu

BN_EPS = 1e-5

# Rows of the packed per-channel parameter array (shape (N_PARAM_ROWS, C)).
ROW_MOVE, ROW_PRELU1, ROW_BN1S, ROW_BN1B, ROW_PRELU2 = 0, 1, 2, 3, 4
ROW_SCALE, ROW_1MSCALE, ROW_BN2S, ROW_BN2B = 5, 6, 7, 8
N_PARAM_ROWS = 9


def _prelu(x, alpha):
    return jnp.where(x >= 0.0, x, x * alpha)


def _sign(x):
    # torch.sign semantics (sign(0) == 0); HardSign forward value at temperature=1
    return jnp.where(x > 0.0, 1.0, jnp.where(x < 0.0, -1.0, 0.0))


def basic_block_kernel(x_ref, w_ref, p_ref, sw1_ref, sb1_ref, sw2_ref, sb2_ref,
                       out_ref, act_buf, pad_ref, col_ref, *, H, W):
    j = pl.program_id(1)                 # 0 = Attention, 1 = FFN_3x3
    HW = H * W
    C = x_ref.shape[-1]
    base = W + 8                         # first image row inside the padded scratch
    pad_rows = pad_ref.shape[0]

    # Sub-block input: the image for Attention, Attention's output (carried in
    # act_buf across the j axis) for the FFN.
    @pl.when(j == 0)
    def _():
        act_buf[...] = x_ref[...]
    xin = act_buf[...]

    # Zero only the halo rows; interior rows are fully overwritten by `act`.
    pad_ref[0:base, :] = jnp.zeros((base, C), jnp.float32)
    pad_ref[base + HW:pad_rows, :] = jnp.zeros((pad_rows - base - HW, C), jnp.float32)

    # Residual: PReLU1 for Attention, identity for FFN (its alpha row is 1.0).
    res = _prelu(xin, p_ref[ROW_PRELU1:ROW_PRELU1 + 1, :])

    # HardSign(x + move_bias): forward value is exactly {-1, 0, +1}.
    act = _sign(xin + p_ref[ROW_MOVE:ROW_MOVE + 1, :])
    pad_ref[base:base + HW, :] = act

    # Column masks for the +/-1 horizontal taps (applied on bf16 data).
    col = jax.lax.broadcasted_iota(jnp.int32, (HW, 1), 0) % W
    ok_left = col > 0
    ok_right = col < (W - 1)

    # im2col staging: nine shifted (HW, C) views -> (HW, 9C) bf16, then ONE
    # fused K = 9C matmul (vertical halos read zeros from the padded scratch).
    k = 0
    for di in (-1, 0, 1):
        for dj in (-1, 0, 1):
            if di == 0 and dj == 0:
                t = act
            else:
                start = base + di * W + dj
                t = pad_ref[start:start + HW, :]
            tb = t.astype(jnp.bfloat16)
            if dj == -1:
                tb = jnp.where(ok_left, tb, jnp.zeros_like(tb))    # w-1 invalid at w==0
            elif dj == 1:
                tb = jnp.where(ok_right, tb, jnp.zeros_like(tb))   # w+1 invalid at w==W-1
            col_ref[:, k * C:(k + 1) * C] = tb
            k += 1
    acc = jnp.dot(col_ref[...], w_ref[...], preferred_element_type=jnp.float32)

    # BatchNorm1 (eval, folded) + PReLU2.
    h = acc * p_ref[ROW_BN1S:ROW_BN1S + 1, :] + p_ref[ROW_BN1B:ROW_BN1B + 1, :]
    h = _prelu(h, p_ref[ROW_PRELU2:ROW_PRELU2 + 1, :])

    # SqueezeAndExpand on mix = scale*res + (1-scale)*h.  scale is per-channel,
    # so mean(mix) = scale*mean(res) + (1-scale)*mean(h): `mix` is never built.
    sum_res = jnp.sum(res, axis=0, keepdims=True)
    sum_h = jnp.sum(h, axis=0, keepdims=True)
    pooled = (p_ref[ROW_SCALE:ROW_SCALE + 1, :] * sum_res
              + p_ref[ROW_1MSCALE:ROW_1MSCALE + 1, :] * sum_h) * (1.0 / HW)
    se = jnp.dot(pooled, sw1_ref[...], preferred_element_type=jnp.float32) + sb1_ref[...]
    se = jnp.maximum(se, 0.0)
    se = jnp.dot(se, sw2_ref[...], preferred_element_type=jnp.float32) + sb2_ref[...]
    gate = 1.0 / (1.0 + jnp.exp(-se))    # exact sigmoid; only a (1, C) vector

    gh = gate * h
    bn2s = p_ref[ROW_BN2S:ROW_BN2S + 1, :]
    bn2b = p_ref[ROW_BN2B:ROW_BN2B + 1, :]

    @pl.when(j == 0)                     # Attention: x = x * residual, feeds the FFN step
    def _():
        act_buf[...] = (gh * res) * bn2s + bn2b + res

    @pl.when(j == 1)                     # FFN: block output
    def _():
        out_ref[...] = gh * bn2s + bn2b + res


def basic_block_forward(x_nchw, params):
    N, C, H, W = x_nchw.shape
    HW = H * W
    # TODO(synk): hoist this layout change out of the per-block wrapper in a full net.
    x = jnp.transpose(x_nchw, (0, 2, 3, 1)).reshape(N, HW, C)   # NCHW -> (N, HW, C)

    Ch = params["se_w1"].shape[-1]
    pad_rows = (W + 8) + HW + (W + 8)

    kern = functools.partial(basic_block_kernel, H=H, W=W)
    img = lambda n, j: (n, 0, 0)
    branch = lambda n, j: (j, 0, 0)      # per-step DMA of the selected branch's params

    out = pl.pallas_call(
        kern,
        grid=(N, 2),
        in_specs=[
            pl.BlockSpec((None, HW, C), img),              # image (resident across j)
            pl.BlockSpec((None, 9 * C, C), branch),        # conv weights, im2col layout (bf16)
            pl.BlockSpec((None, N_PARAM_ROWS, C), branch), # packed per-channel params
            pl.BlockSpec((None, C, Ch), branch),           # SE w1
            pl.BlockSpec((None, 1, Ch), branch),           # SE b1
            pl.BlockSpec((None, Ch, C), branch),           # SE w2
            pl.BlockSpec((None, 1, C), branch),            # SE b2
        ],
        out_specs=pl.BlockSpec((None, HW, C), img),
        out_shape=jax.ShapeDtypeStruct((N, HW, C), jnp.float32),
        scratch_shapes=[
            pltpu.VMEM((HW, C), jnp.float32),              # act_buf: Attention -> FFN carry
            pltpu.VMEM((pad_rows, C), jnp.float32),        # zero-haloed flat activation
            pltpu.VMEM((HW, 9 * C), jnp.bfloat16),         # im2col staging
        ],
        compiler_params=pltpu.CompilerParams(
            dimension_semantics=("parallel", "arbitrary")),
    )(x, params["conv_w"], params["pack"], params["se_w1"], params["se_b1"],
      params["se_w2"], params["se_b2"])

    return jnp.transpose(out.reshape(N, H, W, C), (0, 3, 1, 2))  # back to NCHW


# --------------------------------------------------------------------------
# Deterministic parameter construction (shapes from the module __init__).
# Attention and FFN params are stacked along a leading axis of size 2.
# --------------------------------------------------------------------------
def make_branch_params(key, C, *, prelu1_identity):
    ks = jax.random.split(key, 5)
    hidden = max(C // 8, 1)

    # HardBinaryConv: weight (Cout, Cin, 3, 3) = randn*0.001; eval forward uses
    # clamp(clamp(w, -1.5, 1.5) / temperature, -1, 1) with temperature = 1.
    w = jax.random.normal(ks[0], (C, C, 3, 3), jnp.float32) * 0.001
    w = jnp.clip(jnp.clip(w, -1.5, 1.5), -1.0, 1.0)
    # (Cout, Cin, kh, kw) -> (kh*kw*Cin, Cout): matches the im2col column order.
    conv_w = jnp.transpose(w, (2, 3, 1, 0)).reshape(9 * C, C).astype(jnp.bfloat16)

    # BatchNorm (eval): fold fresh running stats + affine into scale/bias.
    gamma = jnp.ones((C,), jnp.float32)
    beta = jnp.zeros((C,), jnp.float32)
    rmean = jnp.zeros((C,), jnp.float32)
    rvar = jnp.ones((C,), jnp.float32)
    bn_scale = gamma / jnp.sqrt(rvar + BN_EPS)
    bn_bias = beta - rmean * bn_scale

    scale = jnp.full((C,), 0.5, jnp.float32)     # mixing scale (clamp to [0,1] is a no-op)
    pack = jnp.zeros((N_PARAM_ROWS, C), jnp.float32)
    pack = pack.at[ROW_MOVE].set(0.0)                                   # LearnableBias
    pack = pack.at[ROW_PRELU1].set(1.0 if prelu1_identity else 0.25)    # residual PReLU / identity
    pack = pack.at[ROW_BN1S].set(bn_scale)
    pack = pack.at[ROW_BN1B].set(bn_bias)
    pack = pack.at[ROW_PRELU2].set(0.25)
    pack = pack.at[ROW_SCALE].set(scale)
    pack = pack.at[ROW_1MSCALE].set(1.0 - scale)                        # precomputed host-side
    pack = pack.at[ROW_BN2S].set(bn_scale)
    pack = pack.at[ROW_BN2B].set(bn_bias)

    return {
        "conv_w": conv_w,
        "pack": pack,
        # SqueezeAndExpand 1x1 convs (with bias)
        "se_w1": jax.random.normal(ks[1], (C, hidden), jnp.float32) / jnp.sqrt(1.0 * C),
        "se_b1": jax.random.normal(ks[2], (1, hidden), jnp.float32) * 0.01,
        "se_w2": jax.random.normal(ks[3], (hidden, C), jnp.float32) / jnp.sqrt(1.0 * hidden),
        "se_b2": jax.random.normal(ks[4], (1, C), jnp.float32) * 0.01,
    }


def make_params(key, C):
    k_attn, k_ffn = jax.random.split(key)
    attn = make_branch_params(k_attn, C, prelu1_identity=False)   # Attention: PReLU residual
    ffn = make_branch_params(k_ffn, C, prelu1_identity=True)      # FFN: identity residual
    return {k: jnp.stack([attn[k], ffn[k]], axis=0) for k in attn}


if __name__ == "__main__":
    key = jax.random.PRNGKey(0)
    k_in, k_params = jax.random.split(key)

    # inplanes == planes, stride = 1, no downsample.  C = 128 keeps the channel
    # (lane) axis dense, matching production BNext stage widths.
    N, C, H, W = 2, 128, 16, 16
    x = jax.random.normal(k_in, (N, C, H, W), jnp.float32)
    params = make_params(k_params, C)

    fwd = jax.jit(basic_block_forward)
    out = fwd(x, params)
    jax.block_until_ready(out)
    assert out.shape == (N, C, H, W) and out.dtype == jnp.float32
    assert bool(jnp.all(jnp.isfinite(out)))
    print("KERNEL_OK")
</pallas_src>

<mosaic_0001>
module attributes {stable_mosaic.version = 11 : i64} {
  func.func @basic_block_kernel(%arg0: i32, %arg1: i32, %arg2: memref<1x256x128xf32, #tpu.memory_space<vmem>>, %arg3: memref<1x1152x128xbf16, #tpu.memory_space<vmem>>, %arg4: memref<1x9x128xf32, #tpu.memory_space<vmem>>, %arg5: memref<1x128x16xf32, #tpu.memory_space<vmem>>, %arg6: memref<1x1x16xf32, #tpu.memory_space<vmem>>, %arg7: memref<1x16x128xf32, #tpu.memory_space<vmem>>, %arg8: memref<1x1x128xf32, #tpu.memory_space<vmem>>, %arg9: memref<1x256x128xf32, #tpu.memory_space<vmem>>, %arg10: memref<256x128xf32, #tpu.memory_space<vmem>>, %arg11: memref<304x128xf32, #tpu.memory_space<vmem>>, %arg12: memref<256x1152xbf16, #tpu.memory_space<vmem>>) attributes {dimension_semantics = [#tpu.dimension_semantics<parallel>, #tpu.dimension_semantics<arbitrary>], iteration_bounds = array<i64: 2, 2>, scalar_prefetch = 0 : i64, scratch_operands = 3 : i64, tpu.core_type = #tpu.core_type<tc>, window_params = [{transform_indices = @transform_0, window_bounds = array<i64: 1, 256, 128>}, {transform_indices = @transform_1, window_bounds = array<i64: 1, 1152, 128>}, {transform_indices = @transform_2, window_bounds = array<i64: 1, 9, 128>}, {transform_indices = @transform_3, window_bounds = array<i64: 1, 128, 16>}, {transform_indices = @transform_4, window_bounds = array<i64: 1, 1, 16>}, {transform_indices = @transform_5, window_bounds = array<i64: 1, 16, 128>}, {transform_indices = @transform_6, window_bounds = array<i64: 1, 1, 128>}, {transform_indices = @transform_7, window_bounds = array<i64: 1, 256, 128>}]} {
    %c0_i32 = arith.constant 0 : i32
    %0 = arith.cmpi eq, %arg1, %c0_i32 : i32
    %1 = arith.extui %0 : i1 to i32
    %c0_i32_0 = arith.constant 0 : i32
    %2 = arith.cmpi ne, %1, %c0_i32_0 : i32
    scf.if %2 {
      %c0_95 = arith.constant 0 : index
      %c0_96 = arith.constant 0 : index
      %c0_97 = arith.constant 0 : index
      %165 = vector.load %arg2[%c0_95, %c0_96, %c0_97] : memref<1x256x128xf32, #tpu.memory_space<vmem>>, vector<1x256x128xf32>
      %166 = vector.shape_cast %165 : vector<1x256x128xf32> to vector<256x128xf32>
      %c0_98 = arith.constant 0 : index
      %c0_99 = arith.constant 0 : index
      %167 = vector.load %arg10[%c0_98, %c0_99] : memref<256x128xf32, #tpu.memory_space<vmem>>, vector<256x128xf32>
      tpu.vector_store %arg10[%c0_98, %c0_99], %166 {strides = array<i32>} : memref<256x128xf32, #tpu.memory_space<vmem>>, vector<256x128xf32>,
    } else {
    }
    %c0 = arith.constant 0 : index
    %c0_1 = arith.constant 0 : index
    %3 = vector.load %arg10[%c0, %c0_1] : memref<256x128xf32, #tpu.memory_space<vmem>>, vector<256x128xf32>
    %cst = arith.constant 0.000000e+00 : f32
    %4 = vector.broadcast %cst : f32 to vector<24x128xf32>
    %c0_2 = arith.constant 0 : index
    %c0_3 = arith.constant 0 : index
    %5 = vector.load %arg11[%c0_2, %c0_3] : memref<304x128xf32, #tpu.memory_space<vmem>>, vector<24x128xf32>
    tpu.vector_store %arg11[%c0_2, %c0_3], %4 {strides = array<i32>} : memref<304x128xf32, #tpu.memory_space<vmem>>, vector<24x128xf32>,
    %cst_4 = arith.constant 0.000000e+00 : f32
    %6 = vector.broadcast %cst_4 : f32 to vector<24x128xf32>
    %c280 = arith.constant 280 : index
    %c0_5 = arith.constant 0 : index
    %7 = vector.load %arg11[%c280, %c0_5] : memref<304x128xf32, #tpu.memory_space<vmem>>, vector<24x128xf32>
    tpu.vector_store %arg11[%c280, %c0_5], %6 {strides = array<i32>} : memref<304x128xf32, #tpu.memory_space<vmem>>, vector<24x128xf32>,
    %c0_6 = arith.constant 0 : index
    %c1 = arith.constant 1 : index
    %c0_7 = arith.constant 0 : index
    %8 = vector.load %arg4[%c0_6, %c1, %c0_7] : memref<1x9x128xf32, #tpu.memory_space<vmem>>, vector<1x1x128xf32>
    %9 = vector.shape_cast %8 : vector<1x1x128xf32> to vector<1x128xf32>
    %cst_8 = arith.constant 0.000000e+00 : f32
    %10 = vector.broadcast %cst_8 : f32 to vector<256x128xf32>
    %11 = arith.cmpf oge, %3, %10 : vector<256x128xf32>
    %12 = vector.broadcast %9 : vector<1x128xf32> to vector<256x128xf32>
    %13 = arith.mulf %3, %12 : vector<256x128xf32>
    %14 = arith.select %11, %3, %13 : vector<256x128xi1>, vector<256x128xf32>
    %c0_9 = arith.constant 0 : index
    %c0_10 = arith.constant 0 : index
    %c0_11 = arith.constant 0 : index
    %15 = vector.load %arg4[%c0_9, %c0_10, %c0_11] : memref<1x9x128xf32, #tpu.memory_space<vmem>>, vector<1x1x128xf32>
    %16 = vector.shape_cast %15 : vector<1x1x128xf32> to vector<1x128xf32>
    %17 = vector.broadcast %16 : vector<1x128xf32> to vector<256x128xf32>
    %18 = arith.addf %3, %17 : vector<256x128xf32>
    %cst_12 = arith.constant 0.000000e+00 : f32
    %19 = vector.broadcast %cst_12 : f32 to vector<256x128xf32>
    %20 = arith.cmpf ogt, %18, %19 : vector<256x128xf32>
    %cst_13 = arith.constant 0.000000e+00 : f32
    %21 = vector.broadcast %cst_13 : f32 to vector<256x128xf32>
    %22 = arith.cmpf olt, %18, %21 : vector<256x128xf32>
    %cst_14 = arith.constant -1.000000e+00 : f32
    %cst_15 = arith.constant 0.000000e+00 : f32
    %23 = vector.broadcast %cst_14 : f32 to vector<256x128xf32>
    %24 = vector.broadcast %cst_15 : f32 to vector<256x128xf32>
    %25 = arith.select %22, %23, %24 : vector<256x128xi1>, vector<256x128xf32>
    %cst_16 = arith.constant 1.000000e+00 : f32
    %26 = vector.broadcast %cst_16 : f32 to vector<256x128xf32>
    %27 = arith.select %20, %26, %25 : vector<256x128xi1>, vector<256x128xf32>
    %c24 = arith.constant 24 : index
    %c0_17 = arith.constant 0 : index
    %28 = vector.load %arg11[%c24, %c0_17] : memref<304x128xf32, #tpu.memory_space<vmem>>, vector<256x128xf32>
    tpu.vector_store %arg11[%c24, %c0_17], %27 {strides = array<i32>} : memref<304x128xf32, #tpu.memory_space<vmem>>, vector<256x128xf32>,
    %29 = tpu.iota {dimensions = array<i32: 0>} : vector<256x1xi32>
    %c16_i32 = arith.constant 16 : i32
    %c0_i32_18 = arith.constant 0 : i32
    %30 = arith.cmpi eq, %c16_i32, %c0_i32_18 : i32
    %c1_i32 = arith.constant 1 : i32
    %31 = arith.select %30, %c1_i32, %c16_i32 : i32
    %32 = vector.broadcast %31 : i32 to vector<256x1xi32>
    %33 = arith.remsi %29, %32 : vector<256x1xi32>
    %c0_i32_19 = arith.constant 0 : i32
    %34 = vector.broadcast %c0_i32_19 : i32 to vector<256x1xi32>
    %35 = arith.cmpi ne, %33, %34 : vector<256x1xi32>
    %c0_i32_20 = arith.constant 0 : i32
    %36 = vector.broadcast %c0_i32_20 : i32 to vector<256x1xi32>
    %37 = arith.cmpi slt, %33, %36 : vector<256x1xi32>
    %c0_i32_21 = arith.constant 0 : i32
    %38 = arith.cmpi slt, %31, %c0_i32_21 : i32
    %39 = vector.broadcast %38 : i1 to vector<256x1xi1>
    %40 = vector.broadcast %39 : vector<256x1xi1> to vector<256x1xi1>
    %41 = arith.xori %37, %40 : vector<256x1xi1>
    %42 = arith.andi %41, %35 : vector<256x1xi1>
    %43 = vector.broadcast %31 : i32 to vector<256x1xi32>
    %44 = arith.addi %33, %43 : vector<256x1xi32>
    %45 = arith.select %42, %44, %33 : vector<256x1xi1>, vector<256x1xi32>
    %c0_i32_22 = arith.constant 0 : i32
    %46 = vector.broadcast %c0_i32_22 : i32 to vector<256x1xi32>
    %47 = arith.cmpi sgt, %45, %46 : vector<256x1xi32>
    %c15_i32 = arith.constant 15 : i32
    %48 = vector.broadcast %c15_i32 : i32 to vector<256x1xi32>
    %49 = arith.cmpi slt, %45, %48 : vector<256x1xi32>
    %c7 = arith.constant 7 : index
    %c0_23 = arith.constant 0 : index
    %50 = vector.load %arg11[%c7, %c0_23] : memref<304x128xf32, #tpu.memory_space<vmem>>, vector<256x128xf32>
    %51 = arith.truncf %50 : vector<256x128xf32> to vector<256x128xbf16>
    %cst_24 = arith.constant 0.000000e+00 : bf16
    %52 = vector.broadcast %cst_24 : bf16 to vector<256x128xbf16>
    %53 = vector.shape_cast %47 : vector<256x1xi1> to vector<256x1xi1>
    %54 = vector.broadcast %53 : vector<256x1xi1> to vector<256x128xi1>
    %55 = arith.select %54, %51, %52 : vector<256x128xi1>, vector<256x128xbf16>
    %c0_25 = arith.constant 0 : index
    %c0_26 = arith.constant 0 : index
    %56 = vector.load %arg12[%c0_25, %c0_26] : memref<256x1152xbf16, #tpu.memory_space<vmem>>, vector<256x128xbf16>
    tpu.vector_store %arg12[%c0_25, %c0_26], %55 {strides = array<i32>} : memref<256x1152xbf16, #tpu.memory_space<vmem>>, vector<256x128xbf16>,
    %c8 = arith.constant 8 : index
    %c0_27 = arith.constant 0 : index
    %57 = vector.load %arg11[%c8, %c0_27] : memref<304x128xf32, #tpu.memory_space<vmem>>, vector<256x128xf32>
    %58 = arith.truncf %57 : vector<256x128xf32> to vector<256x128xbf16>
    %c0_28 = arith.constant 0 : index
    %c128 = arith.constant 128 : index
    %59 = vector.load %arg12[%c0_28, %c128] : memref<256x1152xbf16, #tpu.memory_space<vmem>>, vector<256x128xbf16>
    tpu.vector_store %arg12[%c0_28, %c128], %58 {strides = array<i32>} : memref<256x1152xbf16, #tpu.memory_space<vmem>>, vector<256x128xbf16>,
    %c9 = arith.constant 9 : index
    %c0_29 = arith.constant 0 : index
    %60 = vector.load %arg11[%c9, %c0_29] : memref<304x128xf32, #tpu.memory_space<vmem>>, vector<256x128xf32>
    %61 = arith.truncf %60 : vector<256x128xf32> to vector<256x128xbf16>
    %cst_30 = arith.constant 0.000000e+00 : bf16
    %62 = vector.broadcast %cst_30 : bf16 to vector<256x128xbf16>
    %63 = vector.shape_cast %49 : vector<256x1xi1> to vector<256x1xi1>
    %64 = vector.broadcast %63 : vector<256x1xi1> to vector<256x128xi1>
    %65 = arith.select %64, %61, %62 : vector<256x128xi1>, vector<256x128xbf16>
    %c0_31 = arith.constant 0 : index
    %c256 = arith.constant 256 : index
    %66 = vector.load %arg12[%c0_31, %c256] : memref<256x1152xbf16, #tpu.memory_space<vmem>>, vector<256x128xbf16>
    tpu.vector_store %arg12[%c0_31, %c256], %65 {strides = array<i32>} : memref<256x1152xbf16, #tpu.memory_space<vmem>>, vector<256x128xbf16>,
    %c23 = arith.constant 23 : index
    %c0_32 = arith.constant 0 : index
    %67 = vector.load %arg11[%c23, %c0_32] : memref<304x128xf32, #tpu.memory_space<vmem>>, vector<256x128xf32>
    %68 = arith.truncf %67 : vector<256x128xf32> to vector<256x128xbf16>
    %cst_33 = arith.constant 0.000000e+00 : bf16
    %69 = vector.broadcast %cst_33 : bf16 to vector<256x128xbf16>
    %70 = vector.shape_cast %47 : vector<256x1xi1> to vector<256x1xi1>
    %71 = vector.broadcast %70 : vector<256x1xi1> to vector<256x128xi1>
    %72 = arith.select %71, %68, %69 : vector<256x128xi1>, vector<256x128xbf16>
    %c0_34 = arith.constant 0 : index
    %c384 = arith.constant 384 : index
    %73 = vector.load %arg12[%c0_34, %c384] : memref<256x1152xbf16, #tpu.memory_space<vmem>>, vector<256x128xbf16>
    tpu.vector_store %arg12[%c0_34, %c384], %72 {strides = array<i32>} : memref<256x1152xbf16, #tpu.memory_space<vmem>>, vector<256x128xbf16>,
    %74 = arith.truncf %27 : vector<256x128xf32> to vector<256x128xbf16>
    %c0_35 = arith.constant 0 : index
    %c512 = arith.constant 512 : index
    %75 = vector.load %arg12[%c0_35, %c512] : memref<256x1152xbf16, #tpu.memory_space<vmem>>, vector<256x128xbf16>
    tpu.vector_store %arg12[%c0_35, %c512], %74 {strides = array<i32>} : memref<256x1152xbf16, #tpu.memory_space<vmem>>, vector<256x128xbf16>,
    %c25 = arith.constant 25 : index
    %c0_36 = arith.constant 0 : index
    %76 = vector.load %arg11[%c25, %c0_36] : memref<304x128xf32, #tpu.memory_space<vmem>>, vector<256x128xf32>
    %77 = arith.truncf %76 : vector<256x128xf32> to vector<256x128xbf16>
    %cst_37 = arith.constant 0.000000e+00 : bf16
    %78 = vector.broadcast %cst_37 : bf16 to vector<256x128xbf16>
    %79 = vector.shape_cast %49 : vector<256x1xi1> to vector<256x1xi1>
    %80 = vector.broadcast %79 : vector<256x1xi1> to vector<256x128xi1>
    %81 = arith.select %80, %77, %78 : vector<256x128xi1>, vector<256x128xbf16>
    %c0_38 = arith.constant 0 : index
    %c640 = arith.constant 640 : index
    %82 = vector.load %arg12[%c0_38, %c640] : memref<256x1152xbf16, #tpu.memory_space<vmem>>, vector<256x128xbf16>
    tpu.vector_store %arg12[%c0_38, %c640], %81 {strides = array<i32>} : memref<256x1152xbf16, #tpu.memory_space<vmem>>, vector<256x128xbf16>,
    %c39 = arith.constant 39 : index
    %c0_39 = arith.constant 0 : index
    %83 = vector.load %arg11[%c39, %c0_39] : memref<304x128xf32, #tpu.memory_space<vmem>>, vector<256x128xf32>
    %84 = arith.truncf %83 : vector<256x128xf32> to vector<256x128xbf16>
    %cst_40 = arith.constant 0.000000e+00 : bf16
    %85 = vector.broadcast %cst_40 : bf16 to vector<256x128xbf16>
    %86 = vector.shape_cast %47 : vector<256x1xi1> to vector<256x1xi1>
    %87 = vector.broadcast %86 : vector<256x1xi1> to vector<256x128xi1>
    %88 = arith.select %87, %84, %85 : vector<256x128xi1>, vector<256x128xbf16>
    %c0_41 = arith.constant 0 : index
    %c768 = arith.constant 768 : index
    %89 = vector.load %arg12[%c0_41, %c768] : memref<256x1152xbf16, #tpu.memory_space<vmem>>, vector<256x128xbf16>
    tpu.vector_store %arg12[%c0_41, %c768], %88 {strides = array<i32>} : memref<256x1152xbf16, #tpu.memory_space<vmem>>, vector<256x128xbf16>,
    %c40 = arith.constant 40 : index
    %c0_42 = arith.constant 0 : index
    %90 = vector.load %arg11[%c40, %c0_42] : memref<304x128xf32, #tpu.memory_space<vmem>>, vector<256x128xf32>
    %91 = arith.truncf %90 : vector<256x128xf32> to vector<256x128xbf16>
    %c0_43 = arith.constant 0 : index
    %c896 = arith.constant 896 : index
    %92 = vector.load %arg12[%c0_43, %c896] : memref<256x1152xbf16, #tpu.memory_space<vmem>>, vector<256x128xbf16>
    tpu.vector_store %arg12[%c0_43, %c896], %91 {strides = array<i32>} : memref<256x1152xbf16, #tpu.memory_space<vmem>>, vector<256x128xbf16>,
    %c41 = arith.constant 41 : index
    %c0_44 = arith.constant 0 : index
    %93 = vector.load %arg11[%c41, %c0_44] : memref<304x128xf32, #tpu.memory_space<vmem>>, vector<256x128xf32>
    %94 = arith.truncf %93 : vector<256x128xf32> to vector<256x128xbf16>
    %cst_45 = arith.constant 0.000000e+00 : bf16
    %95 = vector.broadcast %cst_45 : bf16 to vector<256x128xbf16>
    %96 = vector.shape_cast %49 : vector<256x1xi1> to vector<256x1xi1>
    %97 = vector.broadcast %96 : vector<256x1xi1> to vector<256x128xi1>
    %98 = arith.select %97, %94, %95 : vector<256x128xi1>, vector<256x128xbf16>
    %c0_46 = arith.constant 0 : index
    %c1024 = arith.constant 1024 : index
    %99 = vector.load %arg12[%c0_46, %c1024] : memref<256x1152xbf16, #tpu.memory_space<vmem>>, vector<256x128xbf16>
    tpu.vector_store %arg12[%c0_46, %c1024], %98 {strides = array<i32>} : memref<256x1152xbf16, #tpu.memory_space<vmem>>, vector<256x128xbf16>,
    %c0_47 = arith.constant 0 : index
    %c0_48 = arith.constant 0 : index
    %100 = vector.load %arg12[%c0_47, %c0_48] : memref<256x1152xbf16, #tpu.memory_space<vmem>>, vector<256x1152xbf16>
    %c0_49 = arith.constant 0 : index
    %c0_50 = arith.constant 0 : index
    %c0_51 = arith.constant 0 : index
    %101 = vector.load %arg3[%c0_49, %c0_50, %c0_51] : memref<1x1152x128xbf16, #tpu.memory_space<vmem>>, vector<1x1152x128xbf16>
    %102 = vector.shape_cast %101 : vector<1x1152x128xbf16> to vector<1152x128xbf16>
    %cst_52 = arith.constant dense<0.000000e+00> : vector<256x128xf32>
    %103 = tpu.matmul %100, %102, %cst_52 {dimension_numbers = #tpu.dot_dimension_numbers<[1], [0], [0], [1], [0, 0, 1, 1], [], []>} : vector<256x1152xbf16>, vector<1152x128xbf16>, vector<256x128xf32> -> vector<256x128xf32>
    %c0_53 = arith.constant 0 : index
    %c2 = arith.constant 2 : index
    %c0_54 = arith.constant 0 : index
    %104 = vector.load %arg4[%c0_53, %c2, %c0_54] : memref<1x9x128xf32, #tpu.memory_space<vmem>>, vector<1x1x128xf32>
    %105 = vector.shape_cast %104 : vector<1x1x128xf32> to vector<1x128xf32>
    %106 = vector.broadcast %105 : vector<1x128xf32> to vector<256x128xf32>
    %107 = arith.mulf %103, %106 : vector<256x128xf32>
    %c0_55 = arith.constant 0 : index
    %c3 = arith.constant 3 : index
    %c0_56 = arith.constant 0 : index
    %108 = vector.load %arg4[%c0_55, %c3, %c0_56] : memref<1x9x128xf32, #tpu.memory_space<vmem>>, vector<1x1x128xf32>
    %109 = vector.shape_cast %108 : vector<1x1x128xf32> to vector<1x128xf32>
    %110 = vector.broadcast %109 : vector<1x128xf32> to vector<256x128xf32>
    %111 = arith.addf %107, %110 : vector<256x128xf32>
    %c0_57 = arith.constant 0 : index
    %c4 = arith.constant 4 : index
    %c0_58 = arith.constant 0 : index
    %112 = vector.load %arg4[%c0_57, %c4, %c0_58] : memref<1x9x128xf32, #tpu.memory_space<vmem>>, vector<1x1x128xf32>
    %113 = vector.shape_cast %112 : vector<1x1x128xf32> to vector<1x128xf32>
    %cst_59 = arith.constant 0.000000e+00 : f32
    %114 = vector.broadcast %cst_59 : f32 to vector<256x128xf32>
    %115 = arith.cmpf oge, %111, %114 : vector<256x128xf32>
    %116 = vector.broadcast %113 : vector<1x128xf32> to vector<256x128xf32>
    %117 = arith.mulf %111, %116 : vector<256x128xf32>
    %118 = arith.select %115, %111, %117 : vector<256x128xi1>, vector<256x128xf32>
    %cst_60 = arith.constant dense<0.000000e+00> : vector<128xf32>
    %119 = vector.multi_reduction <add>, %14, %cst_60 [0] : vector<256x128xf32> to vector<128xf32>
    %120 = vector.shape_cast %119 : vector<128xf32> to vector<1x128xf32>
    %cst_61 = arith.constant dense<0.000000e+00> : vector<128xf32>
    %121 = vector.multi_reduction <add>, %118, %cst_61 [0] : vector<256x128xf32> to vector<128xf32>
    %122 = vector.shape_cast %121 : vector<128xf32> to vector<1x128xf32>
    %c0_62 = arith.constant 0 : index
    %c5 = arith.constant 5 : index
    %c0_63 = arith.constant 0 : index
    %123 = vector.load %arg4[%c0_62, %c5, %c0_63] : memref<1x9x128xf32, #tpu.memory_space<vmem>>, vector<1x1x128xf32>
    %124 = vector.shape_cast %123 : vector<1x1x128xf32> to vector<1x128xf32>
    %125 = arith.mulf %124, %120 : vector<1x128xf32>
    %c0_64 = arith.constant 0 : index
    %c6 = arith.constant 6 : index
    %c0_65 = arith.constant 0 : index
    %126 = vector.load %arg4[%c0_64, %c6, %c0_65] : memref<1x9x128xf32, #tpu.memory_space<vmem>>, vector<1x1x128xf32>
    %127 = vector.shape_cast %126 : vector<1x1x128xf32> to vector<1x128xf32>
    %128 = arith.mulf %127, %122 : vector<1x128xf32>
    %129 = arith.addf %125, %128 : vector<1x128xf32>
    %cst_66 = arith.constant 3.906250e-03 : f32
    %130 = vector.broadcast %cst_66 : f32 to vector<1x128xf32>
    %131 = arith.mulf %129, %130 : vector<1x128xf32>
    %c0_67 = arith.constant 0 : index
    %c0_68 = arith.constant 0 : index
    %c0_69 = arith.constant 0 : index
    %132 = vector.load %arg5[%c0_67, %c0_68, %c0_69] : memref<1x128x16xf32, #tpu.memory_space<vmem>>, vector<1x128x16xf32>
    %133 = vector.shape_cast %132 : vector<1x128x16xf32> to vector<128x16xf32>
    %cst_70 = arith.constant dense<0.000000e+00> : vector<1x16xf32>
    %134 = tpu.matmul %131, %133, %cst_70 {dimension_numbers = #tpu.dot_dimension_numbers<[1], [0], [0], [1], [0, 0, 1, 1], [], []>} : vector<1x128xf32>, vector<128x16xf32>, vector<1x16xf32> -> vector<1x16xf32>
    %c0_71 = arith.constant 0 : index
    %c0_72 = arith.constant 0 : index
    %c0_73 = arith.constant 0 : index
    %135 = vector.load %arg6[%c0_71, %c0_72, %c0_73] : memref<1x1x16xf32, #tpu.memory_space<vmem>>, vector<1x1x16xf32>
    %136 = vector.shape_cast %135 : vector<1x1x16xf32> to vector<1x16xf32>
    %137 = arith.addf %134, %136 : vector<1x16xf32>
    %cst_74 = arith.constant 0.000000e+00 : f32
    %138 = vector.broadcast %cst_74 : f32 to vector<1x16xf32>
    %139 = arith.maximumf %137, %138 : vector<1x16xf32>
    %c0_75 = arith.constant 0 : index
    %c0_76 = arith.constant 0 : index
    %c0_77 = arith.constant 0 : index
    %140 = vector.load %arg7[%c0_75, %c0_76, %c0_77] : memref<1x16x128xf32, #tpu.memory_space<vmem>>, vector<1x16x128xf32>
    %141 = vector.shape_cast %140 : vector<1x16x128xf32> to vector<16x128xf32>
    %cst_78 = arith.constant dense<0.000000e+00> : vector<1x128xf32>
    %142 = tpu.matmul %139, %141, %cst_78 {dimension_numbers = #tpu.dot_dimension_numbers<[1], [0], [0], [1], [0, 0, 1, 1], [], []>} : vector<1x16xf32>, vector<16x128xf32>, vector<1x128xf32> -> vector<1x128xf32>
    %c0_79 = arith.constant 0 : index
    %c0_80 = arith.constant 0 : index
    %c0_81 = arith.constant 0 : index
    %143 = vector.load %arg8[%c0_79, %c0_80, %c0_81] : memref<1x1x128xf32, #tpu.memory_space<vmem>>, vector<1x1x128xf32>
    %144 = vector.shape_cast %143 : vector<1x1x128xf32> to vector<1x128xf32>
    %145 = arith.addf %142, %144 : vector<1x128xf32>
    %cst_82 = arith.constant 0.000000e+00 : f32
    %146 = vector.broadcast %cst_82 : f32 to vector<1x128xf32>
    %147 = arith.subf %146, %145 : vector<1x128xf32>
    %148 = math.exp %147 : vector<1x128xf32>
    %cst_83 = arith.constant 1.000000e+00 : f32
    %149 = vector.broadcast %cst_83 : f32 to vector<1x128xf32>
    %150 = arith.addf %149, %148 : vector<1x128xf32>
    %cst_84 = arith.constant 1.000000e+00 : f32
    %151 = vector.broadcast %cst_84 : f32 to vector<1x128xf32>
    %152 = arith.divf %151, %150 : vector<1x128xf32>
    %153 = vector.broadcast %152 : vector<1x128xf32> to vector<256x128xf32>
    %154 = arith.mulf %153, %118 : vector<256x128xf32>
    %c0_85 = arith.constant 0 : index
    %c7_86 = arith.constant 7 : index
    %c0_87 = arith.constant 0 : index
    %155 = vector.load %arg4[%c0_85, %c7_86, %c0_87] : memref<1x9x128xf32, #tpu.memory_space<vmem>>, vector<1x1x128xf32>
    %156 = vector.shape_cast %155 : vector<1x1x128xf32> to vector<1x128xf32>
    %c0_88 = arith.constant 0 : index
    %c8_89 = arith.constant 8 : index
    %c0_90 = arith.constant 0 : index
    %157 = vector.load %arg4[%c0_88, %c8_89, %c0_90] : memref<1x9x128xf32, #tpu.memory_space<vmem>>, vector<1x1x128xf32>
    %158 = vector.shape_cast %157 : vector<1x1x128xf32> to vector<1x128xf32>
    %c0_i32_91 = arith.constant 0 : i32
    %159 = arith.cmpi eq, %arg1, %c0_i32_91 : i32
    %160 = arith.extui %159 : i1 to i32
    %c0_i32_92 = arith.constant 0 : i32
    %161 = arith.cmpi ne, %160, %c0_i32_92 : i32
    scf.if %161 {
      %165 = arith.mulf %154, %14 : vector<256x128xf32>
      %166 = vector.broadcast %156 : vector<1x128xf32> to vector<256x128xf32>
      %167 = arith.mulf %165, %166 : vector<256x128xf32>
      %168 = vector.broadcast %158 : vector<1x128xf32> to vector<256x128xf32>
      %169 = arith.addf %167, %168 : vector<256x128xf32>
      %170 = arith.addf %169, %14 : vector<256x128xf32>
      %c0_95 = arith.constant 0 : index
      %c0_96 = arith.constant 0 : index
      %171 = vector.load %arg10[%c0_95, %c0_96] : memref<256x128xf32, #tpu.memory_space<vmem>>, vector<256x128xf32>
      tpu.vector_store %arg10[%c0_95, %c0_96], %170 {strides = array<i32>} : memref<256x128xf32, #tpu.memory_space<vmem>>, vector<256x128xf32>,
    } else {
    }
    %c1_i32_93 = arith.constant 1 : i32
    %162 = arith.cmpi eq, %arg1, %c1_i32_93 : i32
    %163 = arith.extui %162 : i1 to i32
    %c0_i32_94 = arith.constant 0 : i32
    %164 = arith.cmpi ne, %163, %c0_i32_94 : i32
    scf.if %164 {
      %165 = vector.broadcast %156 : vector<1x128xf32> to vector<256x128xf32>
      %166 = arith.mulf %154, %165 : vector<256x128xf32>
      %167 = vector.broadcast %158 : vector<1x128xf32> to vector<256x128xf32>
      %168 = arith.addf %166, %167 : vector<256x128xf32>
      %169 = arith.addf %168, %14 : vector<256x128xf32>
      %c0_95 = arith.constant 0 : index
      %c0_96 = arith.constant 0 : index
      %c0_97 = arith.constant 0 : index
      %170 = vector.load %arg9[%c0_95, %c0_96, %c0_97] : memref<1x256x128xf32, #tpu.memory_space<vmem>>, vector<1x256x128xf32>
      %171 = vector.shape_cast %170 : vector<1x256x128xf32> to vector<256x128xf32>
      %172 = vector.shape_cast %169 : vector<256x128xf32> to vector<1x256x128xf32>
      tpu.vector_store %arg9[%c0_95, %c0_96, %c0_97], %172 {strides = array<i32>} : memref<1x256x128xf32, #tpu.memory_space<vmem>>, vector<1x256x128xf32>,
    } else {
    }
    return
  }
  func.func @transform_0(%arg0: i32, %arg1: i32) -> (i32, i32, i32) {
    %c0_i32 = arith.constant 0 : i32
    %c0_i32_0 = arith.constant 0 : i32
    %c0_i32_1 = arith.constant 0 : i32
    return %arg0, %c0_i32, %c0_i32_0 : i32, i32, i32
  }
  func.func @transform_1(%arg0: i32, %arg1: i32) -> (i32, i32, i32) {
    %c0_i32 = arith.constant 0 : i32
    %c0_i32_0 = arith.constant 0 : i32
    %c0_i32_1 = arith.constant 0 : i32
    return %arg1, %c0_i32, %c0_i32_0 : i32, i32, i32
  }
  func.func @transform_2(%arg0: i32, %arg1: i32) -> (i32, i32, i32) {
    %c0_i32 = arith.constant 0 : i32
    %c0_i32_0 = arith.constant 0 : i32
    %c0_i32_1 = arith.constant 0 : i32
    return %arg1, %c0_i32, %c0_i32_0 : i32, i32, i32
  }
  func.func @transform_3(%arg0: i32, %arg1: i32) -> (i32, i32, i32) {
    %c0_i32 = arith.constant 0 : i32
    %c0_i32_0 = arith.constant 0 : i32
    %c0_i32_1 = arith.constant 0 : i32
    return %arg1, %c0_i32, %c0_i32_0 : i32, i32, i32
  }
  func.func @transform_4(%arg0: i32, %arg1: i32) -> (i32, i32, i32) {
    %c0_i32 = arith.constant 0 : i32
    %c0_i32_0 = arith.constant 0 : i32
    %c0_i32_1 = arith.constant 0 : i32
    return %arg1, %c0_i32, %c0_i32_0 : i32, i32, i32
  }
  func.func @transform_5(%arg0: i32, %arg1: i32) -> (i32, i32, i32) {
    %c0_i32 = arith.constant 0 : i32
    %c0_i32_0 = arith.constant 0 : i32
    %c0_i32_1 = arith.constant 0 : i32
    return %arg1, %c0_i32, %c0_i32_0 : i32, i32, i32
  }
  func.func @transform_6(%arg0: i32, %arg1: i32) -> (i32, i32, i32) {
    %c0_i32 = arith.constant 0 : i32
    %c0_i32_0 = arith.constant 0 : i32
    %c0_i32_1 = arith.constant 0 : i32
    return %arg1, %c0_i32, %c0_i32_0 : i32, i32, i32
  }
  func.func @transform_7(%arg0: i32, %arg1: i32) -> (i32, i32, i32) {
    %c0_i32 = arith.constant 0 : i32
    %c0_i32_0 = arith.constant 0 : i32
    %c0_i32_1 = arith.constant 0 : i32
    return %arg0, %c0_i32, %c0_i32_0 : i32, i32, i32
  }
}

</mosaic_0001>

<bundles_post_ra>
// kernel: basic_block_forward.1
= control target key start
LH: loop header
LB: loop body
LE: loop exit
PB: predicated region body
PF: predicated region fallthrough
CT: control target
= control target key end

     0   :  { %s8622_s0 = inlined_call_operand.hbm [shape: f32[2,256,128], index: 0, kind: input, shape index: {}]   ;;  %s8623_s1 = inlined_call_operand.hbm [shape: bf16[2,1152,128], index: 1, kind: input, shape index: {}]   ;;  %s8624_s2 = inlined_call_operand.vmem [shape: f32[2,9,128], index: 2, kind: input, shape index: {}]   ;;  %s8625_s3 = inlined_call_operand.vmem [shape: f32[2,128,16], index: 3, kind: input, shape index: {}]   ;;  %s8626_s4 = inlined_call_operand.vmem [shape: f32[2,1,16], index: 4, kind: input, shape index: {}]   ;;  %s8627_s5 = inlined_call_operand.vmem [shape: f32[2,16,128], index: 5, kind: input, shape index: {}]   ;;  %s8628_s6 = inlined_call_operand.vmem [shape: f32[2,1,128], index: 6, kind: input, shape index: {}]   ;;  %s8629_s7 = inlined_call_operand.hbm [shape: f32[2,256,128], index: 7, kind: output, shape index: {}]  }
   0x1   :  { %8739 = sst [smem:[#allocation56_spill]] %s8622_s0 }
   0x2   :  { %8740 = sst [smem:[#allocation57_spill]] %s8623_s1 }
   0x3   :  { %8741 = sst [smem:[#allocation58_spill]] %s8629_s7 }
   0x4   :  { %12 = vsyncpa [#allocation6], 0 }
   0x5   :  { %14 = vsyncpa [#allocation6 + $0x1], 0 }
   0x6   :  { %15 = vsyncpa [#allocation9], 0 }
   0x7   :  { %17 = vsyncpa [#allocation9 + $0x1], 0 }
   0x8   :  { %18 = vsyncpa [#allocation7], 0 }
   0x9   :  { %20 = vsyncpa [#allocation7 + $0x1], 0  ;;  %s6143_s24 = smov 0   ;;  %s6145_s25 = smov 0  }
   0xa   :  { %s6147_s26 = smov 0   ;;  %s6149_s27 = smov 0  }
   0xb   :  { %s6151_s28 = smov 0   ;;  %s6153_s29 = smov 0  }
   0xc   :  { %s6155_s30 = smov 0   ;;  %s6157_s8 = smov 0  }
   0xd   :  { %s6159_s9 = smov 0   ;;  %s6161_s10 = smov 0  }
   0xe   :  { %s6163_s11 = smov 0  }
   0xf LB: > { %8742 = sst [smem:[#allocation14_spill]] %s6059_s27  ;;  %s4824_s12 = sadd.s32 4294967295, %s6087_s11   ;;  %s6087_s11 = sphi %s6163_s11, %s26_s11   ;;  %s6083_s10 = sphi %s6161_s10, %s9033_s10   ;;  %s6079_s9 = sphi %s6159_s9, %s9032_s9   ;;  %s6075_s8 = sphi %s6157_s8, %s9031_s8   ;;  %s6071_s30 = sphi %s6155_s30, %s9030_s30   ;;  %s6067_s29 = sphi %s6153_s29, %s9029_s29   ;;  %s6063_s28 = sphi %s6151_s28, %s9028_s28   ;;  %s6059_s27 = sphi %s6149_s27, %s9027_s27   ;;  %s6055_s26 = sphi %s6147_s26, %s9036_s26   ;;  %s6051_s25 = sphi %s6145_s25, %s9035_s25   ;;  %s6047_s24 = sphi %s6143_s24, %s9034_s24  }
  0x10   : > { %8743 = sst [smem:[#allocation15_spill]] %s6063_s28  ;;  %s4825_s13 = sadd.s32 4294967294, %s6087_s11  }
  0x11   : > { %8744 = sst [smem:[#allocation16_spill]] %s6067_s29  ;;  %p52_p0 = scmp.ne.s32.totalorder %s6067_s29, %s6063_s28 }
  0x12   : > { %8745 = sst [smem:[#allocation17_spill]] %s6079_s9  ;;  %p8634_p1 = scmp.eq.s32.totalorder %s6087_s11, 0 }
  0x13   : > { %8746 = sst [smem:[#allocation18_spill]] %s6083_s10  ;;  %p58_p2 = scmp.ne.s32.totalorder %s6063_s28, %s6059_s27 }
  0x14   : > { %p6207_p3 = scmp.eq.s32.totalorder %s4824_s12, 0  ;;  %p6213_p4 = por %p8634_p1, %p52_p0 }
  0x15   : > { %p238_p5 = scmp.eq.s32.totalorder %s4824_s12, 3  ;;  %p244_p7 = scmp.eq.s32.totalorder %s4825_s13, 3 }
  0x16   : > { %p6219_p6 = por %p6207_p3, %p58_p2  ;;  %p8633_p10 = scmp.lt.s32.totalorder %s6087_s11, 4 }
  0x17   : > { %p6223_p8 = por %p238_p5, %p52_p0  ;;  %p6227_p9 = por %p244_p7, %p58_p2 }
  0x18   : > { %s8749_s18 = scalar_select %p6219_p6, 1, 0 }
  0x19   : > { %s8750_s19 = scalar_select %p6223_p8, 1, 0 }
  0x1a   : > { %s8752_s20 = scalar_select %p6227_p9, 1, 0 }
  0x1b   : > { %8751 = sst [smem:[#allocation19_spill]] %s8750_s19  ;;  %s264_s21 = sand.u32 1, %s6067_s29  }
  0x1c   : > { %8753 = sst [smem:[#allocation20_spill]] %s8752_s20  ;;  %s4959_s22 = sshll.u32 %s6083_s10, 12 }
  0x1d   : > { %s4828_s23 = sshll.u32 %s264_s21, 8  ;;  %s8754_s0 = sld [smem:[#allocation56_spill]] }
  0x1e   : > { %s268_s13 = scalar_lea.vmem [#allocation5], %s4828_s23  ;;  %p6243_p11 = pnand %p8633_p10, %p6213_p4 }
  0x1f   : > { %s275_s27 = sshll.u32 %s268_s13, 4  ;;  %s6249_s20 = scalar_lea.sflag [#allocation6], %s264_s21  ;;  %s6247_s27 = int_to_ptr.vmem [resolvable:$true] %s275_s27 }
  0x20   : > { %p5903_p13 = pneg %p6243_p11 }
  0x23   : > { %s6237_s14 = scalar_lea.hbm %s8754_s0, %s4959_s22  ;;  %s5906_s23 = scalar_lea.hbm %s8754_s0, 8192 }
  0x24   : > { %s5901_s15 = scalar_lea.hbm %s6237_s14, 4096  ;;  %p5907_p4 = scmp.lt.u32.totalorder %s6237_s14, %s8754_s0 }
  0x25   : > { %p5902_p12 = scmp.ne.s32.totalorder %s6237_s14, %s5901_s15  ;;  %p5908_p5 = scmp.lt.u32.totalorder %s5906_s23, %s5901_s15 }
  0x26   : > { %p5910_p10 = scmp.lt.u32.totalorder %s5901_s15, %s6237_s14 }
  0x27   : > { %p5904_p0 = pnand %p5903_p13, %p5902_p12  ;;  %p5909_p7 = por %p5908_p5, %p5907_p4 }
  0x29   : > { %p5905_p2 = pneg %p5904_p0  ;;  %p5911_p1 = por %p5910_p10, %p5909_p7 }
  0x2b   : > { %p5912_p9 = pnand %p5911_p1, %p5905_p2 }
  0x2d   : > { %5915 = shalt.err (!%p5912_p9)
}
  0x2e   : > { %s5916_s21 = scalar_lea.vmem %s6247_s27, 4096  ;;  %s6089_s17 = smov [#allocation5]  }
  0x2f   : > { %p5917_p12 = scmp.ne.s32.totalorder %s6247_s27, %s5916_s21  ;;  %s5921_s22 = sshll.u32 %s6089_s17, 4  ;;  %s5922_s22 = int_to_ptr.vmem [resolvable:$false] %s5921_s22 }
  0x30   : > { %s5923_s12 = scalar_lea.vmem %s5922_s22, 8192  ;;  %p5924_p6 = scmp.lt.s32.totalorder %s6247_s27, %s5922_s22 }
  0x31   : > { %p5919_p0 = pnand %p5917_p12, %p5903_p13  ;;  %p5925_p4 = scmp.lt.s32.totalorder %s5923_s12, %s5916_s21 }
  0x33   : > { %p5920_p8 = pneg %p5919_p0  ;;  %p5926_p5 = por %p5925_p4, %p5924_p6 }
  0x35   : > { %p5927_p10 = pnand %p5926_p5, %p5920_p8 }
  0x37   : > { %5930 = shalt.err (!%p5927_p10)
}
  0x38   : > { %s6090_s15 = smov 128   ;;  %s6091_s23 = smov 8  }
  0x39   : > { %5681 = dma.hbm_to_vmem [thread:$0]  (!%p6243_p11), %s6237_s14, 4096, %s6247_s27, %s6249_s20, %s6090_s15, %s6090_s15, %s6091_s23  }
  0x3a   : > { %p4832_p1 = scmp.ge.s32.totalorder %s6087_s11, 1  ;;  %p340_p6 = scmp.lt.s32.totalorder %s6087_s11, 5 }
  0x3b   : > { %s35_s21 = sadd.s32 1, %s6079_s9  ;;  %s71_s17 = sadd.s32 1, %s6055_s26 }
  0x3c   : > { %p6279_p8 = pnand %p4832_p1, %p340_p6  ;;  %p36_p9 = scmp.ge.s32.totalorder %s35_s21, 2 }
  0x3d   : > { %p78_p13 = scmp.ne.s32.totalorder %s6055_s26, %s6051_s25  ;;  %p84_p2 = scmp.ne.s32.totalorder %s6051_s25, %s6047_s24 }
  0x3e   : > { %s9038_s21 = smov (%p36_p9, %s35_s21), 0  ;;  %s8758_s7 = sadd.s32 1, %s6083_s10 }
  0x3f   : > { %8757 = sst [smem:[#allocation21_spill]] %s9038_s21  ;;  %s9040_s7 = smov (!%p36_p9, %s8758_s7), %s6083_s10 }
  0x40   : > { %s68_s27 = ssub.s32 %s6079_s9, %s9038_s21  ;;  %p8759_p11 = scmp.eq.s32.totalorder %s6087_s11, 0 }
  0x41   : > { %p40_p12 = scmp.ge.s32.totalorder %s9040_s7, 2  ;;  %p69_p0 = scmp.eq.s32.totalorder %s68_s27, 0 }
  0x42   : > { %p80_p7 = por %p78_p13, %p8759_p11  ;;  %p6300_p4 = por %p84_p2, %p6207_p3 }
  0x43   : > { %s285_s20 = sand.u32 1, %s6055_s26   ;;  %s9042_s7 = smov (%p40_p12, %s9040_s7), 0 }
  0x44   : > { %s8760_s14 = scalar_select %p6300_p4, 1, 0 }
  0x45   : > { %8761 = sst [smem:[#allocation22_spill]] %s9042_s7  ;;  %s42_s22 = ssub.s32 %s6083_s10, %s9042_s7 }
  0x46   : > { %s6308_s24 = scalar_select %p69_p0, %s6055_s26, %s71_s17  }
  0x47   : > { %p43_p5 = scmp.eq.s32.totalorder %s42_s22, 0  ;;  %s5669_s12 = smul.u32 576, %s285_s20 }
  0x48   : > { %8762 = sst [smem:[#allocation23_spill]] %s6308_s24  ;;  %s5670_s15 = smul.u32 9216, %s6079_s9 }
  0x49   : > { %p8763_p10 = scmp.lt.s32.totalorder %s6087_s11, 4  ;;  %s8765_s16 = sadd.s32 1, %s6067_s29 }
  0x4a   : > { %s6322_s27 = scalar_select %p43_p5, %s6067_s29, %s8765_s16  }
  0x4b   : > { %p6315_p1 = pnand %p8763_p10, %p80_p7  ;;  %s8767_s1 = sld [smem:[#allocation57_spill]] }
  0x4c   : > { %8766 = sst [smem:[#allocation24_spill]] %s6322_s27  ;;  %s289_s17 = scalar_lea.vmem [#allocation8], %s5669_s12 }
  0x4d   : > { %s296_s22 = sshll.u32 %s289_s17, 4  ;;  %s6331_s7 = scalar_lea.sflag [#allocation9], %s285_s20  ;;  %s6329_s22 = int_to_ptr.vmem [resolvable:$true] %s296_s22 }
  0x4e   : > { %p5933_p6 = pneg %p6315_p1 }
  0x51   : > { %s6327_s19 = scalar_lea.hbm %s8767_s1, %s5670_s15  ;;  %s5936_s15 = scalar_lea.hbm %s8767_s1, 18432 }
  0x52   : > { %s5931_s10 = scalar_lea.hbm %s6327_s19, 9216  ;;  %p5937_p2 = scmp.lt.u32.totalorder %s6327_s19, %s8767_s1 }
  0x53   : > { %p5932_p3 = scmp.ne.s32.totalorder %s6327_s19, %s5931_s10  ;;  %p5938_p11 = scmp.lt.u32.totalorder %s5936_s15, %s5931_s10 }
  0x54   : > { %p5940_p12 = scmp.lt.u32.totalorder %s5931_s10, %s6327_s19 }
  0x55   : > { %p5934_p9 = pnand %p5933_p6, %p5932_p3  ;;  %p5939_p7 = por %p5938_p11, %p5937_p2 }
  0x57   : > { %p5935_p13 = pneg %p5934_p9  ;;  %p5941_p0 = por %p5940_p12, %p5939_p7 }
  0x59   : > { %p5942_p5 = pnand %p5941_p0, %p5935_p13 }
  0x5b   : > { %5945 = shalt.err (!%p5942_p5)
}
  0x5c   : > { %s5946_s20 = scalar_lea.vmem %s6329_s22, 9216  ;;  %s6092_s12 = smov [#allocation8]  }
  0x5d   : > { %p5947_p10 = scmp.ne.s32.totalorder %s6329_s22, %s5946_s20  ;;  %s5951_s17 = sshll.u32 %s6092_s12, 4  ;;  %s5952_s17 = int_to_ptr.vmem [resolvable:$false] %s5951_s17 }
  0x5e   : > { %s5953_s9 = scalar_lea.vmem %s5952_s17, 18432  ;;  %p5954_p4 = scmp.lt.s32.totalorder %s6329_s22, %s5952_s17 }
  0x5f   : > { %p5949_p3 = pnand %p5947_p10, %p5933_p6  ;;  %p5955_p2 = scmp.lt.s32.totalorder %s5953_s9, %s5946_s20 }
  0x61   : > { %p5950_p9 = pneg %p5949_p3  ;;  %p5956_p11 = por %p5955_p2, %p5954_p4 }
  0x63   : > { %p5957_p7 = pnand %p5956_p11, %p5950_p9 }
  0x65   : > { %5960 = shalt.err (!%p5957_p7)
}
  0x66   : > { %s6093_s10 = smov 64   ;;  %s6094_s0 = smov 4  }
  0x67   : > { %5684 = dma.hbm_to_vmem [thread:$0]  (!%p6315_p1), %s6327_s19, 9216, %s6329_s22, %s6331_s7, %s6093_s10, %s6093_s10, %s6094_s0  }
  0x68   : > { %344 = sbr.rel (%p6279_p8) target bundleno = 1304 (0x518), region = 48 }
  0x6f   : > { %s6362_s21 = sand.u32 1, %s6063_s28   ;;  %p8768_p4 = scmp.ne.s32.totalorder %s8749_s18, 0 }
  0x70   : > { %s4833_s15 = sshll.u32 %s6362_s21, 8  ;;  %s347_s16 = scalar_lea.sflag [#allocation6], %s6362_s21 }
  0x71   : > { %s6366_s20 = scalar_lea.vmem [#allocation5], %s4833_s15 }
  0x72   : > { %6034 = dma.done.wait (%p8768_p4), %s347_s16, 4096  }
  0x73   : > { %6036 = vsyncadd (%p8768_p4), %s347_s16, 4294963200  ;;  %s355_s19 = sand.u32 1, %s6051_s25   ;;  %p8769_p8 = scmp.ne.s32.totalorder %s8760_s14, 0 }
  0x74   : > { %s5671_s13 = smul.u32 576, %s355_s19  ;;  %s356_s7 = scalar_lea.sflag [#allocation9], %s355_s19 }
  0x76   : > { %s6373_s23 = scalar_lea.vmem [#allocation8], %s5671_s13 }
  0x77   : > { %6038 = dma.done.wait (%p8769_p8), %s356_s7, 9216  }
  0x78   : > { %6040 = vsyncadd (%p8769_p8), %s356_s7, 4294958080  ;;  %p416_p1 = scmp.lt.s32.totalorder %s6071_s30, 1  ;;  %s6408_s9 = scalar_lea.vmem [#allocation10], %s4833_s15 }
  0x79   : > { %p4841_p6 = scmp.ne.s32.totalorder %s6071_s30, 0 }
  0x7a   : > { %s6381_s22 = scalar_select %p416_p1, %s6071_s30, 1 }
  0x7b   : > { %443 = sbr.rel (%p4841_p6) target bundleno = 140 (0x8c), region = 60  ;;  %v444_v0 = vld [vmem:[%s6366_s20] sm:$0xff] (!%p4841_p6)  ;;  %v445_v1 = vld [vmem:[%s6366_s20 + $0x8] sm:$0xff] (!%p4841_p6)  ;;  %v446_v2 = vld [vmem:[%s6366_s20 + $0x10] sm:$0xff] (!%p4841_p6) }
  0x7c   : > { %s4960_s18 = sshll.u32 %s6381_s22, 4  ;;  %s4961_s12 = sshll.u32 %s6381_s22, 7  ;;  %476 = vst [vmem:[#allocation2] sm:$0xff] (!%p4841_p6), %v444_v0  ;;  %477 = vst [vmem:[#allocation2 + $0x8] sm:$0xff] (!%p4841_p6), %v445_v1  ;;  %v447_v3 = vld [vmem:[%s6366_s20 + $0x18] sm:$0xff] (!%p4841_p6)  ;;  %v448_v4 = vld [vmem:[%s6366_s20 + $0x20] sm:$0xff] (!%p4841_p6) }
  0x7d   : > { %s6388_s10 = scalar_lea.vmem %s8624_s2, %s4960_s18  ;;  %s6393_s14 = scalar_lea.vmem %s8625_s3, %s4961_s12  ;;  %478 = vst [vmem:[#allocation2 + $0x10] sm:$0xff] (!%p4841_p6), %v446_v2  ;;  %v449_v5 = vld [vmem:[%s6366_s20 + $0x28] sm:$0xff] (!%p4841_p6)  ;;  %479 = vst [vmem:[#allocation2 + $0x18] sm:$0xff] (!%p4841_p6), %v447_v3  ;;  %v450_v6 = vld [vmem:[%s6366_s20 + $0x30] sm:$0xff] (!%p4841_p6) }
  0x7e   : > { %s428_s7 = scalar_lea.vmem %s8626_s4, %s6381_s22  ;;  %s6402_s29 = scalar_lea.vmem %s8627_s5, %s4960_s18  ;;  %480 = vst [vmem:[#allocation2 + $0x20] sm:$0xff] (!%p4841_p6), %v448_v4  ;;  %481 = vst [vmem:[#allocation2 + $0x28] sm:$0xff] (!%p4841_p6), %v449_v5  ;;  %v451_v7 = vld [vmem:[%s6366_s20 + $0x38] sm:$0xff] (!%p4841_p6)  ;;  %v452_v8 = vld [vmem:[%s6366_s20 + $0x40] sm:$0xff] (!%p4841_p6) }
  0x7f   : > { %s436_s17 = scalar_lea.vmem %s8628_s6, %s6381_s22  ;;  %482 = vst [vmem:[#allocation2 + $0x30] sm:$0xff] (!%p4841_p6), %v450_v6  ;;  %483 = vst [vmem:[#allocation2 + $0x38] sm:$0xff] (!%p4841_p6), %v451_v7  ;;  %v453_v9 = vld [vmem:[%s6366_s20 + $0x48] sm:$0xff] (!%p4841_p6)  ;;  %v454_v10 = vld [vmem:[%s6366_s20 + $0x50] sm:$0xff] (!%p4841_p6) }
  0x80   : > { %484 = vst [vmem:[#allocation2 + $0x40] sm:$0xff] (!%p4841_p6), %v452_v8  ;;  %v455_v11 = vld [vmem:[%s6366_s20 + $0x58] sm:$0xff] (!%p4841_p6)  ;;  %485 = vst [vmem:[#allocation2 + $0x48] sm:$0xff] (!%p4841_p6), %v453_v9  ;;  %v456_v12 = vld [vmem:[%s6366_s20 + $0x60] sm:$0xff] (!%p4841_p6) }
  0x81   : > { %486 = vst [vmem:[#allocation2 + $0x50] sm:$0xff] (!%p4841_p6), %v454_v10  ;;  %487 = vst [vmem:[#allocation2 + $0x58] sm:$0xff] (!%p4841_p6), %v455_v11  ;;  %v457_v13 = vld [vmem:[%s6366_s20 + $0x68] sm:$0xff] (!%p4841_p6)  ;;  %v458_v14 = vld [vmem:[%s6366_s20 + $0x70] sm:$0xff] (!%p4841_p6) }
  0x82   : > { %488 = vst [vmem:[#allocation2 + $0x60] sm:$0xff] %v456_v12  ;;  %489 = vst [vmem:[#allocation2 + $0x68] sm:$0xff] %v457_v13  ;;  %v459_v15 = vld [vmem:[%s6366_s20 + $0x78] sm:$0xff]  ;;  %v460_v16 = vld [vmem:[%s6366_s20 + $0x80] sm:$0xff] }
  0x83   : > { %490 = vst [vmem:[#allocation2 + $0x70] sm:$0xff] %v458_v14  ;;  %v461_v17 = vld [vmem:[%s6366_s20 + $0x88] sm:$0xff]  ;;  %491 = vst [vmem:[#allocation2 + $0x78] sm:$0xff] %v459_v15  ;;  %v462_v18 = vld [vmem:[%s6366_s20 + $0x90] sm:$0xff] }
  0x84   : > { %492 = vst [vmem:[#allocation2 + $0x80] sm:$0xff] %v460_v16  ;;  %493 = vst [vmem:[#allocation2 + $0x88] sm:$0xff] %v461_v17  ;;  %v463_v19 = vld [vmem:[%s6366_s20 + $0x98] sm:$0xff]  ;;  %v464_v20 = vld [vmem:[%s6366_s20 + $0xa0] sm:$0xff] }
  0x85   : > { %494 = vst [vmem:[#allocation2 + $0x90] sm:$0xff] %v462_v18  ;;  %495 = vst [vmem:[#allocation2 + $0x98] sm:$0xff] %v463_v19  ;;  %v465_v21 = vld [vmem:[%s6366_s20 + $0xa8] sm:$0xff]  ;;  %v466_v22 = vld [vmem:[%s6366_s20 + $0xb0] sm:$0xff] }
  0x86   : > { %496 = vst [vmem:[#allocation2 + $0xa0] sm:$0xff] %v464_v20  ;;  %v467_v23 = vld [vmem:[%s6366_s20 + $0xb8] sm:$0xff]  ;;  %497 = vst [vmem:[#allocation2 + $0xa8] sm:$0xff] %v465_v21  ;;  %v468_v24 = vld [vmem:[%s6366_s20 + $0xc0] sm:$0xff] }
  0x87   : > { %498 = vst [vmem:[#allocation2 + $0xb0] sm:$0xff] %v466_v22  ;;  %499 = vst [vmem:[#allocation2 + $0xb8] sm:$0xff] %v467_v23  ;;  %v469_v25 = vld [vmem:[%s6366_s20 + $0xc8] sm:$0xff]  ;;  %v470_v26 = vld [vmem:[%s6366_s20 + $0xd0] sm:$0xff] }
  0x88   : > { %500 = vst [vmem:[#allocation2 + $0xc0] sm:$0xff] %v468_v24  ;;  %501 = vst [vmem:[#allocation2 + $0xc8] sm:$0xff] %v469_v25  ;;  %v471_v27 = vld [vmem:[%s6366_s20 + $0xd8] sm:$0xff]  ;;  %v472_v28 = vld [vmem:[%s6366_s20 + $0xe0] sm:$0xff] }
  0x89   : > { %502 = vst [vmem:[#allocation2 + $0xd0] sm:$0xff] %v470_v26  ;;  %v473_v29 = vld [vmem:[%s6366_s20 + $0xe8] sm:$0xff]  ;;  %503 = vst [vmem:[#allocation2 + $0xd8] sm:$0xff] %v471_v27  ;;  %v474_v30 = vld [vmem:[%s6366_s20 + $0xf0] sm:$0xff] }
  0x8a   : > { %504 = vst [vmem:[#allocation2 + $0xe0] sm:$0xff] %v472_v28  ;;  %505 = vst [vmem:[#allocation2 + $0xe8] sm:$0xff] %v473_v29  ;;  %v475_v31 = vld [vmem:[%s6366_s20 + $0xf8] sm:$0xff] }
  0x8b   : > { %506 = vst [vmem:[#allocation2 + $0xf0] sm:$0xff] %v474_v30  ;;  %507 = vst [vmem:[#allocation2 + $0xf8] sm:$0xff] %v475_v31 }
  0x8c PF: > { %v5790_v32 = vld [vmem:[%s6373_s23 + $0x40] sm:$0xff]   ;;  %v6095_v34 = vmov 0.0   ;;  %v8654_v37 = vmov 0.0|0.0   ;;  %v5794_v38 = vld [vmem:[%s6373_s23 + $0x48] sm:$0xff]   ;;  %v844_v40 = vlaneseq  ;;  %v5798_v43 = vld [vmem:[%s6373_s23 + $0x50] sm:$0xff]   ;;  %vm6097_vm8 = vmmov 1  }
  0x8d   : > { %v5791_v33 = vld [vmem:[%s6373_s23 + $0xc0] sm:$0xff]   ;;  %541 = vst [vmem:[#allocation3 + $0x8] sm:$0xff] %v6095_v34  ;;  %542 = vst [vmem:[#allocation3 + $0x10] sm:$0xff] %v6095_v34  ;;  %5060 = vmatprep.subr.bf16.mxu0 %v5790_v32  ;;  %3101 = vmatprep.mubr.bf16.mxu0 %v8654_v37  ;;  %v5795_v39 = vld [vmem:[%s6373_s23 + $0xc8] sm:$0xff]  }
  0x8e   : > { %540 = vst [vmem:[#allocation3] sm:$0xff] %v6095_v34  ;;  %543 = vst [vmem:[#allocation3 + $0x118] sm:$0xff] %v6095_v34  ;;  %v5792_v35 = vld [vmem:[%s6373_s23] sm:$0xff]   ;;  %5172 = vmatprep.subr.bf16.mxu1 %v5791_v33  ;;  %v5796_v41 = vld [vmem:[%s6373_s23 + $0x8] sm:$0xff]   ;;  %v6462_v45 = vshrl.u32 %v844_v40, 7  ;;  %v8664_v40 = vmov 0  }
  0x8f   : > { %544 = vst [vmem:[#allocation3 + $0x120] sm:$0xff] %v6095_v34  ;;  %545 = vst [vmem:[#allocation3 + $0x128] sm:$0xff] %v6095_v34  ;;  %v5793_v36 = vld [vmem:[%s6373_s23 + $0x80] sm:$0xff]   ;;  %5061 = vmatpush3.bf16.msra.mxu0 %v5792_v35  ;;  %v5797_v42 = vld [vmem:[%s6373_s23 + $0x88] sm:$0xff]  }
  0x90   : > { %5173 = vmatpush3.bf16.msra.mxu1 %v5793_v36  ;;  %5062 = vmatprep.subr.bf16.mxu0 %v5794_v38  ;;  %v5799_v44 = vld [vmem:[%s6373_s23 + $0xd0] sm:$0xff]   ;;  %8770 = vst [vmem:[#allocation25_spill] sm:$0xff] %v6462_v45  ;;  %v5802_v48 = vld [vmem:[%s6373_s23 + $0x58] sm:$0xff]   ;;  %v846_v50 = vadd.s32 8, %v6462_v45  ;;  %v881_v53 = vand.u32 15, %v6462_v45  ;;  %v5806_v54 = vld [vmem:[%s6373_s23 + $0x60] sm:$0xff]  }
  0x91   : > { %5174 = vmatprep.subr.bf16.mxu1 %v5795_v39  ;;  %v5800_v46 = vld [vmem:[%s6373_s23 + $0x10] sm:$0xff]   ;;  %v5803_v49 = vld [vmem:[%s6373_s23 + $0xd8] sm:$0xff]   ;;  %v847_v55 = vadd.s32 16, %v6462_v45  ;;  %v5807_v56 = vld [vmem:[%s6373_s23 + $0xe0] sm:$0xff]   ;;  %v848_v59 = vadd.s32 24, %v6462_v45  ;;  %v849_v61 = vadd.s32 32, %v6462_v45 }
  0x92   : > { %v5801_v47 = vld [vmem:[%s6373_s23 + $0x90] sm:$0xff]   ;;  %v5804_v51 = vld [vmem:[%s6373_s23 + $0x18] sm:$0xff]   ;;  %v888_v57 = vand.u32 15, %v846_v50  ;;  %v5808_v58 = vld [vmem:[%s6373_s23 + $0x20] sm:$0xff]   ;;  %v850_v1 = vadd.s32 40, %v6462_v45  ;;  %vm6483_vm0 = vcmp.gt.s32.totalorder %v881_v53, 0 }
  0x93   : > { %5063 = vmatpush3.bf16.msra.mxu0 %v5796_v41  ;;  %v5805_v52 = vld [vmem:[%s6373_s23 + $0x98] sm:$0xff]   ;;  %v5809_v60 = vld [vmem:[%s6373_s23 + $0xa0] sm:$0xff]   ;;  %v5810_v62 = vld [vmem:[%s6373_s23 + $0x68] sm:$0xff]   ;;  %v895_v63 = vand.u32 15, %v847_v55  ;;  %v902_v4 = vand.u32 15, %v848_v59  ;;  %v909_v6 = vand.u32 15, %v849_v61 }
  0x94   : > { %5175 = vmatpush3.bf16.msra.mxu1 %v5797_v42  ;;  %5064 = vmatprep.subr.bf16.mxu0 %v5798_v43  ;;  %v5811_v0 = vld [vmem:[%s6373_s23 + $0xe8] sm:$0xff]   ;;  %v5814_v7 = vld [vmem:[%s6373_s23 + $0x70] sm:$0xff]   ;;  %vm6489_vm1 = vcmp.lt.s32.totalorder %v888_v57, 15  ;;  %v6494_v9 = vadd.s32 48, %v6462_v45  ;;  %v916_v12 = vand.u32 15, %v850_v1  ;;  %v6503_v14 = vadd.s32 56, %v6462_v45  ;;  %vm1437_vm6 = vmpackc.low %vm6483_vm0, %vm6483_vm0 }
  0x95   : > { %5176 = vmatprep.subr.bf16.mxu1 %v5799_v44  ;;  %v5812_v2 = vld [vmem:[%s6373_s23 + $0x28] sm:$0xff]   ;;  %v5815_v10 = vld [vmem:[%s6373_s23 + $0xf0] sm:$0xff]   ;;  %vm6497_vm2 = vcmp.gt.s32.totalorder %v895_v63, 0  ;;  %vm6506_vm3 = vcmp.lt.s32.totalorder %v902_v4, 15  ;;  %v6511_v17 = vadd.s32 64, %v6462_v45  ;;  %v5818_v18 = vld [vmem:[%s6373_s23 + $0x78] sm:$0xff]  }
  0x96   : > { %v5813_v5 = vld [vmem:[%s6373_s23 + $0xa8] sm:$0xff]   ;;  %v5816_v13 = vld [vmem:[%s6373_s23 + $0x30] sm:$0xff]   ;;  %v923_v19 = vand.u32 15, %v6494_v9  ;;  %v5819_v20 = vld [vmem:[%s6373_s23 + $0xf8] sm:$0xff]   ;;  %v6517_v21 = vadd.s32 72, %v6462_v45  ;;  %v930_v23 = vand.u32 15, %v6503_v14 }
  0x97   : > { %5065 = vmatpush3.bf16.msra.mxu0 %v5800_v46  ;;  %v5817_v15 = vld [vmem:[%s6373_s23 + $0xb0] sm:$0xff]   ;;  %v5820_v22 = vld [vmem:[%s6373_s23 + $0x38] sm:$0xff]   ;;  %v937_v25 = vand.u32 15, %v6511_v17  ;;  %v6528_v30 = vadd.s32 80, %v6462_v45  ;;  %vm6538_vm7 = vcmp.gt.s32.totalorder %v909_v6, 0  ;;  %vm1438_vm9 = vmpackc.low %vm6097_vm8, %vm6097_vm8  ;;  %v1469_v41 = vsel %vm1437_vm6, 65537, %v8664_v40 }
  0x98   : > { %5177 = vmatpush3.bf16.msra.mxu1 %v5801_v47  ;;  %5066 = vmatprep.subr.bf16.mxu0 %v5802_v48  ;;  %v5821_v24 = vld [vmem:[%s6373_s23 + $0xb8] sm:$0xff]   ;;  %v508_v26 = vld [vmem:[#allocation2] sm:$0xff]  ;;  %v944_v29 = vand.u32 15, %v6517_v21  ;;  %vm6545_vm10 = vcmp.lt.s32.totalorder %v916_v12, 15  ;;  %v6550_v44 = vadd.s32 88, %v6462_v45  ;;  %v6559_v48 = vsel %vm1438_vm9, 65537, %v8664_v40  ;;  %vm1774_vm11 = vmpackc.low %vm6489_vm1, %vm6489_vm1 }
  0x99   : > { %5178 = vmatprep.subr.bf16.mxu1 %v5803_v49  ;;  %v509_v27 = vld [vmem:[#allocation2 + $0x8] sm:$0xff]  ;;  %v6524_v28 = vld [vmem:[%s6388_s10 + $0x1] ss:$0 sm:$0xff]  ;;  %vm547_vm4 = vcmp.ge.f32.partialorder %v508_v26, 0.0  ;;  %v6533_v33 = vld [vmem:[%s6388_s10] ss:$0 sm:$0xff] }
  0x9a   : > { %vm548_vm5 = vcmp.ge.f32.partialorder %v509_v27, 0.0  ;;  %v583_v31 = vmul.f32 %v6524_v28, %v508_v26  ;;  %v584_v32 = vmul.f32 %v6524_v28, %v509_v27  ;;  %v1325_v35 = vld [vmem:[#allocation3 + $0x7] sm:$0xff]  ;;  %v652_v38 = vadd.f32 %v6533_v33, %v508_v26  ;;  %v1326_v42 = vld [vmem:[#allocation3 + $0xf] sm:$0xff]  ;;  %vm1439_vm0 = vmpackc.low %vm6497_vm2, %vm6497_vm2 }
  0x9b   : > { %5067 = vmatpush3.bf16.msra.mxu0 %v5804_v51  ;;  %v653_v39 = vadd.f32 %v6533_v33, %v509_v27  ;;  %v1357_v49 = vpack.c.bf16 %v1326_v42, %v1325_v35  ;;  %v5822_v50 = vld [vmem:[%s6373_s23 + $0x140] sm:$0xff]   ;;  %v1471_v61 = vsel %vm1439_vm0, 65537, %v8664_v40  ;;  %vm1776_vm1 = vmpackc.low %vm6506_vm3, %vm6506_vm3  ;;  %v5824_v4 = vld [vmem:[%s6373_s23 + $0x148] sm:$0xff]   ;;  %vm6592_vm6 = vcmp.gt.s32.totalorder %v923_v19, 0 }
  0x9c   : > { %5179 = vmatpush3.bf16.msra.mxu1 %v5805_v52  ;;  %5068 = vmatprep.subr.bf16.mxu0 %v5806_v54  ;;  %v6553_v46 = vsel %vm547_vm4, %v508_v26, %v583_v31  ;;  %v6556_v47 = vsel %vm548_vm5, %v509_v27, %v584_v32  ;;  %vm684_vm12 = vcmp.gt.f32.partialorder %v652_v38, 0.0  ;;  %vm716_vm14 = vcmp.lt.f32.partialorder %v652_v38, 0.0  ;;  %v5823_v51 = vld [vmem:[%s6373_s23 + $0x100] sm:$0xff]   ;;  %v513_v19 = vld [vmem:[#allocation2 + $0x28] sm:$0xff]  ;;  %v5826_v27 = vld [vmem:[%s6373_s23 + $0x150] sm:$0xff]  }
  0x9d   : > { %5180 = vmatprep.subr.bf16.mxu1 %v5807_v56  ;;  %8783 = vst [vmem:[#allocation26_spill] sm:$0xff] %v6553_v46  ;;  %8784 = vst [vmem:[#allocation27_spill] sm:$0xff] %v6556_v47  ;;  %vm685_vm13 = vcmp.gt.f32.partialorder %v653_v39, 0.0  ;;  %vm717_vm15 = vcmp.lt.f32.partialorder %v653_v39, 0.0  ;;  %v748_v52 = vsel %vm716_vm14, -1.0, %v6095_v34  ;;  %v4844_v54 = vcombine.low %v1469_v41, %v6559_v48  ;;  %v510_v59 = vld [vmem:[#allocation2 + $0x10] sm:$0xff] }
  0x9e   : > { %v749_v53 = vsel %vm717_vm15, -1.0, %v6095_v34  ;;  %v4049_v55 = vadd.f32 %v6556_v47, %v6553_v46  ;;  %v780_v56 = vsel %vm684_vm12, 1.0, %v748_v52  ;;  %vm549_vm4 = vcmp.ge.f32.partialorder %v510_v59, 0.0  ;;  %v1661_v11 = vld [vmem:[#allocation3 + $0x9] sm:$0xff]  ;;  %vm1441_vm15 = vmpackc.low %vm6538_vm7, %vm6538_vm7 }
  0x9f   : > { %5069 = vmatpush3.bf16.msra.mxu0 %v5808_v58  ;;  %v781_v57 = vsel %vm685_vm13, 1.0, %v749_v53  ;;  %v1806_v58 = vsel %vm1774_vm11, 65537, %v8664_v40  ;;  %812 = vst [vmem:[#allocation3 + $0x18] sm:$0xff] %v780_v56  ;;  %vm6579_vm2 = vcmp.ne.s16.totalorder %v4844_v54, 0  ;;  %v585_v1 = vmul.f32 %v6524_v28, %v510_v59  ;;  %v5827_v54 = vld [vmem:[%s6373_s23 + $0x110] sm:$0xff]   ;;  %v5828_v43 = vld [vmem:[%s6373_s23 + $0x158] sm:$0xff]  }
  0xa0   : > { %5181 = vmatpush3.bf16.msra.mxu1 %v5809_v60  ;;  %5070 = vmatprep.subr.bf16.mxu0 %v5810_v62  ;;  %v511_v60 = vld [vmem:[#allocation2 + $0x18] sm:$0xff]  ;;  %813 = vst [vmem:[#allocation3 + $0x20] sm:$0xff] %v781_v57  ;;  %v4860_v63 = vcombine.low %v6559_v48, %v1806_v58  ;;  %v654_v3 = vadd.f32 %v6533_v33, %v510_v59  ;;  %v8789_v6 = vmov 0  ;;  %v6608_v9 = vsel %vm1776_vm1, 65537, %v8664_v40  ;;  %v5829_v21 = vld [vmem:[%s6373_s23 + $0x118] sm:$0xff]  }
  0xa1   : > { %5182 = vmatprep.subr.bf16.mxu1 %v5811_v0  ;;  %v1630_v0 = vpack.c.bf16 %v781_v57, %v780_v56  ;;  %vm550_vm5 = vcmp.ge.f32.partialorder %v511_v60, 0.0  ;;  %v4845_v8 = vcombine.low %v1471_v61, %v6559_v48  ;;  %vm6612_vm9 = vcmp.lt.s32.totalorder %v930_v23, 15 }
  0xa2   : > { %vm6596_vm8 = vcmp.ne.s16.totalorder %v4860_v63, 0  ;;  %v6617_v12 = vsel %vm549_vm4, %v510_v59, %v585_v1  ;;  %vm686_vm11 = vcmp.gt.f32.partialorder %v654_v3, 0.0  ;;  %vm718_vm12 = vcmp.lt.f32.partialorder %v654_v3, 0.0  ;;  %vm1778_vm4 = vmpackc.low %vm6545_vm10, %vm6545_vm10  ;;  %v514_v59 = vld [vmem:[#allocation2 + $0x30] sm:$0xff] }
  0xa3   : > { %5071 = vmatpush3.bf16.msra.mxu0 %v5812_v2  ;;  %v586_v2 = vmul.f32 %v6524_v28, %v511_v60  ;;  %v8790_v6 = vsel %vm6596_vm8, 4294967295, %v8789_v6  ;;  %8794 = vst [vmem:[#allocation29_spill] sm:$0xff] %v6617_v12  ;;  %v750_v16 = vsel %vm718_vm12, -1.0, %v6095_v34  ;;  %vm6623_vm14 = vcmp.ne.s16.totalorder %v4845_v8, 0 }
  0xa4   : > { %5183 = vmatpush3.bf16.msra.mxu1 %v5813_v5  ;;  %5072 = vmatprep.subr.bf16.mxu0 %v5814_v7  ;;  %8791 = vst [vmem:[#allocation28_spill] sm:$0xff] %v8790_v6  ;;  %v655_v7 = vadd.f32 %v6533_v33, %v511_v60  ;;  %v4050_v23 = vadd.f32 %v4049_v55, %v6617_v12  ;;  %vm552_vm1 = vcmp.ge.f32.partialorder %v513_v19, 0.0  ;;  %v1473_v57 = vsel %vm1441_vm15, 65537, %v8664_v40  ;;  %vm1443_vm15 = vmpackc.low %vm6592_vm6, %vm6592_vm6  ;;  %v517_v5 = vld [vmem:[#allocation2 + $0x48] sm:$0xff] }
  0xa5   : > { %5184 = vmatprep.subr.bf16.mxu1 %v5815_v10  ;;  %v4861_v39 = vcombine.low %v6559_v48, %v6608_v9  ;;  %v588_v42 = vmul.f32 %v6524_v28, %v513_v19  ;;  %v657_v56 = vadd.f32 %v6533_v33, %v513_v19  ;;  %v4846_v58 = vcombine.low %v1473_v57, %v6559_v48  ;;  %v5832_v57 = vld [vmem:[%s6373_s23 + $0x120] sm:$0xff]  }
  0xa6   : > { %vm687_vm13 = vcmp.gt.f32.partialorder %v655_v7, 0.0  ;;  %vm719_vm3 = vcmp.lt.f32.partialorder %v655_v7, 0.0  ;;  %v1933_v31 = vld [vmem:[#allocation3 + $0x17] sm:$0xff]  ;;  %v1810_v36 = vsel %vm1778_vm4, 65537, %v8664_v40  ;;  %v8804_v1 = vmov 0  ;;  %vm1780_vm4 = vmpackc.low %vm6612_vm9, %vm6612_vm9 }
  0xa7   : > { %5073 = vmatpush3.bf16.msra.mxu0 %v5816_v13  ;;  %v6619_v13 = vsel %vm550_vm5, %v511_v60, %v586_v2  ;;  %v1934_v32 = vld [vmem:[#allocation3 + $0x1f] sm:$0xff]  ;;  %v1662_v35 = vld [vmem:[#allocation3 + $0x11] sm:$0xff]  ;;  %vm6647_vm5 = vcmp.gt.s32.totalorder %v937_v25, 0  ;;  %v6653_v55 = vsel %vm552_vm1, %v513_v19, %v588_v42  ;;  %vm689_vm7 = vcmp.gt.f32.partialorder %v657_v56, 0.0 }
  0xa8   : > { %5185 = vmatpush3.bf16.msra.mxu1 %v5817_v15  ;;  %5074 = vmatprep.subr.bf16.mxu0 %v5818_v18  ;;  %8795 = vst [vmem:[#allocation30_spill] sm:$0xff] %v6619_v13  ;;  %v5825_v15 = vld [vmem:[%s6373_s23 + $0x108] sm:$0xff]   ;;  %v512_v18 = vld [vmem:[#allocation2 + $0x20] sm:$0xff]  ;;  %v4051_v38 = vadd.f32 %v4050_v23, %v6619_v13  ;;  %8801 = vst [vmem:[#allocation32_spill] sm:$0xff] %v6653_v55  ;;  %vm6687_vm10 = vcmp.ne.s16.totalorder %v4861_v39, 0  ;;  %v589_v9 = vmul.f32 %v6524_v28, %v514_v59  ;;  %v8817_v53 = vmov 0 }
  0xa9   : > { %5186 = vmatprep.subr.bf16.mxu1 %v5819_v20  ;;  %v751_v20 = vsel %vm719_vm3, -1.0, %v6095_v34  ;;  %vm551_vm0 = vcmp.ge.f32.partialorder %v512_v18, 0.0  ;;  %v587_v26 = vmul.f32 %v6524_v28, %v512_v18  ;;  %v656_v52 = vadd.f32 %v6533_v33, %v512_v18  ;;  %v6667_v25 = vld [vmem:[#allocation3 + $0x19] sm:$0xff]  ;;  %v5831_v42 = vld [vmem:[%s6373_s23 + $0x1c0] sm:$0xff]  }
  0xaa   : > { %v515_v60 = vld [vmem:[#allocation2 + $0x38] sm:$0xff]  ;;  %vm6682_vm3 = vcmp.lt.s32.totalorder %v944_v29, 15  ;;  %v8805_v1 = vsel %vm6687_vm10, 4294967295, %v8804_v1  ;;  %v658_v23 = vadd.f32 %v6533_v33, %v514_v59  ;;  %v516_v39 = vld [vmem:[#allocation2 + $0x40] sm:$0xff] }
  0xab   : > { %5075 = vmatpush3.bf16.msra.mxu0 %v5820_v22  ;;  %v782_v22 = vsel %vm686_vm11, 1.0, %v750_v16  ;;  %vm688_vm11 = vcmp.gt.f32.partialorder %v656_v52, 0.0  ;;  %vm720_vm12 = vcmp.lt.f32.partialorder %v656_v52, 0.0  ;;  %8806 = vst [vmem:[#allocation33_spill] sm:$0xff] %v8805_v1  ;;  %vm554_vm1 = vcmp.ge.f32.partialorder %v515_v60, 0.0 }
  0xac   : > { %5187 = vmatpush3.bf16.msra.mxu1 %v5821_v24  ;;  %5284 = vmatprep.subr.bf16.mxu0 %v5822_v50  ;;  %v783_v24 = vsel %vm687_vm13, 1.0, %v751_v20  ;;  %814 = vst [vmem:[#allocation3 + $0x28] sm:$0xff] %v782_v22  ;;  %v1693_v50 = vpack.c.bf16 %v1662_v35, %v1661_v11  ;;  %vm721_vm13 = vcmp.lt.f32.partialorder %v657_v56, 0.0  ;;  %v752_v61 = vsel %vm720_vm12, -1.0, %v6095_v34 }
  0xad   : > { %815 = vst [vmem:[#allocation3 + $0x30] sm:$0xff] %v783_v24  ;;  %v1631_v41 = vpack.c.bf16 %v783_v24, %v782_v22  ;;  %v753_v2 = vsel %vm721_vm13, -1.0, %v6095_v34  ;;  %v784_v3 = vsel %vm688_vm11, 1.0, %v752_v61  ;;  %vm6703_vm11 = vcmp.ne.s16.totalorder %v4846_v58, 0  ;;  %5396 = vmatprep.subr.bf16.mxu1 %v5831_v42 }
  0xae   : > { %4964 = vmatmul.mubr.msk.bf16.vlgmr.msra.gmra.mrb[0].mxu0 %vm6579_vm2, %v1357_v49  ;;  %v1965_v49 = vpack.c.bf16 %v1934_v32, %v1933_v31  ;;  %v785_v8 = vsel %vm689_vm7, 1.0, %v753_v2  ;;  %816 = vst [vmem:[#allocation3 + $0x38] sm:$0xff] %v784_v3  ;;  %v8807_v16 = vmov 0  ;;  %v590_v19 = vmul.f32 %v6524_v28, %v515_v60 }
  0xaf   : > { %5285 = vmatpush3.bf16.msra.mxu0 %v5823_v51  ;;  %3109 = vmatprep.mubr.bf16.mxu0 %v1630_v0  ;;  %v6642_v51 = vsel %vm551_vm0, %v512_v18, %v587_v26  ;;  %vm553_vm0 = vcmp.ge.f32.partialorder %v514_v59, 0.0  ;;  %817 = vst [vmem:[#allocation3 + $0x40] sm:$0xff] %v785_v8  ;;  %v8808_v16 = vsel %vm6703_vm11, 4294967295, %v8807_v16  ;;  %v1632_v18 = vpack.c.bf16 %v785_v8, %v784_v3 }
  0xb0   : > { %5286 = vmatprep.subr.bf16.mxu0 %v5824_v4  ;;  %8798 = vst [vmem:[#allocation31_spill] sm:$0xff] %v6642_v51  ;;  %v4052_v17 = vadd.f32 %v4051_v38, %v6642_v51  ;;  %4980 = vmatprep.mubr.msk.bf16.mxu1 %vm6579_vm2, %v1965_v49  ;;  %v4862_v4 = vcombine.low %v6559_v48, %v1810_v36  ;;  %v1475_v32 = vsel %vm1443_vm15, 65537, %v8664_v40  ;;  %v1812_v38 = vsel %vm1780_vm4, 65537, %v8664_v40  ;;  %vm1445_vm15 = vmpackc.low %vm6647_vm5, %vm6647_vm5  ;;  %v539_v51 = vld [vmem:[#allocation2 + $0xf8] sm:$0xff] }
  0xb1   : > { %4981 = vmatmul.mubr.msk.bf16.vlgmr.msra.gmra.mrb[0].mxu1 %vm6596_vm8, %v1693_v50  ;;  %v6708_v22 = vsel %vm553_vm0, %v514_v59, %v589_v9  ;;  %v659_v24 = vadd.f32 %v6533_v33, %v515_v60  ;;  %v6719_v31 = vsel %vm554_vm1, %v515_v60, %v590_v19  ;;  %vm690_vm7 = vcmp.gt.f32.partialorder %v658_v23, 0.0 }
  0xb2   : > { %v4053_v63 = vadd.f32 %v4052_v17, %v6653_v55  ;;  %8809 = vst [vmem:[#allocation34_spill] sm:$0xff] %v6708_v22  ;;  %vm6714_vm12 = vcmp.ne.s16.totalorder %v4862_v4, 0  ;;  %8812 = vst [vmem:[#allocation35_spill] sm:$0xff] %v6719_v31  ;;  %vm722_vm0 = vcmp.lt.f32.partialorder %v658_v23, 0.0  ;;  %v4847_v50 = vcombine.low %v1475_v32, %v6559_v48  ;;  %v5834_v23 = vld [vmem:[%s6373_s23 + $0x168] sm:$0xff]   ;;  %v538_v55 = vld [vmem:[#allocation2 + $0xf0] sm:$0xff] }
  0xb3   : > { %5287 = vmatpush3.bf16.msra.mxu0 %v5825_v15  ;;  %v1935_v29 = vld [vmem:[#allocation3 + $0x27] sm:$0xff]  ;;  %vm691_vm13 = vcmp.gt.f32.partialorder %v659_v24, 0.0  ;;  %vm723_vm6 = vcmp.lt.f32.partialorder %v659_v24, 0.0  ;;  %v754_v10 = vsel %vm722_vm0, -1.0, %v6095_v34  ;;  %vm555_vm9 = vcmp.ge.f32.partialorder %v516_v39, 0.0 }
  0xb4   : > { %5288 = vmatprep.subr.bf16.mxu0 %v5826_v27  ;;  %v1664_v7 = vld [vmem:[#allocation3 + $0x21] sm:$0xff]  ;;  %v1936_v11 = vld [vmem:[#allocation3 + $0x2f] sm:$0xff]  ;;  %v4054_v35 = vadd.f32 %v4053_v63, %v6708_v22  ;;  %vm6750_vm1 = vcmp.ne.s16.totalorder %v4847_v50, 0  ;;  %v8813_v58 = vmov 0  ;;  %v4863_v36 = vcombine.low %v6559_v48, %v1812_v38 }
  0xb5   : > { %v1694_v15 = vpack.c.bf16 %v1664_v7, %v6667_v25  ;;  %v1966_v20 = vpack.c.bf16 %v1936_v11, %v1935_v29  ;;  %v6712_v26 = vld [vmem:[#allocation3 + $0x29] sm:$0xff]  ;;  %v1937_v17 = vld [vmem:[#allocation3 + $0x37] sm:$0xff]  ;;  %v8814_v58 = vsel %vm6750_vm1, 4294967295, %v8813_v58  ;;  %vm556_vm4 = vcmp.ge.f32.partialorder %v517_v5, 0.0 }
  0xb6   : > { %4965 = vmatmul.mubr.msk.bf16.gmra.mrb[4].mxu0 %vm6623_vm14, %v1965_v49  ;;  %v755_v49 = vsel %vm723_vm6, -1.0, %v6095_v34  ;;  %v4055_v52 = vadd.f32 %v4054_v35, %v6719_v31  ;;  %v1666_v25 = vld [vmem:[#allocation3 + $0x31] sm:$0xff]  ;;  %v591_v59 = vmul.f32 %v6524_v28, %v516_v39  ;;  %v1938_v60 = vld [vmem:[#allocation3 + $0x3f] sm:$0xff]  ;;  %v660_v2 = vadd.f32 %v6533_v33, %v516_v39 }
  0xb7   : > { %3117 = vmatprep.mubr.bf16.mxu0 %v1631_v41  ;;  %5289 = vmatpush3.bf16.msra.mxu0 %v5827_v54  ;;  %v5830_v41 = vld [vmem:[%s6373_s23 + $0x160] sm:$0xff]   ;;  %v786_v54 = vsel %vm690_vm7, 1.0, %v754_v10  ;;  %v787_v56 = vsel %vm691_vm13, 1.0, %v755_v49  ;;  %v1695_v61 = vpack.c.bf16 %v1666_v25, %v6712_v26  ;;  %v1967_v3 = vpack.c.bf16 %v1938_v60, %v1937_v17  ;;  %vm1782_vm7 = vmpackc.low %vm6682_vm3, %vm6682_vm3  ;;  %v6773_v8 = vld [vmem:[#allocation3 + $0x39] sm:$0xff] }
  0xb8   : > { %5290 = vmatprep.subr.bf16.mxu0 %v5828_v43  ;;  %4982 = vmatprep.mubr.msk.bf16.mxu1 %vm6623_vm14, %v1966_v20  ;;  %818 = vst [vmem:[#allocation3 + $0x48] sm:$0xff] %v786_v54  ;;  %819 = vst [vmem:[#allocation3 + $0x50] sm:$0xff] %v787_v56  ;;  %v1633_v63 = vpack.c.bf16 %v787_v56, %v786_v54  ;;  %v592_v43 = vmul.f32 %v6524_v28, %v517_v5  ;;  %v1477_v29 = vsel %vm1445_vm15, 65537, %v8664_v40  ;;  %v5833_v7 = vld [vmem:[%s6373_s23 + $0x180] sm:$0xff]   ;;  %v8820_v32 = vmov 0  ;;  %v5836_v60 = vld [vmem:[%s6373_s23 + $0x128] sm:$0xff]  }
  0xb9   : > { %4983 = vmatmul.mubr.msk.bf16.gmra.mrb[4].mxu1 %vm6687_vm10, %v1694_v15  ;;  %v6760_v4 = vsel %vm555_vm9, %v516_v39, %v591_v59  ;;  %vm692_vm13 = vcmp.gt.f32.partialorder %v660_v2, 0.0  ;;  %vm724_vm0 = vcmp.lt.f32.partialorder %v660_v2, 0.0  ;;  %v4848_v11 = vcombine.low %v1477_v29, %v6559_v48  ;;  %v518_v15 = vld [vmem:[#allocation2 + $0x50] sm:$0xff] }
  0xba   : > { %8815 = vst [vmem:[#allocation36_spill] sm:$0xff] %v6760_v4  ;;  %v6776_v9 = vsel %vm556_vm4, %v517_v5, %v592_v43  ;;  %4984 = vmatprep.mubr.msk.bf16.mxu1 %vm6703_vm11, %v1967_v3  ;;  %vm6781_vm5 = vcmp.ne.s16.totalorder %v4863_v36, 0  ;;  %v4056_v19 = vadd.f32 %v4055_v52, %v6760_v4  ;;  %5397 = vmatpush3.bf16.msra.mxu1 %v5833_v7  ;;  %v1814_v35 = vsel %vm1782_vm7, 65537, %v8664_v40  ;;  %v5837_v43 = vld [vmem:[%s6373_s23 + $0x188] sm:$0xff]  }
  0xbb   : > { %5291 = vmatpush3.bf16.msra.mxu0 %v5829_v21  ;;  %v661_v21 = vadd.f32 %v6533_v33, %v517_v5  ;;  %8816 = vst [vmem:[#allocation37_spill] sm:$0xff] %v6776_v9  ;;  %v8818_v53 = vsel %vm6781_vm5, 4294967295, %v8817_v53  ;;  %vm6791_vm15 = vcmp.ne.s16.totalorder %v4848_v11, 0  ;;  %vm557_vm4 = vcmp.ge.f32.partialorder %v518_v15, 0.0  ;;  %v521_v11 = vld [vmem:[#allocation2 + $0x68] sm:$0xff]  ;;  %v2127_v1 = vld [vmem:[#allocation3 + $0x37] sm:$0xff] }
  0xbc   : > { %5292 = vmatprep.subr.bf16.mxu0 %v5830_v41  ;;  %8819 = vst [vmem:[#allocation38_spill] sm:$0xff] %v8818_v53  ;;  %v8821_v32 = vsel %vm6791_vm15, 4294967295, %v8820_v32  ;;  %v4057_v39 = vadd.f32 %v4056_v19, %v6776_v9  ;;  %v4864_v42 = vcombine.low %v6559_v48, %v1814_v35  ;;  %v593_v10 = vmul.f32 %v6524_v28, %v518_v15 }
  0xbd   : > { %vm693_vm6 = vcmp.gt.f32.partialorder %v661_v21, 0.0  ;;  %vm725_vm9 = vcmp.lt.f32.partialorder %v661_v21, 0.0  ;;  %v662_v56 = vadd.f32 %v6533_v33, %v518_v15  ;;  %v951_v59 = vand.u32 15, %v6528_v30  ;;  %v522_v30 = vld [vmem:[#allocation2 + $0x70] sm:$0xff] }
  0xbe   : > { %4966 = vmatmul.mubr.msk.bf16.gmra.mrb[8].mxu0 %vm6703_vm11, %v1966_v20  ;;  %v519_v20 = vld [vmem:[#allocation2 + $0x58] sm:$0xff]  ;;  %v757_v24 = vsel %vm725_vm9, -1.0, %v6095_v34  ;;  %v6819_v17 = vsel %vm557_vm4, %v518_v15, %v593_v10  ;;  %v8828_v19 = vmov 0  ;;  %v8874_v22 = vmov 0 }
  0xbf   : > { %3125 = vmatprep.mubr.bf16.mxu0 %v1632_v18  ;;  %5293 = vmatpush3.bf16.msra.mxu0 %v5832_v57  ;;  %v756_v18 = vsel %vm724_vm0, -1.0, %v6095_v34  ;;  %v6803_v38 = vsel %vm693_vm6, 1.0, %v757_v24  ;;  %v1939_v5 = vld [vmem:[#allocation3 + $0x47] sm:$0xff]  ;;  %v1940_v41 = vld [vmem:[#allocation3 + $0x4f] sm:$0xff]  ;;  %vm558_vm3 = vcmp.ge.f32.partialorder %v519_v20, 0.0  ;;  %v594_v49 = vmul.f32 %v6524_v28, %v519_v20  ;;  %v5835_v57 = vld [vmem:[%s6373_s23 + $0x1c8] sm:$0xff]  }
  0xc0   : > { %v6789_v26 = vsel %vm692_vm13, 1.0, %v756_v18  ;;  %5294 = vmatprep.subr.bf16.mxu0 %v5834_v23  ;;  %v1668_v0 = vld [vmem:[#allocation3 + $0x41] sm:$0xff]  ;;  %821 = vst [vmem:[#allocation3 + $0x60] sm:$0xff] %v6803_v38  ;;  %v1968_v50 = vpack.c.bf16 %v1940_v41, %v1939_v5  ;;  %8822 = vst [vmem:[#allocation39_spill] sm:$0xff] %v6819_v17  ;;  %v663_v36 = vadd.f32 %v6533_v33, %v519_v20  ;;  %vm694_vm7 = vcmp.gt.f32.partialorder %v662_v56, 0.0  ;;  %v6831_v2 = vld [vmem:[#allocation3 + $0x49] sm:$0xff] }
  0xc1   : > { %820 = vst [vmem:[#allocation3 + $0x58] sm:$0xff] %v6789_v26  ;;  %4985 = vmatmul.mubr.msk.bf16.gmra.mrb[8].mxu1 %vm6714_vm12, %v1695_v61  ;;  %v1696_v52 = vpack.c.bf16 %v1668_v0, %v6773_v8  ;;  %v1634_v54 = vpack.c.bf16 %v6803_v38, %v6789_v26  ;;  %v6821_v25 = vsel %vm558_vm3, %v519_v20, %v594_v49  ;;  %vm726_vm13 = vcmp.lt.f32.partialorder %v662_v56, 0.0  ;;  %v520_v8 = vld [vmem:[#allocation2 + $0x60] sm:$0xff] }
  0xc2   : > { %8823 = vst [vmem:[#allocation40_spill] sm:$0xff] %v6821_v25  ;;  %4986 = vmatprep.mubr.msk.bf16.mxu1 %vm6750_vm1, %v1968_v50  ;;  %v4058_v61 = vadd.f32 %v4057_v39, %v6819_v17  ;;  %5398 = vmatprep.subr.bf16.mxu1 %v5835_v57  ;;  %vm695_vm0 = vcmp.gt.f32.partialorder %v663_v36, 0.0  ;;  %vm727_vm6 = vcmp.lt.f32.partialorder %v663_v36, 0.0  ;;  %vm6834_vm9 = vcmp.gt.s32.totalorder %v951_v59, 0  ;;  %v5839_v56 = vld [vmem:[%s6373_s23 + $0x1d0] sm:$0xff]  }
  0xc3   : > { %5295 = vmatpush3.bf16.msra.mxu0 %v5836_v60  ;;  %v759_v21 = vsel %vm727_vm6, -1.0, %v6095_v34  ;;  %vm1447_vm4 = vmpackc.low %vm6834_vm9, %vm6834_vm9  ;;  %5399 = vmatpush3.bf16.msra.mxu1 %v5837_v43  ;;  %vm559_vm6 = vcmp.ge.f32.partialorder %v520_v8, 0.0  ;;  %v595_v41 = vmul.f32 %v6524_v28, %v520_v8  ;;  %v857_v0 = vadd.s32 96, %v6462_v45  ;;  %v5840_v60 = vld [vmem:[%s6373_s23 + $0x130] sm:$0xff]  }
  0xc4   : > { %v6856_v20 = vsel %vm695_vm0, 1.0, %v759_v21  ;;  %v1479_v23 = vsel %vm1447_vm4, 65537, %v8664_v40  ;;  %vm560_vm0 = vcmp.ge.f32.partialorder %v521_v11, 0.0  ;;  %v596_v49 = vmul.f32 %v6524_v28, %v521_v11  ;;  %5400 = vmatprep.subr.bf16.mxu1 %v5839_v56 }
  0xc5   : > { %823 = vst [vmem:[#allocation3 + $0x70] sm:$0xff] %v6856_v20  ;;  %v4849_v35 = vcombine.low %v1479_v23, %v6559_v48  ;;  %v6889_v57 = vsel %vm559_vm6, %v520_v8, %v595_v41  ;;  %v965_v36 = vand.u32 15, %v857_v0  ;;  %v858_v59 = vadd.s32 104, %v6462_v45  ;;  %v5842_v41 = vld [vmem:[%s6373_s23 + $0x1d8] sm:$0xff]  }
  0xc6   : > { %4967 = vmatmul.mubr.msk.bf16.gmra.mrb[12].mxu0 %vm6750_vm1, %v1967_v3  ;;  %v758_v3 = vsel %vm726_vm13, -1.0, %v6095_v34  ;;  %vm6851_vm13 = vcmp.ne.s16.totalorder %v4864_v42, 0  ;;  %v5838_v42 = vld [vmem:[%s6373_s23 + $0x170] sm:$0xff]   ;;  %8832 = vst [vmem:[#allocation41_spill] sm:$0xff] %v6889_v57  ;;  %v597_v0 = vmul.f32 %v6524_v28, %v522_v30 }
  0xc7   : > { %3133 = vmatprep.mubr.bf16.mxu0 %v1633_v63  ;;  %v958_v63 = vand.u32 15, %v6550_v44  ;;  %v6839_v29 = vsel %vm694_vm7, 1.0, %v758_v3  ;;  %v4059_v44 = vadd.f32 %v4058_v61, %v6821_v25  ;;  %v8829_v19 = vsel %vm6851_vm13, 4294967295, %v8828_v19  ;;  %5296 = vmatprep.subr.bf16.mxu0 %v5838_v42 }
  0xc8   : > { %v1941_v15 = vld [vmem:[#allocation3 + $0x57] sm:$0xff]  ;;  %822 = vst [vmem:[#allocation3 + $0x68] sm:$0xff] %v6839_v29  ;;  %v1942_v24 = vld [vmem:[#allocation3 + $0x5f] sm:$0xff]  ;;  %v1635_v5 = vpack.c.bf16 %v6856_v20, %v6839_v29  ;;  %vm6884_vm9 = vcmp.ne.s16.totalorder %v4849_v35, 0  ;;  %v6894_v61 = vsel %vm560_vm0, %v521_v11, %v596_v49  ;;  %vm6898_vm1 = vcmp.gt.s32.totalorder %v965_v36, 0  ;;  %5297 = vmatpush3.bf16.msra.mxu0 %v5840_v60  ;;  %v5844_v36 = vld [vmem:[%s6373_s23 + $0x178] sm:$0xff]  }
  0xc9   : > { %vm6845_vm3 = vcmp.lt.s32.totalorder %v958_v63, 15  ;;  %v6849_v18 = vld [vmem:[#allocation3 + $0x51] sm:$0xff]  ;;  %4987 = vmatmul.mubr.msk.bf16.gmra.mrb[12].mxu1 %vm6781_vm5, %v1696_v52  ;;  %v1969_v39 = vpack.c.bf16 %v1942_v24, %v1941_v15  ;;  %v665_v52 = vadd.f32 %v6533_v33, %v521_v11  ;;  %8833 = vst [vmem:[#allocation42_spill] sm:$0xff] %v6894_v61  ;;  %v5841_v63 = vld [vmem:[%s6373_s23 + $0x190] sm:$0xff]   ;;  %v4060_v3 = vadd.f32 %v4059_v44, %v6889_v57  ;;  %vm1449_vm0 = vmpackc.low %vm6898_vm1, %vm6898_vm1 }
  0xca   : > { %vm1784_vm7 = vmpackc.low %vm6845_vm3, %vm6845_vm3  ;;  %v1697_v26 = vpack.c.bf16 %v6849_v18, %v6831_v2  ;;  %v8836_v29 = vmov 0  ;;  %v972_v11 = vand.u32 15, %v858_v59  ;;  %v523_v15 = vld [vmem:[#allocation2 + $0x78] sm:$0xff]  ;;  %5401 = vmatpush3.bf16.msra.mxu1 %v5841_v63  ;;  %v8840_v60 = vmov 0  ;;  %v6953_v63 = vld [vmem:[#allocation3 + $0x8] sm:$0xff]  ;;  %5298 = vmatprep.subr.bf16.mxu0 %v5844_v36 }
  0xcb   : > { %v1816_v38 = vsel %vm1784_vm7, 65537, %v8664_v40  ;;  %4988 = vmatprep.mubr.msk.bf16.mxu1 %vm6791_vm15, %v1969_v39  ;;  %vm697_vm3 = vcmp.gt.f32.partialorder %v665_v52, 0.0  ;;  %v6913_v18 = vld [vmem:[#allocation3 + $0x59] sm:$0xff]  ;;  %v4061_v24 = vadd.f32 %v4060_v3, %v6894_v61  ;;  %v598_v42 = vmul.f32 %v6524_v28, %v523_v15  ;;  %5402 = vmatprep.subr.bf16.mxu1 %v5842_v41 }
  0xcc   : > { %v4865_v10 = vcombine.low %v6559_v48, %v1816_v38  ;;  %vm1306_vm1 = vcmp.lt.s32.totalorder %v972_v11, 15  ;;  %v862_v36 = vadd.s32 136, %v6462_v45 }
  0xce   : > { %4968 = vmatmul.mubr.msk.bf16.gmra.mrb[16].mxu0 %vm6791_vm15, %v1968_v50  ;;  %v664_v50 = vadd.f32 %v6533_v33, %v520_v8  ;;  %vm729_vm15 = vcmp.lt.f32.partialorder %v665_v52, 0.0  ;;  %vm6903_vm6 = vcmp.ne.s16.totalorder %v4865_v10, 0 }
  0xcf   : > { %3141 = vmatprep.mubr.bf16.mxu0 %v1634_v54  ;;  %v8830_v54 = vmov 0  ;;  %v1943_v21 = vld [vmem:[#allocation3 + $0x67] sm:$0xff]  ;;  %v8837_v29 = vsel %vm6903_vm6, 4294967295, %v8836_v29  ;;  %v761_v7 = vsel %vm729_vm15, -1.0, %v6095_v34  ;;  %v1944_v44 = vld [vmem:[#allocation3 + $0x6f] sm:$0xff]  ;;  %vm561_vm15 = vcmp.ge.f32.partialorder %v522_v30, 0.0 }
  0xd0   : > { %v8831_v54 = vsel %vm6884_vm9, 4294967295, %v8830_v54  ;;  %vm696_vm4 = vcmp.gt.f32.partialorder %v664_v50, 0.0  ;;  %vm728_vm7 = vcmp.lt.f32.partialorder %v664_v50, 0.0  ;;  %v6915_v20 = vld [vmem:[#allocation3 + $0x61] sm:$0xff]  ;;  %v6918_v23 = vsel %vm697_vm3, 1.0, %v761_v7  ;;  %v2055_v53 = vld [vmem:[#allocation3 + $0x69] sm:$0xff] }
  0xd1   : > { %v760_v43 = vsel %vm728_vm7, -1.0, %v6095_v34  ;;  %v1481_v34 = vsel %vm1449_vm0, 65537, %v8664_v40  ;;  %v1970_v35 = vpack.c.bf16 %v1944_v44, %v1943_v21  ;;  %825 = vst [vmem:[#allocation3 + $0x80] sm:$0xff] %v6918_v23  ;;  %4989 = vmatmul.mubr.msk.bf16.gmra.mrb[16].mxu1 %vm6851_vm13, %v1697_v26  ;;  %vm562_vm3 = vcmp.ge.f32.partialorder %v523_v15, 0.0  ;;  %v5843_v50 = vld [vmem:[%s6373_s23 + $0x198] sm:$0xff]  }
  0xd2   : > { %v6908_v8 = vsel %vm696_vm4, 1.0, %v760_v43  ;;  %v4850_v38 = vcombine.low %v1481_v34, %v6559_v48  ;;  %vm1786_vm4 = vmpackc.low %vm1306_vm1, %vm1306_vm1  ;;  %v1698_v10 = vpack.c.bf16 %v6915_v20, %v6913_v18  ;;  %v667_v26 = vadd.f32 %v6533_v33, %v523_v15  ;;  %5403 = vmatpush3.bf16.msra.mxu1 %v5843_v50  ;;  %v5845_v21 = vld [vmem:[%s6373_s23 + $0x138] sm:$0xff]  }
  0xd3   : > { %824 = vst [vmem:[#allocation3 + $0x78] sm:$0xff] %v6908_v8  ;;  %4990 = vmatprep.mubr.msk.bf16.mxu1 %vm6884_vm9, %v1970_v35  ;;  %v1818_v49 = vsel %vm1786_vm4, 65537, %v8664_v40  ;;  %v1636_v52 = vpack.c.bf16 %v6918_v23, %v6908_v8  ;;  %v6944_v28 = vsel %vm561_vm15, %v522_v30, %v597_v0  ;;  %v6946_v56 = vsel %vm562_vm3, %v523_v15, %v598_v42  ;;  %v525_v44 = vld [vmem:[#allocation2 + $0x88] sm:$0xff]  ;;  %v5846_v42 = vld [vmem:[%s6373_s23 + $0x1e0] sm:$0xff]  }
  0xd4   : > { %8838 = vst [vmem:[#allocation43_spill] sm:$0xff] %v6944_v28  ;;  %8839 = vst [vmem:[#allocation44_spill] sm:$0xff] %v6946_v56  ;;  %vm699_vm0 = vcmp.gt.f32.partialorder %v667_v26, 0.0  ;;  %vm731_vm4 = vcmp.lt.f32.partialorder %v667_v26, 0.0  ;;  %v4062_v3 = vadd.f32 %v4061_v24, %v6944_v28  ;;  %v860_v15 = vadd.s32 120, %v6462_v45  ;;  %v6961_v20 = vld [vmem:[#allocation3 + $0x69] sm:$0xff]  ;;  %5299 = vmatpush3.bf16.msra.mxu0 %v5845_v21  ;;  %5404 = vmatprep.subr.bf16.mxu1 %v5846_v42 }
  0xd5   : > { %v763_v2 = vsel %vm731_vm4, -1.0, %v6953_v63  ;;  %v4866_v23 = vcombine.low %v6559_v48, %v1818_v49  ;;  %v861_v49 = vadd.s32 128, %v6462_v45  ;;  %v526_v26 = vld [vmem:[#allocation2 + $0x90] sm:$0xff]  ;;  %v669_v50 = vadd.f32 %v6533_v33, %v525_v44  ;;  %v5848_v21 = vld [vmem:[%s6373_s23 + $0x1e8] sm:$0xff]  }
  0xd6   : > { %4969 = vmatmul.mubr.msk.bf16.gmra.mrb[20].mxu0 %vm6884_vm9, %v1969_v39  ;;  %v666_v39 = vadd.f32 %v6533_v33, %v522_v30  ;;  %vm6949_vm9 = vcmp.ne.s16.totalorder %v4850_v38, 0  ;;  %v524_v30 = vld [vmem:[#allocation2 + $0x80] sm:$0xff]  ;;  %v795_v11 = vsel %vm699_vm0, 1.0, %v763_v2  ;;  %v6965_v34 = vadd.f32 %v4062_v3, %v6946_v56  ;;  %v527_v2 = vld [vmem:[#allocation2 + $0x98] sm:$0xff]  ;;  %v7072_v56 = vld [vmem:[%s6373_s23 + $0x200] sm:$0xff]  }
  0xd7   : > { %3149 = vmatprep.mubr.bf16.mxu0 %v1635_v5  ;;  %v859_v5 = vadd.s32 112, %v6462_v45  ;;  %v8841_v60 = vsel %vm6949_vm9, 4294967295, %v8840_v60  ;;  %827 = vst [vmem:[#allocation3 + $0x90] sm:$0xff] %v795_v11  ;;  %v986_v0 = vand.u32 15, %v860_v15  ;;  %vm6982_vm0 = vcmp.ne.s16.totalorder %v4866_v23, 0  ;;  %5552 = vmatprep.subr.bf16.mxu0 %v7072_v56 }
  0xd8   : > { %vm698_vm7 = vcmp.gt.f32.partialorder %v666_v39, 0.0  ;;  %vm730_vm1 = vcmp.lt.f32.partialorder %v666_v39, 0.0  ;;  %8842 = vst [vmem:[#allocation45_spill] sm:$0xff] %v6965_v34 }
  0xd9   : > { %v979_v59 = vand.u32 15, %v859_v5  ;;  %v762_v43 = vsel %vm730_vm1, -1.0, %v6953_v63  ;;  %4991 = vmatmul.mubr.msk.bf16.gmra.mrb[20].mxu1 %vm6903_vm6, %v1698_v10  ;;  %v5847_v5 = vld [vmem:[%s6373_s23 + $0x1a0] sm:$0xff]   ;;  %vm733_vm6 = vcmp.lt.f32.partialorder %v669_v50, 0.0 }
  0xda   : > { %v1945_v7 = vld [vmem:[#allocation3 + $0x77] sm:$0xff]  ;;  %v794_v8 = vsel %vm698_vm7, 1.0, %v762_v43  ;;  %v1946_v18 = vld [vmem:[#allocation3 + $0x7f] sm:$0xff]  ;;  %vm1308_vm7 = vcmp.lt.s32.totalorder %v986_v0, 15  ;;  %v993_v43 = vand.u32 15, %v861_v49  ;;  %5405 = vmatpush3.bf16.msra.mxu1 %v5847_v5 }
  0xdb   : > { %vm1275_vm15 = vcmp.gt.s32.totalorder %v979_v59, 0  ;;  %826 = vst [vmem:[#allocation3 + $0x88] sm:$0xff] %v794_v8  ;;  %v1971_v24 = vpack.c.bf16 %v1946_v18, %v1945_v7  ;;  %v1674_v38 = vld [vmem:[#allocation3 + $0x71] sm:$0xff]  ;;  %vm1788_vm1 = vmpackc.low %vm1308_vm7, %vm1308_vm7  ;;  %v6986_v59 = vpack.c.bf16 %v795_v11, %v794_v8  ;;  %v6988_v3 = vld [vmem:[#allocation3 + $0x79] sm:$0xff]  ;;  %v8845_v7 = vmov 0  ;;  %5406 = vmatprep.subr.bf16.mxu1 %v5848_v21 }
  0xdc   : > { %vm1451_vm3 = vmpackc.low %vm1275_vm15, %vm1275_vm15  ;;  %v1699_v10 = vpack.c.bf16 %v1674_v38, %v6961_v20  ;;  %vm701_vm15 = vcmp.gt.f32.partialorder %v669_v50, 0.0  ;;  %vm6997_vm7 = vcmp.gt.s32.totalorder %v993_v43, 0  ;;  %v765_v20 = vsel %vm733_vm6, -1.0, %v6953_v63  ;;  %v528_v49 = vld [vmem:[#allocation2 + $0xa0] sm:$0xff]  ;;  %v529_v50 = vld [vmem:[#allocation2 + $0xa8] sm:$0xff] }
  0xdd   : > { %v1483_v41 = vsel %vm1451_vm3, 65537, %v8664_v40  ;;  %4992 = vmatprep.mubr.msk.bf16.mxu1 %vm6949_vm9, %v1971_v24  ;;  %v1000_v38 = vand.u32 15, %v862_v36  ;;  %v5849_v36 = vld [vmem:[%s6373_s23 + $0x1a8] sm:$0xff]   ;;  %v5850_v43 = vld [vmem:[%s6373_s23 + $0x1f0] sm:$0xff]  }
  0xde   : > { %4970 = vmatmul.mubr.msk.bf16.gmra.mrb[24].mxu0 %vm6949_vm9, %v1970_v35  ;;  %v4851_v39 = vcombine.low %v1483_v41, %v6559_v48  ;;  %v668_v35 = vadd.f32 %v6533_v33, %v524_v30  ;;  %v1820_v30 = vsel %vm1788_vm1, 65537, %v8664_v40  ;;  %v670_v41 = vadd.f32 %v6533_v33, %v526_v26  ;;  %vm1453_vm1 = vmpackc.low %vm6997_vm7, %vm6997_vm7  ;;  %v5851_v21 = vld [vmem:[%s6373_s23 + $0x1b0] sm:$0xff]   ;;  %5407 = vmatpush3.bf16.msra.mxu1 %v5849_v36 }
  0xdf   : > { %3157 = vmatprep.mubr.bf16.mxu0 %v1636_v52  ;;  %v8843_v52 = vmov 0  ;;  %v4867_v42 = vcombine.low %v6559_v48, %v1820_v30  ;;  %v1485_v5 = vsel %vm1453_vm1, 65537, %v8664_v40  ;;  %vm1310_vm6 = vcmp.lt.s32.totalorder %v1000_v38, 15  ;;  %5408 = vmatprep.subr.bf16.mxu1 %v5850_v43 }
  0xe0   : > { %v8844_v52 = vsel %vm6982_vm0, 4294967295, %v8843_v52  ;;  %vm700_vm4 = vcmp.gt.f32.partialorder %v668_v35, 0.0  ;;  %vm732_vm3 = vcmp.lt.f32.partialorder %v668_v35, 0.0  ;;  %vm6992_vm9 = vcmp.ne.s16.totalorder %v4851_v39, 0 }
  0xe1   : > { %v8846_v7 = vsel %vm6992_vm9, 4294967295, %v8845_v7  ;;  %v764_v15 = vsel %vm732_vm3, -1.0, %v6953_v63  ;;  %v797_v39 = vsel %vm701_vm15, 1.0, %v765_v20  ;;  %v671_v35 = vadd.f32 %v6533_v33, %v527_v2  ;;  %4993 = vmatmul.mubr.msk.bf16.gmra.mrb[24].mxu1 %vm6982_vm0, %v1699_v10 }
  0xe2   : > { %v1947_v11 = vld [vmem:[#allocation3 + $0x87] sm:$0xff]  ;;  %v1948_v44 = vld [vmem:[#allocation3 + $0x8f] sm:$0xff]  ;;  %v796_v23 = vsel %vm700_vm4, 1.0, %v764_v15  ;;  %829 = vst [vmem:[#allocation3 + $0xa0] sm:$0xff] %v797_v39  ;;  %vm1790_vm4 = vmpackc.low %vm1310_vm6, %vm1310_vm6  ;;  %vm702_vm15 = vcmp.gt.f32.partialorder %v670_v41, 0.0  ;;  %vm734_vm3 = vcmp.lt.f32.partialorder %v670_v41, 0.0  ;;  %5409 = vmatpush3.bf16.msra.mxu1 %v5851_v21 }
  0xe3   : > { %v7001_v18 = vld [vmem:[#allocation3 + $0x81] sm:$0xff]  ;;  %v7005_v0 = vpack.c.bf16 %v1948_v44, %v1947_v11  ;;  %828 = vst [vmem:[#allocation3 + $0x98] sm:$0xff] %v796_v23  ;;  %v863_v30 = vadd.s32 144, %v6462_v45  ;;  %v1822_v33 = vsel %vm1790_vm4, 65537, %v8664_v40  ;;  %vm703_vm7 = vcmp.gt.f32.partialorder %v671_v35, 0.0 }
  0xe4   : > { %vm735_vm1 = vcmp.lt.f32.partialorder %v671_v35, 0.0  ;;  %v766_v10 = vsel %vm734_vm3, -1.0, %v6953_v63  ;;  %vm7031_vm0 = vcmp.ne.s16.totalorder %v4867_v42, 0  ;;  %v8849_v2 = vmov 0  ;;  %v5852_v44 = vld [vmem:[%s6373_s23 + $0x1f8] sm:$0xff]  }
  0xe5   : > { %4994 = vmatprep.mubr.msk.bf16.mxu1 %vm6992_vm9, %v7005_v0  ;;  %v8850_v2 = vsel %vm7031_vm0, 4294967295, %v8849_v2  ;;  %v4868_v15 = vcombine.low %v6559_v48, %v1822_v33  ;;  %v767_v8 = vsel %vm735_vm1, -1.0, %v6953_v63  ;;  %v798_v11 = vsel %vm702_vm15, 1.0, %v766_v10  ;;  %v530_v10 = vld [vmem:[#allocation2 + $0xb0] sm:$0xff]  ;;  %5410 = vmatprep.subr.bf16.mxu1 %v5852_v44 }
  0xe6   : > { %4971 = vmatmul.mubr.msk.bf16.gmra.mrb[28].mxu0 %vm6992_vm9, %v1971_v24  ;;  %v4852_v24 = vcombine.low %v1485_v5, %v6559_v48  ;;  %v799_v20 = vsel %vm703_vm7, 1.0, %v767_v8  ;;  %830 = vst [vmem:[#allocation3 + $0xa8] sm:$0xff] %v798_v11  ;;  %v1007_v38 = vand.u32 15, %v863_v30  ;;  %v864_v41 = vadd.s32 152, %v6462_v45  ;;  %v7040_v5 = vld [vmem:[%s6388_s10] ss:$0 sm:$0xff] }
  0xe7   : > { %3165 = vmatprep.mubr.bf16.mxu0 %v6986_v59  ;;  %v672_v42 = vadd.f32 %v7040_v5, %v528_v49  ;;  %v8851_v35 = vmov 0  ;;  %v7047_v36 = vpack.c.bf16 %v797_v39, %v796_v23  ;;  %831 = vst [vmem:[#allocation3 + $0xb0] sm:$0xff] %v799_v20  ;;  %v673_v43 = vadd.f32 %v7040_v5, %v529_v50  ;;  %v7051_v8 = vld [vmem:[#allocation3 + $0x89] sm:$0xff] }
  0xe8   : > { %vm7043_vm6 = vcmp.ne.s16.totalorder %v4852_v24, 0  ;;  %v865_v33 = vadd.s32 160, %v6462_v45  ;;  %vm7053_vm4 = vcmp.gt.s32.totalorder %v1007_v38, 0  ;;  %v1014_v49 = vand.u32 15, %v864_v41  ;;  %v531_v24 = vld [vmem:[#allocation2 + $0xb8] sm:$0xff]  ;;  %v5853_v23 = vld [vmem:[%s6373_s23 + $0x1b8] sm:$0xff]  }
  0xe9   : > { %v8852_v35 = vsel %vm7043_vm6, 4294967295, %v8851_v35  ;;  %vm736_vm3 = vcmp.lt.f32.partialorder %v672_v42, 0.0  ;;  %vm7058_vm7 = vcmp.ne.s16.totalorder %v4868_v15, 0  ;;  %v8855_v50 = vmov 0  ;;  %vm1455_vm1 = vmpackc.low %vm7053_vm4, %vm7053_vm4  ;;  %5411 = vmatpush3.bf16.msra.mxu1 %v5853_v23 }
  0xea   : > { %v1949_v30 = vld [vmem:[#allocation3 + $0x97] sm:$0xff]  ;;  %v1950_v39 = vld [vmem:[#allocation3 + $0x9f] sm:$0xff]  ;;  %v8856_v50 = vsel %vm7058_vm7, 4294967295, %v8855_v50  ;;  %vm705_vm9 = vcmp.gt.f32.partialorder %v673_v43, 0.0  ;;  %vm737_vm13 = vcmp.lt.f32.partialorder %v673_v43, 0.0  ;;  %v768_v38 = vsel %vm736_vm3, -1.0, %v6953_v63 }
  0xeb   : > { %v1678_v26 = vld [vmem:[#allocation3 + $0x91] sm:$0xff]  ;;  %v1973_v41 = vpack.c.bf16 %v1950_v39, %v1949_v30  ;;  %v1487_v21 = vsel %vm1455_vm1, 65537, %v8664_v40  ;;  %vm1312_vm15 = vcmp.lt.s32.totalorder %v1014_v49, 15  ;;  %v769_v15 = vsel %vm737_vm13, -1.0, %v6953_v63 }
  0xec   : > { %v8857_v37 = vpack.c.bf16 %v7001_v18, %v6988_v3  ;;  %v4853_v44 = vcombine.low %v1487_v21, %v6559_v48  ;;  %vm1792_vm4 = vmpackc.low %vm1312_vm15, %vm1312_vm15  ;;  %vm8858_vm3 = vcmp.gt.f32.partialorder %v672_v42, 0.0  ;;  %v801_v43 = vsel %vm705_vm9, 1.0, %v769_v15 }
  0xed   : > { %v1021_v30 = vand.u32 15, %v865_v33  ;;  %v1824_v49 = vsel %vm1792_vm4, 65537, %v8664_v40  ;;  %833 = vst [vmem:[#allocation3 + $0xc0] sm:$0xff] %v801_v43  ;;  %v866_v3 = vadd.s32 168, %v6462_v45  ;;  %v674_v18 = vadd.f32 %v7040_v5, %v530_v10  ;;  %v1951_v21 = vld [vmem:[#allocation3 + $0xa7] sm:$0xff] }
  0xee   : > { %4972 = vmatmul.mubr.msk.bf16.gmra.mrb[32].mxu0 %vm7043_vm6, %v7005_v0  ;;  %4995 = vmatmul.mubr.msk.bf16.gmra.mrb[28].mxu1 %vm7031_vm0, %v8857_v37  ;;  %v800_v0 = vsel %vm8858_vm3, 1.0, %v768_v38  ;;  %v1701_v39 = vpack.c.bf16 %v1678_v26, %v7051_v8  ;;  %v7088_v37 = vpack.c.bf16 %v799_v20, %v798_v11  ;;  %v675_v42 = vadd.f32 %v7040_v5, %v531_v24  ;;  %v1952_v38 = vld [vmem:[#allocation3 + $0xaf] sm:$0xff]  ;;  %v532_v20 = vld [vmem:[#allocation2 + $0xc0] sm:$0xff] }
  0xef   : > { %3173 = vmatprep.mubr.bf16.mxu0 %v7047_v36  ;;  %4996 = vmatprep.mubr.msk.bf16.mxu1 %vm7043_vm6, %v1973_v41  ;;  %832 = vst [vmem:[#allocation3 + $0xb8] sm:$0xff] %v800_v0  ;;  %vm1281_vm13 = vcmp.gt.s32.totalorder %v1021_v30, 0  ;;  %vm7092_vm9 = vcmp.ne.s16.totalorder %v4853_v44, 0  ;;  %v8859_v33 = vmov 0  ;;  %v1028_v15 = vand.u32 15, %v866_v3  ;;  %v533_v44 = vld [vmem:[#allocation2 + $0xc8] sm:$0xff] }
  0xf0   : > { %v8860_v33 = vsel %vm7092_vm9, 4294967295, %v8859_v33  ;;  %vm1457_vm15 = vmpackc.low %vm1281_vm13, %vm1281_vm13  ;;  %vm706_vm1 = vcmp.gt.f32.partialorder %v674_v18, 0.0  ;;  %vm738_vm4 = vcmp.lt.f32.partialorder %v674_v18, 0.0  ;;  %v7096_v10 = vpack.c.bf16 %v1952_v38, %v1951_v21  ;;  %v1679_v30 = vld [vmem:[#allocation3 + $0x99] sm:$0xff]  ;;  %v1680_v3 = vld [vmem:[#allocation3 + $0xa1] sm:$0xff] }
  0xf1   : > { %v4869_v26 = vcombine.low %v6559_v48, %v1824_v49  ;;  %v1489_v11 = vsel %vm1457_vm15, 65537, %v8664_v40  ;;  %vm707_vm3 = vcmp.gt.f32.partialorder %v675_v42, 0.0  ;;  %vm7101_vm6 = vcmp.lt.s32.totalorder %v1028_v15, 15 }
  0xf2   : > { %v4854_v8 = vcombine.low %v1489_v11, %v6559_v48  ;;  %vm739_vm0 = vcmp.lt.f32.partialorder %v675_v42, 0.0  ;;  %v770_v23 = vsel %vm738_vm4, -1.0, %v6953_v63  ;;  %v867_v49 = vadd.s32 176, %v6462_v45  ;;  %vm8868_vm13 = vmpackc.low %vm7101_vm6, %vm7101_vm6 }
  0xf3   : > { %v771_v18 = vsel %vm739_vm0, -1.0, %v6953_v63  ;;  %v802_v21 = vsel %vm706_vm1, 1.0, %v770_v23  ;;  %v868_v38 = vadd.s32 184, %v6462_v45  ;;  %v676_v11 = vadd.f32 %v7040_v5, %v532_v20 }
  0xf4   : > { %v803_v15 = vsel %vm707_vm3, 1.0, %v771_v18  ;;  %834 = vst [vmem:[#allocation3 + $0xc8] sm:$0xff] %v802_v21  ;;  %v1035_v42 = vand.u32 15, %v867_v49  ;;  %v7118_v23 = vpack.c.bf16 %v1680_v3, %v1679_v30  ;;  %v677_v20 = vadd.f32 %v7040_v5, %v533_v44  ;;  %v534_v44 = vld [vmem:[#allocation2 + $0xd0] sm:$0xff] }
  0xf5   : > { %835 = vst [vmem:[#allocation3 + $0xd0] sm:$0xff] %v803_v15  ;;  %v1042_v40 = vand.u32 15, %v868_v38  ;;  %vm7126_vm15 = vcmp.ne.s16.totalorder %v4869_v26, 0  ;;  %vm7130_vm1 = vcmp.ne.s16.totalorder %v4854_v8, 0  ;;  %v8865_v18 = vmov 0 }
  0xf6   : > { %4973 = vmatmul.mubr.msk.bf16.gmra.mrb[36].mxu0 %vm7092_vm9, %v1973_v41  ;;  %4997 = vmatmul.mubr.msk.bf16.gmra.mrb[32].mxu1 %vm7058_vm7, %v1701_v39  ;;  %v7123_v41 = vpack.c.bf16 %v801_v43, %v800_v0  ;;  %v8866_v18 = vsel %vm7130_vm1, 4294967295, %v8865_v18  ;;  %v1953_v49 = vld [vmem:[#allocation3 + $0xb7] sm:$0xff]  ;;  %v1954_v30 = vld [vmem:[#allocation3 + $0xbf] sm:$0xff]  ;;  %vm1283_vm4 = vcmp.gt.s32.totalorder %v1035_v42, 0  ;;  %vm740_vm3 = vcmp.lt.f32.partialorder %v676_v11, 0.0 }
  0xf7   : > { %3181 = vmatprep.mubr.bf16.mxu0 %v7088_v37  ;;  %4998 = vmatprep.mubr.msk.bf16.mxu1 %vm7092_vm9, %v7096_v10  ;;  %vm1459_vm9 = vmpackc.low %vm1283_vm4, %vm1283_vm4  ;;  %vm709_vm7 = vcmp.gt.f32.partialorder %v677_v20, 0.0  ;;  %vm741_vm0 = vcmp.lt.f32.partialorder %v677_v20, 0.0  ;;  %v772_v0 = vsel %vm740_vm3, -1.0, %v6953_v63  ;;  %v869_v43 = vadd.s32 192, %v6462_v45  ;;  %v535_v20 = vld [vmem:[#allocation2 + $0xd8] sm:$0xff] }
  0xf8   : > { %v8867_v26 = vmov 0   ;;  %vm7142_vm11 = vcmp.lt.s32.totalorder %v1042_v40, 15  ;;  %v773_v38 = vsel %vm741_vm0, -1.0, %v6953_v63  ;;  %vm8871_vm4 = vcmp.gt.f32.partialorder %v676_v11, 0.0 }
  0xf9   : > { %v1826_v8 = vsel %vm8868_vm13, 65537, %v8867_v26  ;;  %v7148_v42 = vsel %vm8871_vm4, 1.0, %v772_v0  ;;  %v7150_v28 = vpack.c.bf16 %v1954_v30, %v1953_v49  ;;  %v1491_v61 = vsel %vm1459_vm9, 65537, %v8867_v26  ;;  %vm1796_vm6 = vmpackc.low %vm7142_vm11, %vm7142_vm11  ;;  %v536_v30 = vld [vmem:[#allocation2 + $0xe0] sm:$0xff]  ;;  %v1681_v0 = vld [vmem:[#allocation3 + $0xa9] sm:$0xff] }
  0xfa   : > { %v7153_v57 = vsel %vm709_vm7, 1.0, %v773_v38  ;;  %836 = vst [vmem:[#allocation3 + $0xd8] sm:$0xff] %v7148_v42  ;;  %v1049_v24 = vand.u32 15, %v869_v43  ;;  %v870_v40 = vadd.s32 200, %v6462_v45  ;;  %v678_v25 = vadd.f32 %v7040_v5, %v534_v44  ;;  %v537_v38 = vld [vmem:[#allocation2 + $0xe8] sm:$0xff] }
  0xfb   : > { %837 = vst [vmem:[#allocation3 + $0xe0] sm:$0xff] %v7153_v57  ;;  %v679_v49 = vadd.f32 %v7040_v5, %v535_v20  ;;  %v4870_v43 = vcombine.low %v6559_v48, %v1826_v8  ;;  %v4855_v44 = vcombine.low %v1491_v61, %v6559_v48  ;;  %v1682_v20 = vld [vmem:[#allocation3 + $0xb1] sm:$0xff]  ;;  %v1955_v8 = vld [vmem:[#allocation3 + $0xc7] sm:$0xff]  ;;  %v1828_v61 = vsel %vm1796_vm6, 65537, %v8867_v26 }
  0xfc   : > { %vm7165_vm9 = vcmp.gt.s32.totalorder %v1049_v24, 0  ;;  %vm710_vm0 = vcmp.gt.f32.partialorder %v678_v25, 0.0  ;;  %v7182_v24 = vpack.c.bf16 %v803_v15, %v802_v21  ;;  %vm742_vm3 = vcmp.lt.f32.partialorder %v678_v25, 0.0  ;;  %v1956_v17 = vld [vmem:[#allocation3 + $0xcf] sm:$0xff] }
  0xfd   : > { %vm1461_vm7 = vmpackc.low %vm7165_vm9, %vm7165_vm9  ;;  %vm711_vm13 = vcmp.gt.f32.partialorder %v679_v49, 0.0  ;;  %vm743_vm4 = vcmp.lt.f32.partialorder %v679_v49, 0.0  ;;  %v1056_v11 = vand.u32 15, %v870_v40  ;;  %v774_v9 = vsel %vm742_vm3, -1.0, %v6953_v63 }
  0xfe   : > { %4974 = vmatmul.mubr.msk.bf16.gmra.mrb[40].mxu0 %vm7130_vm1, %v7096_v10  ;;  %4999 = vmatmul.mubr.msk.bf16.gmra.mrb[36].mxu1 %vm7126_vm15, %v7118_v23  ;;  %v775_v4 = vsel %vm743_vm4, -1.0, %v6953_v63  ;;  %v1493_v21 = vsel %vm1461_vm7, 65537, %v8867_v26  ;;  %v7193_v15 = vsel %vm710_vm0, 1.0, %v774_v9  ;;  %v871_v49 = vadd.s32 208, %v6462_v45 }
  0xff   : > { %3189 = vmatprep.mubr.bf16.mxu0 %v7123_v41  ;;  %5000 = vmatprep.mubr.msk.bf16.mxu1 %vm7130_vm1, %v7150_v28  ;;  %v7195_v25 = vsel %vm711_vm13, 1.0, %v775_v4  ;;  %v7198_v31 = vpack.c.bf16 %v1682_v20, %v1681_v0  ;;  %vm7200_vm9 = vcmp.ne.s16.totalorder %v4870_v43, 0  ;;  %vm7204_vm11 = vcmp.ne.s16.totalorder %v4855_v44, 0  ;;  %838 = vst [vmem:[#allocation3 + $0xe8] sm:$0xff] %v7193_v15 }
 0x100   : > { %v8875_v22 = vsel %vm7200_vm9, 4294967295, %v8874_v22  ;;  %v8876_v3 = vmov 0  ;;  %839 = vst [vmem:[#allocation3 + $0xf0] sm:$0xff] %v7195_v25  ;;  %v680_v9 = vadd.f32 %v7040_v5, %v536_v30  ;;  %v7211_v4 = vpack.c.bf16 %v1956_v17, %v1955_v8  ;;  %v1683_v17 = vld [vmem:[#allocation3 + $0xb9] sm:$0xff]  ;;  %v1684_v30 = vld [vmem:[#allocation3 + $0xc1] sm:$0xff] }
 0x101   : > { %v8877_v3 = vsel %vm7204_vm11, 4294967295, %v8876_v3  ;;  %v4871_v40 = vcombine.low %v6559_v48, %v1828_v61  ;;  %v1063_v0 = vand.u32 15, %v871_v49  ;;  %v681_v43 = vadd.f32 %v7040_v5, %v537_v38 }
 0x102   : > { %v4856_v20 = vcombine.low %v1493_v21, %v6559_v48  ;;  %vm7216_vm6 = vcmp.lt.s32.totalorder %v1056_v11, 15  ;;  %vm712_vm7 = vcmp.gt.f32.partialorder %v680_v9, 0.0  ;;  %vm744_vm0 = vcmp.lt.f32.partialorder %v680_v9, 0.0  ;;  %v1958_v13 = vld [vmem:[#allocation3 + $0xdf] sm:$0xff] }
 0x103   : > { %vm7223_vm13 = vcmp.gt.s32.totalorder %v1063_v0, 0  ;;  %vm713_vm3 = vcmp.gt.f32.partialorder %v681_v43, 0.0  ;;  %vm745_vm4 = vcmp.lt.f32.partialorder %v681_v43, 0.0  ;;  %v776_v38 = vsel %vm744_vm0, -1.0, %v6953_v63  ;;  %v1957_v43 = vld [vmem:[#allocation3 + $0xd7] sm:$0xff] }
 0x104   : > { %v872_v61 = vadd.s32 216, %v6462_v45  ;;  %v777_v11 = vsel %vm745_vm4, -1.0, %v6953_v63  ;;  %v7234_v21 = vsel %vm712_vm7, 1.0, %v776_v38  ;;  %v873_v49 = vadd.s32 224, %v6462_v45  ;;  %vm1463_vm0 = vmpackc.low %vm7223_vm13, %vm7223_vm13 }
 0x105   : > { %v7240_v9 = vsel %vm713_vm3, 1.0, %v777_v11  ;;  %840 = vst [vmem:[#allocation3 + $0xf8] sm:$0xff] %v7234_v21  ;;  %v682_v0 = vadd.f32 %v7040_v5, %v538_v55  ;;  %v7248_v38 = vpack.c.bf16 %v1684_v30, %v1683_v17  ;;  %vm1798_vm7 = vmpackc.low %vm7216_vm6, %vm7216_vm6  ;;  %v7255_v11 = vpack.c.bf16 %v7153_v57, %v7148_v42 }
 0x106   : > { %4975 = vmatmul.mubr.msk.bf16.gmra.mrb[44].mxu0 %vm7204_vm11, %v7150_v28  ;;  %5001 = vmatmul.mubr.msk.bf16.gmra.mrb[40].mxu1 %vm7200_vm9, %v7198_v31  ;;  %841 = vst [vmem:[#allocation3 + $0x100] sm:$0xff] %v7240_v9  ;;  %v1077_v12 = vand.u32 15, %v873_v49  ;;  %v683_v55 = vadd.f32 %v7040_v5, %v539_v51  ;;  %vm7258_vm3 = vcmp.ne.s16.totalorder %v4871_v40, 0  ;;  %vm7262_vm13 = vcmp.ne.s16.totalorder %v4856_v20, 0  ;;  %v2299_v5 = vld [vmem:[#allocation3 + $0x119] sm:$0xff] }
 0x107   : > { %3197 = vmatprep.mubr.bf16.mxu0 %v7182_v24  ;;  %5002 = vmatprep.mubr.msk.bf16.mxu1 %vm7204_vm11, %v7211_v4  ;;  %v8884_v8 = vmov 0  ;;  %v1070_v17 = vand.u32 15, %v872_v61  ;;  %vm714_vm4 = vcmp.gt.f32.partialorder %v682_v0, 0.0  ;;  %v7266_v44 = vpack.c.bf16 %v1958_v13, %v1957_v43 }
 0x108   : > { %v8885_v8 = vsel %vm7262_vm13, 4294967295, %v8884_v8  ;;  %v1495_v30 = vsel %vm1463_vm0, 65537, %v8867_v26  ;;  %vm715_vm6 = vcmp.gt.f32.partialorder %v683_v55, 0.0  ;;  %vm746_vm11 = vcmp.lt.f32.partialorder %v682_v0, 0.0  ;;  %v1686_v0 = vld [vmem:[#allocation3 + $0xd1] sm:$0xff] }
 0x109   : > { %8886 = vst [vmem:[#allocation46_spill] sm:$0xff] %v8885_v8  ;;  %v1830_v57 = vsel %vm1798_vm7, 65537, %v8867_v26  ;;  %vm747_vm1 = vcmp.lt.f32.partialorder %v683_v55, 0.0  ;;  %v778_v51 = vsel %vm746_vm11, -1.0, %v6953_v63  ;;  %vm7274_vm9 = vcmp.gt.s32.totalorder %v1077_v12, 0  ;;  %v1959_v55 = vld [vmem:[#allocation3 + $0xe7] sm:$0xff] }
 0x10a   : > { %v779_v13 = vsel %vm747_vm1, -1.0, %v6953_v63  ;;  %v7279_v42 = vsel %vm714_vm4, 1.0, %v778_v51  ;;  %v875_v40 = vadd.s32 240, %v6462_v45  ;;  %v4857_v20 = vcombine.low %v1495_v30, %v6559_v48  ;;  %v1685_v63 = vld [vmem:[#allocation3 + $0xc9] sm:$0xff]  ;;  %vm1465_vm1 = vmpackc.low %vm7274_vm9, %vm7274_vm9 }
 0x10b   : > { %vm7287_vm11 = vcmp.lt.s32.totalorder %v1070_v17, 15  ;;  %v874_v12 = vadd.s32 232, %v6462_v45  ;;  %v7292_v49 = vsel %vm715_vm6, 1.0, %v779_v13  ;;  %842 = vst [vmem:[#allocation3 + $0x108] sm:$0xff] %v7279_v42  ;;  %v4872_v43 = vcombine.low %v6559_v48, %v1830_v57  ;;  %v1960_v17 = vld [vmem:[#allocation3 + $0xef] sm:$0xff] }
 0x10c   : > { %843 = vst [vmem:[#allocation3 + $0x110] sm:$0xff] %v7292_v49  ;;  %vm1800_vm0 = vmpackc.low %vm7287_vm11, %vm7287_vm11  ;;  %v1091_v30 = vand.u32 15, %v875_v40  ;;  %v7306_v51 = vpack.c.bf16 %v1686_v0, %v1685_v63  ;;  %vm7308_vm7 = vcmp.ne.s16.totalorder %v4857_v20, 0  ;;  %v8891_v13 = vmov 0  ;;  %v1687_v63 = vld [vmem:[#allocation3 + $0xd9] sm:$0xff]  ;;  %v1688_v0 = vld [vmem:[#allocation3 + $0xe1] sm:$0xff] }
 0x10d   : > { %v8892_v13 = vsel %vm7308_vm7, 4294967295, %v8891_v13  ;;  %v7314_v57 = vpack.c.bf16 %v7195_v25, %v7193_v15  ;;  %v1084_v46 = vand.u32 15, %v874_v12  ;;  %vm7316_vm4 = vcmp.ne.s16.totalorder %v4872_v43, 0 }
 0x10e   : > { %4976 = vmatmul.mubr.msk.bf16.gmra.mrb[48].mxu0 %vm7262_vm13, %v7211_v4  ;;  %5003 = vmatmul.mubr.msk.bf16.gmra.mrb[44].mxu1 %vm7258_vm3, %v7248_v38  ;;  %8893 = vst [vmem:[#allocation47_spill] sm:$0xff] %v8892_v13  ;;  %v7320_v34 = vpack.c.bf16 %v1960_v17, %v1959_v55  ;;  %v1497_v61 = vsel %vm1465_vm1, 65537, %v8867_v26  ;;  %v1832_v40 = vsel %vm1800_vm0, 65537, %v8867_v26  ;;  %vm7327_vm9 = vcmp.gt.s32.totalorder %v1091_v30, 0  ;;  %v1961_v55 = vld [vmem:[#allocation3 + $0xf7] sm:$0xff]  ;;  %v1962_v17 = vld [vmem:[#allocation3 + $0xff] sm:$0xff] }
 0x10f   : > { %3205 = vmatprep.mubr.bf16.mxu0 %v7255_v11  ;;  %5004 = vmatprep.mubr.msk.bf16.mxu1 %vm7262_vm13, %v7266_v44  ;;  %v4858_v15 = vcombine.low %v1497_v61, %v6559_v48  ;;  %vm7336_vm6 = vcmp.lt.s32.totalorder %v1084_v46, 15  ;;  %v876_v12 = vadd.s32 248, %v6462_v45  ;;  %v4873_v43 = vcombine.low %v6559_v48, %v1832_v40  ;;  %vm1467_vm11 = vmpackc.low %vm7327_vm9, %vm7327_vm9 }
 0x110   : > { %vm1802_vm1 = vmpackc.low %vm7336_vm6, %vm7336_vm6  ;;  %v7353_v46 = vpack.c.bf16 %v7240_v9, %v7234_v21  ;;  %v7355_v30 = vpack.c.bf16 %v1688_v0, %v1687_v63  ;;  %v8901_v61 = vmov 0  ;;  %v7365_v20 = vpack.c.bf16 %v1962_v17, %v1961_v55  ;;  %v1690_v63 = vld [vmem:[#allocation3 + $0xf1] sm:$0xff] }
 0x111   : > { %vm7357_vm0 = vcmp.ne.s16.totalorder %v4858_v15, 0  ;;  %v1098_v40 = vand.u32 15, %v876_v12  ;;  %v1499_v25 = vsel %vm1467_vm11, 65537, %v8867_v26  ;;  %v1834_v13 = vsel %vm1802_vm1, 65537, %v8867_v26  ;;  %v2045_v15 = vld [vmem:[#allocation3 + $0x19] sm:$0xff]  ;;  %v1689_v12 = vld [vmem:[#allocation3 + $0xe9] sm:$0xff] }
 0x112   : > { %8900 = vst [vmem:[#allocation48_spill] sm:$0xff] %v7353_v46  ;;  %v8902_v61 = vsel %vm7357_vm0, 4294967295, %v8901_v61  ;;  %v4859_v21 = vcombine.low %v1499_v25, %v6559_v48  ;;  %v4874_v0 = vcombine.low %v6559_v48, %v1834_v13  ;;  %v1963_v55 = vld [vmem:[#allocation3 + $0x107] sm:$0xff]  ;;  %v8908_v25 = vmov 0 }
 0x113   : > { %8903 = vst [vmem:[#allocation49_spill] sm:$0xff] %v8902_v61  ;;  %vm7377_vm9 = vcmp.lt.s32.totalorder %v1098_v40, 15  ;;  %v1964_v17 = vld [vmem:[#allocation3 + $0x10f] sm:$0xff]  ;;  %v7388_v40 = vpack.c.bf16 %v1690_v63, %v1689_v12  ;;  %v7406_v9 = vpack.c.bf16 %v7292_v49, %v7279_v42 }
 0x114   : > { %vm1804_vm6 = vmpackc.low %vm7377_vm9, %vm7377_vm9  ;;  %vm7390_vm11 = vcmp.ne.s16.totalorder %v4859_v21, 0  ;;  %vm7394_vm1 = vcmp.ne.s16.totalorder %v4874_v0, 0  ;;  %v7398_v8 = vpack.c.bf16 %v1964_v17, %v1963_v55  ;;  %v1692_v21 = vld [vmem:[#allocation3 + $0x101] sm:$0xff]  ;;  %v2206_v63 = vld [vmem:[#allocation3 + $0x30] sm:$0xff] }
 0x115   : > { %v8909_v25 = vsel %vm7390_vm11, 4294967295, %v8908_v25  ;;  %v1836_v13 = vsel %vm1804_vm6, 65537, %v8867_v26  ;;  %v1691_v26 = vld [vmem:[#allocation3 + $0xf9] sm:$0xff]  ;;  %v2205_v12 = vld [vmem:[#allocation3 + $0x28] sm:$0xff]  ;;  %v2048_v49 = vld [vmem:[#allocation3 + $0x31] sm:$0xff]  ;;  %vm8919_vm6 = vnez %v8814_v58 }
 0x116   : > { %4977 = vmatmul.mubr.msk.bf16.gmra.mrb[52].mxu0 %vm7308_vm7, %v7266_v44  ;;  %5005 = vmatmul.mubr.msk.bf16.gmra.mrb[48].mxu1 %vm7316_vm4, %v7306_v51  ;;  %8910 = vst [vmem:[#allocation50_spill] sm:$0xff] %v8909_v25  ;;  %8913 = vst [vmem:[#allocation51_spill] sm:$0xff] %v7398_v8  ;;  %v2047_v42 = vld [vmem:[#allocation3 + $0x29] sm:$0xff]  ;;  %v5868_v0 = vld [vmem:[#allocation3 + $0x18] sm:$0xff]  ;;  %v7417_v17 = vpack.c.bf16 %v1692_v21, %v1691_v26  ;;  %v2237_v25 = vpack.c.bf16 %v2206_v63, %v2205_v12 }
 0x117   : > { %3213 = vmatprep.mubr.bf16.mxu0 %v7314_v57  ;;  %5006 = vmatprep.mubr.msk.bf16.mxu1 %vm7308_vm7, %v7320_v34  ;;  %vm7361_vm7 = vcmp.ne.s16.totalorder %v4873_v43, 0  ;;  %v2046_v43 = vld [vmem:[#allocation3 + $0x21] sm:$0xff]  ;;  %v7423_v6 = vpack.c.bf16 %v2048_v49, %v2047_v42  ;;  %v2049_v26 = vld [vmem:[#allocation3 + $0x39] sm:$0xff]  ;;  %v5871_v49 = vld [vmem:[#allocation3 + $0x30] sm:$0xff] }
 0x118   : > { %v2050_v21 = vld [vmem:[#allocation3 + $0x41] sm:$0xff]  ;;  %v2207_v12 = vld [vmem:[#allocation3 + $0x38] sm:$0xff] }
 0x119   : > { %8916 = vst [vmem:[#allocation52_spill] sm:$0xff] %v7423_v6  ;;  %v2208_v63 = vld [vmem:[#allocation3 + $0x40] sm:$0xff]  ;;  %v5870_v42 = vld [vmem:[#allocation3 + $0x28] sm:$0xff]  ;;  %v2135_v58 = vld [vmem:[#allocation3 + $0x77] sm:$0xff] }
 0x11e   : > { %4978 = vmatmul.mubr.msk.bf16.gmra.mrb[56].mxu0 %vm7357_vm0, %v7320_v34  ;;  %5007 = vmatmul.mubr.msk.bf16.gmra.mrb[52].mxu1 %vm7361_vm7, %v7355_v30 }
 0x11f   : > { %3221 = vmatprep.mubr.bf16.mxu0 %v7353_v46  ;;  %5008 = vmatprep.mubr.msk.bf16.mxu1 %vm7357_vm0, %v7365_v20  ;;  %v2077_v46 = vpack.c.bf16 %v2046_v43, %v2045_v15  ;;  %v4875_v15 = vcombine.low %v6559_v48, %v1836_v13  ;;  %v5869_v43 = vld [vmem:[#allocation3 + $0x20] sm:$0xff]  ;;  %v2126_v13 = vld [vmem:[#allocation3 + $0x2f] sm:$0xff] }
 0x120   : > { %v2013_v55 = vpack.c.bf16 %v5869_v43, %v5868_v0  ;;  %v2125_v48 = vld [vmem:[#allocation3 + $0x27] sm:$0xff]  ;;  %v2014_v0 = vpack.c.bf16 %v5871_v49, %v5870_v42 }
 0x121   : > { %vm7419_vm9 = vcmp.ne.s16.totalorder %v4875_v15, 0  ;;  %v5856_v15 = vld [vmem:[%s6373_s23 + $0x210] sm:$0xff]   ;;  %v2157_v43 = vpack.c.bf16 %v2126_v13, %v2125_v48  ;;  %v2051_v48 = vld [vmem:[#allocation3 + $0x49] sm:$0xff]  ;;  %v2052_v13 = vld [vmem:[#allocation3 + $0x51] sm:$0xff] }
 0x122   : > { %v7443_v49 = vpack.c.bf16 %v2052_v13, %v2051_v48  ;;  %v2211_v48 = vld [vmem:[#allocation3 + $0x58] sm:$0xff]  ;;  %v2212_v13 = vld [vmem:[#allocation3 + $0x60] sm:$0xff] }
 0x126   : > { %4979 = vmatmul.mubr.msk.bf16.gmra.mrb[60].mxu0 %vm7390_vm11, %v7365_v20  ;;  %5009 = vmatmul.mubr.msk.bf16.gmra.mrb[56].mxu1 %vm7394_vm1, %v7388_v40 }
 0x127   : > { %5012 = vmatprep.mubr.msk.bf16.mxu0 %vm6596_vm8, %v2077_v46  ;;  %5010 = vmatprep.mubr.msk.bf16.mxu1 %vm7390_vm11, %v7398_v8  ;;  %v5855_v8 = vld [vmem:[%s6373_s23 + $0x208] sm:$0xff]  }
 0x12e   : > { %3424 = vmatmul.mubr.bf16.vlgmr.msra.gmra.mrb[64].mxu0 %v2013_v55  ;;  %5011 = vmatmul.mubr.msk.bf16.gmra.mrb[60].mxu1 %vm7419_vm9, %v7417_v17  ;;  %v7434_v55 = vpack.c.bf16 %v2050_v21, %v2049_v26  ;;  %v2210_v26 = vld [vmem:[#allocation3 + $0x50] sm:$0xff] }
 0x12f   : > { %5553 = vmatpush3.bf16.msra.mxu0 %v7072_v56  ;;  %3584 = vmatprep.mubr.bf16.mxu1 %v2237_v25  ;;  %v2238_v56 = vpack.c.bf16 %v2208_v63, %v2207_v12  ;;  %v5857_v25 = vld [vmem:[%s6373_s23 + $0x218] sm:$0xff]   ;;  %v5858_v21 = vld [vmem:[%s6373_s23 + $0x220] sm:$0xff]   ;;  %v5872_v12 = vld [vmem:[#allocation3 + $0x38] sm:$0xff] }
 0x130   : > { %5013 = vmatprep.mubr.msk.bf16.mxu0 %vm6687_vm10, %v7423_v6  ;;  %5554 = vmatprep.subr.bf16.mxu0 %v5855_v8  ;;  %v2128_v6 = vld [vmem:[#allocation3 + $0x3f] sm:$0xff] }
 0x131   : > { %v5873_v63 = vld [vmem:[#allocation3 + $0x40] sm:$0xff]  ;;  %v2158_v62 = vpack.c.bf16 %v2128_v6, %v2127_v1 }
 0x132   : > { %v2015_v42 = vpack.c.bf16 %v5873_v63, %v5872_v12  ;;  %v2053_v6 = vld [vmem:[#allocation3 + $0x59] sm:$0xff]  ;;  %v2054_v1 = vld [vmem:[#allocation3 + $0x61] sm:$0xff] }
 0x133   : > { %5555 = vmatpush3.bf16.msra.mxu0 %v5855_v8  ;;  %v2209_v8 = vld [vmem:[#allocation3 + $0x48] sm:$0xff]  ;;  %v7452_v63 = vpack.c.bf16 %v2054_v1, %v2053_v6  ;;  %v5877_v6 = vld [vmem:[#allocation3 + $0x60] sm:$0xff] }
 0x134   : > { %5556 = vmatprep.subr.bf16.mxu0 %v5856_v15 }
 0x136   : > { %3432 = vmatmul.mubr.bf16.gmra.mrb[68].mxu0 %v2014_v0  ;;  %5028 = vmatmul.mubr.msk.bf16.vlgmr.msra.gmra.mrb[64].mxu1 %vm6579_vm2, %v2157_v43  ;;  %v2239_v0 = vpack.c.bf16 %v2210_v26, %v2209_v8  ;;  %v5859_v43 = vld [vmem:[%s6373_s23 + $0x228] sm:$0xff]   ;;  %v5874_v8 = vld [vmem:[#allocation3 + $0x48] sm:$0xff]  ;;  %v5875_v26 = vld [vmem:[#allocation3 + $0x50] sm:$0xff]  ;;  %vm8917_vm2 = vnez %v8808_v16 }
 0x137   : > { %5014 = vmatprep.mubr.msk.bf16.mxu0 %vm6714_vm12, %v7434_v55  ;;  %3592 = vmatprep.mubr.bf16.mxu1 %v2238_v56  ;;  %v2130_v56 = vld [vmem:[#allocation3 + $0x4f] sm:$0xff]  ;;  %v2016_v12 = vpack.c.bf16 %v5875_v26, %v5874_v8  ;;  %v2133_v26 = vld [vmem:[#allocation3 + $0x67] sm:$0xff] }
 0x138   : > { %5557 = vmatpush3.bf16.msra.mxu0 %v5856_v15  ;;  %v2129_v15 = vld [vmem:[#allocation3 + $0x47] sm:$0xff]  ;;  %v2056_v8 = vld [vmem:[#allocation3 + $0x71] sm:$0xff] }
 0x139   : > { %5558 = vmatprep.subr.bf16.mxu0 %v5857_v25  ;;  %v2159_v14 = vpack.c.bf16 %v2130_v56, %v2129_v15  ;;  %v2213_v15 = vld [vmem:[#allocation3 + $0x68] sm:$0xff]  ;;  %v2214_v56 = vld [vmem:[#allocation3 + $0x70] sm:$0xff] }
 0x13a   : > { %v2241_v16 = vpack.c.bf16 %v2214_v56, %v2213_v15  ;;  %v2136_v56 = vld [vmem:[#allocation3 + $0x7f] sm:$0xff] }
 0x13c   : > { %5559 = vmatpush3.bf16.msra.mxu0 %v5857_v25  ;;  %v5860_v25 = vld [vmem:[%s6373_s23 + $0x230] sm:$0xff]  }
 0x13d   : > { %5560 = vmatprep.subr.bf16.mxu0 %v5858_v21 }
 0x13e   : > { %3440 = vmatmul.mubr.bf16.gmra.mrb[72].mxu0 %v2015_v42  ;;  %5029 = vmatmul.mubr.msk.bf16.gmra.mrb[68].mxu1 %vm6623_vm14, %v2158_v62  ;;  %v2240_v42 = vpack.c.bf16 %v2212_v13, %v2211_v48  ;;  %v5861_v62 = vld [vmem:[%s6373_s23 + $0x238] sm:$0xff]   ;;  %vm8918_vm14 = vnez %v8829_v19  ;;  %v7460_v13 = vpack.c.bf16 %v2056_v8, %v2055_v53  ;;  %v5879_v53 = vld [vmem:[#allocation3 + $0x70] sm:$0xff] }
 0x13f   : > { %5015 = vmatprep.mubr.msk.bf16.mxu0 %vm6781_vm5, %v7443_v49  ;;  %3600 = vmatprep.mubr.bf16.mxu1 %v2239_v0  ;;  %v2131_v0 = vld [vmem:[#allocation3 + $0x57] sm:$0xff]  ;;  %vm8926_vm5 = vnez %v8856_v50 }
 0x140   : > { %5561 = vmatpush3.bf16.msra.mxu0 %v5858_v21  ;;  %v2132_v21 = vld [vmem:[#allocation3 + $0x5f] sm:$0xff] }
 0x141   : > { %5562 = vmatprep.subr.bf16.mxu0 %v5859_v43  ;;  %v2160_v48 = vpack.c.bf16 %v2132_v21, %v2131_v0  ;;  %v5878_v0 = vld [vmem:[#allocation3 + $0x68] sm:$0xff] }
 0x142   : > { %v2018_v21 = vpack.c.bf16 %v5879_v53, %v5878_v0  ;;  %v5880_v0 = vld [vmem:[#allocation3 + $0x78] sm:$0xff] }
 0x143   : > { %v2219_v53 = vld [vmem:[#allocation3 + $0x98] sm:$0xff] }
 0x144   : > { %5563 = vmatpush3.bf16.msra.mxu0 %v5859_v43  ;;  %v5876_v43 = vld [vmem:[#allocation3 + $0x58] sm:$0xff] }
 0x145   : > { %5564 = vmatprep.subr.bf16.mxu0 %v5860_v25  ;;  %v2017_v1 = vpack.c.bf16 %v5877_v6, %v5876_v43  ;;  %v2216_v43 = vld [vmem:[#allocation3 + $0x80] sm:$0xff]  ;;  %v2059_v6 = vld [vmem:[#allocation3 + $0x89] sm:$0xff] }
 0x146   : > { %3448 = vmatmul.mubr.bf16.gmra.mrb[76].mxu0 %v2016_v12  ;;  %5030 = vmatmul.mubr.msk.bf16.gmra.mrb[72].mxu1 %vm8917_vm2, %v2159_v14  ;;  %vm8920_vm2 = vnez %v8837_v29  ;;  %v2057_v12 = vld [vmem:[#allocation3 + $0x79] sm:$0xff]  ;;  %v2058_v14 = vld [vmem:[#allocation3 + $0x81] sm:$0xff] }
 0x147   : > { %5016 = vmatprep.mubr.msk.bf16.mxu0 %vm8918_vm14, %v7452_v63  ;;  %3608 = vmatprep.mubr.bf16.mxu1 %v2240_v42  ;;  %v2215_v42 = vld [vmem:[#allocation3 + $0x78] sm:$0xff]  ;;  %vm8925_vm14 = vnez %v8841_v60 }
 0x148   : > { %5565 = vmatpush3.bf16.msra.mxu0 %v5860_v25  ;;  %v2134_v25 = vld [vmem:[#allocation3 + $0x6f] sm:$0xff]  ;;  %v2242_v15 = vpack.c.bf16 %v2216_v43, %v2215_v42 }
 0x149   : > { %5566 = vmatprep.subr.bf16.mxu0 %v5861_v62  ;;  %v2161_v8 = vpack.c.bf16 %v2134_v25, %v2133_v26  ;;  %v5881_v26 = vld [vmem:[#allocation3 + $0x80] sm:$0xff]  ;;  %v2138_v43 = vld [vmem:[#allocation3 + $0x8f] sm:$0xff] }
 0x14a   : > { %v2019_v25 = vpack.c.bf16 %v5881_v26, %v5880_v0 }
 0x14c   : > { %5567 = vmatpush3.bf16.msra.mxu0 %v5861_v62  ;;  %v7467_v62 = vpack.c.bf16 %v2058_v14, %v2057_v12  ;;  %v2162_v12 = vpack.c.bf16 %v2136_v56, %v2135_v58  ;;  %v2140_v58 = vld [vmem:[#allocation3 + $0x9f] sm:$0xff]  ;;  %v2221_v56 = vld [vmem:[#allocation3 + $0xa8] sm:$0xff] }
 0x14e   : > { %3456 = vmatmul.mubr.bf16.gmra.mrb[80].mxu0 %v2017_v1  ;;  %5031 = vmatmul.mubr.msk.bf16.gmra.mrb[76].mxu1 %vm8919_vm6, %v2160_v48  ;;  %vm8921_vm6 = vnez %v8821_v32  ;;  %v2060_v1 = vld [vmem:[#allocation3 + $0x91] sm:$0xff]  ;;  %v2217_v48 = vld [vmem:[#allocation3 + $0x88] sm:$0xff] }
 0x14f   : > { %5017 = vmatprep.mubr.msk.bf16.mxu0 %vm8920_vm2, %v7460_v13  ;;  %3616 = vmatprep.mubr.bf16.mxu1 %v2241_v16  ;;  %vm8922_vm2 = vnez %v8844_v52  ;;  %v2218_v16 = vld [vmem:[#allocation3 + $0x90] sm:$0xff]  ;;  %v7474_v14 = vpack.c.bf16 %v2060_v1, %v2059_v6  ;;  %v2137_v32 = vld [vmem:[#allocation3 + $0x87] sm:$0xff] }
 0x150   : > { %v2243_v42 = vpack.c.bf16 %v2218_v16, %v2217_v48  ;;  %v2222_v6 = vld [vmem:[#allocation3 + $0xb0] sm:$0xff] }
 0x151   : > { %v2245_v48 = vpack.c.bf16 %v2222_v6, %v2221_v56  ;;  %v2075_v56 = vld [vmem:[#allocation3 + $0x109] sm:$0xff]  ;;  %v2076_v6 = vld [vmem:[#allocation3 + $0x111] sm:$0xff] }
 0x156   : > { %3464 = vmatmul.mubr.bf16.gmra.mrb[84].mxu0 %v2018_v21  ;;  %5032 = vmatmul.mubr.msk.bf16.gmra.mrb[80].mxu1 %vm8921_vm6, %v2161_v8  ;;  %vm8923_vm6 = vnez %v8831_v54  ;;  %v2220_v21 = vld [vmem:[#allocation3 + $0xa0] sm:$0xff]  ;;  %v2163_v8 = vpack.c.bf16 %v2138_v43, %v2137_v32  ;;  %v2139_v54 = vld [vmem:[#allocation3 + $0x97] sm:$0xff] }
 0x157   : > { %5018 = vmatprep.mubr.msk.bf16.mxu0 %vm8922_vm2, %v7467_v62  ;;  %3624 = vmatprep.mubr.bf16.mxu1 %v2242_v15  ;;  %vm8924_vm2 = vnez %v8850_v2  ;;  %v2244_v15 = vpack.c.bf16 %v2220_v21, %v2219_v53  ;;  %v2164_v1 = vpack.c.bf16 %v2140_v58, %v2139_v54  ;;  %v8934_v58 = vld [vmem:[#allocation48_spill] sm:$0xff] }
 0x15e   : > { %3472 = vmatmul.mubr.bf16.gmra.mrb[88].mxu0 %v2019_v25  ;;  %5033 = vmatmul.mubr.msk.bf16.gmra.mrb[84].mxu1 %vm8923_vm6, %v2162_v12  ;;  %vm8927_vm6 = vnez %v8846_v7 }
 0x15f   : > { %5019 = vmatprep.mubr.msk.bf16.mxu0 %vm8924_vm2, %v7474_v14  ;;  %3632 = vmatprep.mubr.bf16.mxu1 %v2243_v42 }
 0x166   : > { %3480 = vmatmul.mubr.bf16.gmra.mrb[92].mxu0 %v6986_v59  ;;  %5034 = vmatmul.mubr.msk.bf16.gmra.mrb[88].mxu1 %vm8925_vm14, %v2163_v8  ;;  %vm8928_vm14 = vnez %v8852_v35 }
 0x167   : > { %5020 = vmatprep.mubr.msk.bf16.mxu0 %vm8926_vm5, %v7118_v23  ;;  %3640 = vmatprep.mubr.bf16.mxu1 %v2244_v15  ;;  %vm8929_vm5 = vnez %v8875_v22 }
 0x16e   : > { %3488 = vmatmul.mubr.bf16.gmra.mrb[96].mxu0 %v7047_v36  ;;  %5035 = vmatmul.mubr.msk.bf16.gmra.mrb[92].mxu1 %vm8927_vm6, %v2164_v1  ;;  %vm8930_vm6 = vnez %v8860_v33 }
 0x16f   : > { %5021 = vmatprep.mubr.msk.bf16.mxu0 %vm7126_vm15, %v7198_v31  ;;  %3648 = vmatprep.mubr.bf16.mxu1 %v2245_v48 }
 0x176   : > { %3496 = vmatmul.mubr.bf16.gmra.mrb[100].mxu0 %v7088_v37  ;;  %5036 = vmatmul.mubr.msk.bf16.gmra.mrb[96].mxu1 %vm8928_vm14, %v7096_v10  ;;  %vm8931_vm14 = vnez %v8866_v18 }
 0x177   : > { %5022 = vmatprep.mubr.msk.bf16.mxu0 %vm8929_vm5, %v7248_v38  ;;  %3656 = vmatprep.mubr.bf16.mxu1 %v7123_v41 }
 0x17e   : > { %3504 = vmatmul.mubr.bf16.gmra.mrb[104].mxu0 %v7123_v41  ;;  %5037 = vmatmul.mubr.msk.bf16.gmra.mrb[100].mxu1 %vm8930_vm6, %v7150_v28  ;;  %vm8932_vm6 = vnez %v8877_v3 }
 0x17f   : > { %5023 = vmatprep.mubr.msk.bf16.mxu0 %vm7258_vm3, %v7306_v51  ;;  %3664 = vmatprep.mubr.bf16.mxu1 %v7182_v24 }
 0x181   : > { %v5076_v31 = vpop.f32.mrb[0].mxu0 }
 0x182   : > { %v5077_v60 = vpop.f32.mrb[1].mxu0 }
 0x183   : > { %v5078_v59 = vadd.f32 %v5077_v60, %v5076_v31  ;;  %v5079_v7 = vpop.f32.mrb[2].mxu0 }
 0x184   : > { %v5080_v35 = vpop.f32.mrb[3].mxu0  ;;  %v5188_v37 = vpop.f32.mrb[0].mxu1 }
 0x185   : > { %v5081_v36 = vadd.f32 %v5080_v35, %v5079_v7  ;;  %v5189_v10 = vpop.f32.mrb[1].mxu1  ;;  %v7541_v7 = vpack.c.bf16 %v2076_v6, %v2075_v56  ;;  %v2156_v56 = vld [vmem:[#allocation3 + $0x11f] sm:$0xff] }
 0x186   : > { %3512 = vmatmul.mubr.bf16.gmra.mrb[108].mxu0 %v7182_v24  ;;  %5038 = vmatmul.mubr.msk.bf16.gmra.mrb[104].mxu1 %vm8931_vm14, %v7211_v4  ;;  %v5190_v38 = vadd.f32 %v5189_v10, %v5188_v37  ;;  %v5191_v51 = vpop.f32.mrb[2].mxu1 }
 0x187   : > { %5024 = vmatprep.mubr.msk.bf16.mxu0 %vm7316_vm4, %v7355_v30  ;;  %3672 = vmatprep.mubr.bf16.mxu1 %v7255_v11  ;;  %v5192_v24 = vpop.f32.mrb[3].mxu1 }
 0x188   : > { %v7517_v26 = vadd.f32 %v5190_v38, %v5078_v59  ;;  %v5193_v18 = vadd.f32 %v5192_v24, %v5191_v51 }
 0x189   : > { %v5082_v28 = vpop.f32.mrb[4].mxu0 }
 0x18a   : > { %v5083_v33 = vpop.f32.mrb[5].mxu0  ;;  %v7526_v4 = vadd.f32 %v5193_v18, %v5081_v36 }
 0x18b   : > { %v5084_v23 = vadd.f32 %v5083_v33, %v5082_v28  ;;  %v5085_v41 = vpop.f32.mrb[6].mxu0 }
 0x18c   : > { %v5086_v16 = vpop.f32.mrb[7].mxu0  ;;  %v5194_v25 = vpop.f32.mrb[4].mxu1 }
 0x18d   : > { %v5087_v0 = vadd.f32 %v5086_v16, %v5085_v41  ;;  %v5195_v42 = vpop.f32.mrb[5].mxu1 }
 0x18e   : > { %3520 = vmatmul.mubr.bf16.gmra.mrb[112].mxu0 %v7255_v11  ;;  %5039 = vmatmul.mubr.msk.bf16.gmra.mrb[108].mxu1 %vm8932_vm6, %v7266_v44  ;;  %v5196_v53 = vadd.f32 %v5195_v42, %v5194_v25  ;;  %v5197_v11 = vpop.f32.mrb[6].mxu1  ;;  %v7555_v42 = vld [vmem:[#allocation3 + $0x8] sm:$0xff] }
 0x18f   : > { %5025 = vmatprep.mubr.msk.bf16.mxu0 %vm7361_vm7, %v7388_v40  ;;  %3680 = vmatprep.mubr.bf16.mxu1 %v7314_v57  ;;  %v5198_v8 = vpop.f32.mrb[7].mxu1 }
 0x190   : > { %v7529_v44 = vadd.f32 %v5196_v53, %v5084_v23  ;;  %v5199_v15 = vadd.f32 %v5198_v8, %v5197_v11  ;;  %v8935_v23 = vld [vmem:[#allocation47_spill] sm:$0xff] }
 0x191   : > { %v5088_v30 = vpop.f32.mrb[8].mxu0 }
 0x192   : > { %v5089_v12 = vpop.f32.mrb[9].mxu0  ;;  %v7538_v54 = vadd.f32 %v5199_v15, %v5087_v0 }
 0x193   : > { %v5090_v32 = vadd.f32 %v5089_v12, %v5088_v30  ;;  %v5091_v43 = vpop.f32.mrb[10].mxu0 }
 0x194   : > { %v5092_v21 = vpop.f32.mrb[11].mxu0  ;;  %v5200_v48 = vpop.f32.mrb[8].mxu1 }
 0x195   : > { %v5093_v3 = vadd.f32 %v5092_v21, %v5091_v43  ;;  %v5201_v60 = vpop.f32.mrb[9].mxu1  ;;  %v8937_v21 = vld [vmem:[#allocation51_spill] sm:$0xff] }
 0x196   : > { %3528 = vmatmul.mubr.bf16.gmra.mrb[116].mxu0 %v7314_v57  ;;  %5040 = vmatmul.mubr.msk.bf16.gmra.mrb[112].mxu1 %vm7262_vm13, %v7320_v34  ;;  %v5202_v35 = vadd.f32 %v5201_v60, %v5200_v48  ;;  %v5203_v34 = vpop.f32.mrb[10].mxu1  ;;  %vm8936_vm13 = vnez %v8935_v23 }
 0x197   : > { %5026 = vmatprep.mubr.msk.bf16.mxu0 %vm7394_vm1, %v7417_v17  ;;  %3688 = vmatprep.mubr.bf16.mxu1 %v8934_v58  ;;  %v5204_v28 = vpop.f32.mrb[11].mxu1 }
 0x198   : > { %v7543_v33 = vadd.f32 %v5202_v35, %v5090_v32  ;;  %v5205_v10 = vadd.f32 %v5204_v28, %v5203_v34 }
 0x199   : > { %v5094_v1 = vpop.f32.mrb[12].mxu0 }
 0x19a   : > { %v5095_v31 = vpop.f32.mrb[13].mxu0  ;;  %v7552_v41 = vadd.f32 %v5205_v10, %v5093_v3  ;;  %v8939_v3 = vld [vmem:[#allocation52_spill] sm:$0xff] }
 0x19b   : > { %v5096_v59 = vadd.f32 %v5095_v31, %v5094_v1  ;;  %v5097_v57 = vpop.f32.mrb[14].mxu0 }
 0x19c   : > { %v5098_v36 = vpop.f32.mrb[15].mxu0  ;;  %v5206_v51 = vpop.f32.mrb[12].mxu1 }
 0x19d   : > { %v5099_v37 = vadd.f32 %v5098_v36, %v5097_v57  ;;  %v5207_v24 = vpop.f32.mrb[13].mxu1 }
 0x19e   : > { %3536 = vmatmul.mubr.bf16.gmra.mrb[120].mxu0 %v8934_v58  ;;  %5041 = vmatmul.mubr.msk.bf16.gmra.mrb[116].mxu1 %vm8936_vm13, %v7365_v20  ;;  %v5208_v30 = vadd.f32 %v5207_v24, %v5206_v51  ;;  %v5209_v25 = vpop.f32.mrb[14].mxu1  ;;  %v2252_v20 = vpack.c.bf16 %v7555_v42, %v7555_v42  ;;  %v2155_v58 = vld [vmem:[#allocation3 + $0x117] sm:$0xff] }
 0x19f   : > { %5027 = vmatprep.mubr.msk.bf16.mxu0 %vm7419_vm9, %v7541_v7  ;;  %3696 = vmatprep.mubr.bf16.mxu1 %v7406_v9  ;;  %v5210_v32 = vpop.f32.mrb[15].mxu1  ;;  %v2172_v60 = vpack.c.bf16 %v2156_v56, %v2155_v58 }
 0x1a0   : > { %v7559_v53 = vadd.f32 %v5208_v30, %v5096_v59  ;;  %v5211_v11 = vadd.f32 %v5210_v32, %v5209_v25 }
 0x1a1   : > { %v5100_v38 = vpop.f32.mrb[16].mxu0 }
 0x1a2   : > { %v5101_v16 = vpop.f32.mrb[17].mxu0  ;;  %v7568_v40 = vadd.f32 %v5211_v11, %v5099_v37 }
 0x1a3   : > { %v5102_v0 = vadd.f32 %v5101_v16, %v5100_v38  ;;  %v5103_v18 = vpop.f32.mrb[18].mxu0 }
 0x1a4   : > { %v5104_v12 = vpop.f32.mrb[19].mxu0  ;;  %v5212_v1 = vpop.f32.mrb[16].mxu1 }
 0x1a5   : > { %v5105_v43 = vadd.f32 %v5104_v12, %v5103_v18  ;;  %v5213_v31 = vpop.f32.mrb[17].mxu1 }
 0x1a6   : > { %3544 = vmatmul.mubr.bf16.gmra.mrb[124].mxu0 %v7406_v9  ;;  %5042 = vmatmul.mubr.msk.bf16.gmra.mrb[120].mxu1 %vm7357_vm0, %v8937_v21  ;;  %v5214_v57 = vadd.f32 %v5213_v31, %v5212_v1  ;;  %v5215_v35 = vpop.f32.mrb[18].mxu1  ;;  %vm8947_vm0 = vnez %v8844_v52 }
 0x1a7   : > { %5568 = vmatprep.mubr.msk.bf16.mxu0 %vm6596_vm8, %v8939_v3  ;;  %3704 = vmatprep.mubr.bf16.mxu1 %v2252_v20  ;;  %v5216_v36 = vpop.f32.mrb[19].mxu1  ;;  %v8943_v3 = vld [vmem:[#allocation38_spill] sm:$0xff] }
 0x1a8   : > { %v7570_v10 = vadd.f32 %v5214_v57, %v5102_v0  ;;  %v5217_v23 = vadd.f32 %v5216_v36, %v5215_v35  ;;  %vm8944_vm8 = vnez %v8943_v3  ;;  %v2285_v35 = vld [vmem:[#allocation3 + $0xa9] sm:$0xff] }
 0x1a9   : > { %v5106_v6 = vpop.f32.mrb[20].mxu0 }
 0x1aa   : > { %v5107_v48 = vpop.f32.mrb[21].mxu0  ;;  %v7580_v51 = vadd.f32 %v5217_v23, %v5105_v43 }
 0x1ab   : > { %v5108_v59 = vadd.f32 %v5107_v48, %v5106_v6  ;;  %v5109_v9 = vpop.f32.mrb[22].mxu0 }
 0x1ac   : > { %v5110_v34 = vpop.f32.mrb[23].mxu0  ;;  %v5218_v24 = vpop.f32.mrb[20].mxu1 }
 0x1ad   : > { %v5111_v28 = vadd.f32 %v5110_v34, %v5109_v9  ;;  %v5219_v30 = vpop.f32.mrb[21].mxu1  ;;  %v2286_v34 = vld [vmem:[#allocation3 + $0xb1] sm:$0xff] }
 0x1ae   : > { %5569 = vmatmul.mubr.msk.bf16.vlgmr.msra.gmra.mrb[128].mxu0 %vm6687_vm10, %v7434_v55  ;;  %5043 = vmatmul.mubr.msk.bf16.gmra.mrb[124].mxu1 %vm7390_vm11, %v2172_v60  ;;  %v5220_v12 = vadd.f32 %v5219_v30, %v5218_v24  ;;  %v5221_v20 = vpop.f32.mrb[22].mxu1  ;;  %vm8945_vm10 = vnez %v8829_v19  ;;  %v2283_v19 = vld [vmem:[#allocation3 + $0x99] sm:$0xff]  ;;  %vm8948_vm11 = vnez %v8856_v50 }
 0x1af   : > { %5572 = vmatprep.mubr.msk.bf16.mxu0 %vm6714_vm12, %v7443_v49  ;;  %v5222_v11 = vpop.f32.mrb[23].mxu1  ;;  %vm8946_vm12 = vnez %v8837_v29 }
 0x1b0   : > { %v7582_v21 = vadd.f32 %v5220_v12, %v5108_v59  ;;  %v5223_v8 = vadd.f32 %v5222_v11, %v5221_v20  ;;  %v2287_v12 = vld [vmem:[#allocation3 + $0xb9] sm:$0xff]  ;;  %v2288_v20 = vld [vmem:[#allocation3 + $0xc1] sm:$0xff]  ;;  %v2289_v11 = vld [vmem:[#allocation3 + $0xc9] sm:$0xff] }
 0x1b1   : > { %v5112_v16 = vpop.f32.mrb[24].mxu0 }
 0x1b2   : > { %v5113_v18 = vpop.f32.mrb[25].mxu0  ;;  %v7590_v27 = vadd.f32 %v5223_v8, %v5111_v28 }
 0x1b3   : > { %v5114_v0 = vadd.f32 %v5113_v18, %v5112_v16  ;;  %v5115_v25 = vpop.f32.mrb[26].mxu0  ;;  %v2309_v18 = vpack.c.bf16 %v2286_v34, %v2285_v35  ;;  %v2293_v35 = vld [vmem:[#allocation3 + $0xe9] sm:$0xff]  ;;  %v2294_v34 = vld [vmem:[#allocation3 + $0xf1] sm:$0xff] }
 0x1b4   : > { %v5116_v32 = vpop.f32.mrb[27].mxu0  ;;  %v5224_v43 = vpop.f32.mrb[24].mxu1 }
 0x1b5   : > { %v5117_v55 = vadd.f32 %v5116_v32, %v5115_v25  ;;  %v5225_v58 = vpop.f32.mrb[25].mxu1 }
 0x1b6   : > { %5573 = vmatmul.mubr.msk.bf16.gmra.mrb[132].mxu0 %vm8944_vm8, %v7452_v63  ;;  %v5226_v1 = vadd.f32 %v5225_v58, %v5224_v43  ;;  %v5227_v48 = vpop.f32.mrb[26].mxu1  ;;  %v2310_v43 = vpack.c.bf16 %v2288_v20, %v2287_v12 }
 0x1b7   : > { %5576 = vmatprep.mubr.msk.bf16.mxu0 %vm8945_vm10, %v7460_v13  ;;  %v5228_v60 = vpop.f32.mrb[27].mxu1  ;;  %v2284_v13 = vld [vmem:[#allocation3 + $0xa1] sm:$0xff] }
 0x1b8   : > { %v7592_v9 = vadd.f32 %v5226_v1, %v5114_v0  ;;  %v5229_v63 = vadd.f32 %v5228_v60, %v5227_v48  ;;  %v2308_v37 = vpack.c.bf16 %v2284_v13, %v2283_v19  ;;  %v2292_v19 = vld [vmem:[#allocation3 + $0xe1] sm:$0xff] }
 0x1b9   : > { %v5118_v49 = vpop.f32.mrb[28].mxu0 }
 0x1ba   : > { %v5119_v15 = vpop.f32.mrb[29].mxu0  ;;  %v7600_v57 = vadd.f32 %v5229_v63, %v5117_v55  ;;  %v2290_v55 = vld [vmem:[#allocation3 + $0xd1] sm:$0xff] }
 0x1bb   : > { %v5120_v56 = vadd.f32 %v5119_v15, %v5118_v49  ;;  %v5121_v6 = vpop.f32.mrb[30].mxu0 }
 0x1bc   : > { %v5122_v31 = vpop.f32.mrb[31].mxu0 }
 0x1bd   : > { %v5123_v59 = vadd.f32 %v5122_v31, %v5121_v6  ;;  %v2311_v6 = vpack.c.bf16 %v2290_v55, %v2289_v11 }
 0x1be   : > { %5577 = vmatmul.mubr.msk.bf16.gmra.mrb[136].mxu0 %vm8946_vm12, %v7467_v62 }
 0x1bf   : > { %5580 = vmatprep.mubr.msk.bf16.mxu0 %vm8947_vm0, %v7474_v14 }
 0x1c1   : > { %v5124_v36 = vpop.f32.mrb[32].mxu0  ;;  %v5230_v28 = vpop.f32.mrb[28].mxu1 }
 0x1c2   : > { %v5125_v23 = vpop.f32.mrb[33].mxu0  ;;  %v5231_v38 = vpop.f32.mrb[29].mxu1 }
 0x1c3   : > { %v5126_v16 = vadd.f32 %v5125_v23, %v5124_v36  ;;  %v5127_v24 = vpop.f32.mrb[34].mxu0  ;;  %v5232_v29 = vadd.f32 %v5231_v38, %v5230_v28  ;;  %v5233_v62 = vpop.f32.mrb[30].mxu1 }
 0x1c4   : > { %v5128_v30 = vpop.f32.mrb[35].mxu0  ;;  %v5234_v0 = vpop.f32.mrb[31].mxu1 }
 0x1c5   : > { %v5129_v52 = vadd.f32 %v5128_v30, %v5127_v24  ;;  %v7602_v14 = vadd.f32 %v5232_v29, %v5120_v56  ;;  %v5235_v25 = vadd.f32 %v5234_v0, %v5233_v62 }
 0x1c6   : > { %5581 = vmatmul.mubr.msk.bf16.gmra.mrb[140].mxu0 %vm8924_vm2, %v2308_v37 }
 0x1c7   : > { %5584 = vmatprep.mubr.msk.bf16.mxu0 %vm8948_vm11, %v2309_v18  ;;  %v7608_v32 = vadd.f32 %v5235_v25, %v5123_v59  ;;  %v2291_v59 = vld [vmem:[#allocation3 + $0xd9] sm:$0xff]  ;;  %v2313_v18 = vpack.c.bf16 %v2294_v34, %v2293_v35 }
 0x1c8   : > { %v2312_v37 = vpack.c.bf16 %v2292_v19, %v2291_v59 }
 0x1c9   : > { %v5130_v8 = vpop.f32.mrb[36].mxu0  ;;  %v5236_v3 = vpop.f32.mrb[32].mxu1 }
 0x1ca   : > { %v5131_v49 = vpop.f32.mrb[37].mxu0  ;;  %v5237_v15 = vpop.f32.mrb[33].mxu1 }
 0x1cb   : > { %v5132_v58 = vadd.f32 %v5131_v49, %v5130_v8  ;;  %v5133_v56 = vpop.f32.mrb[38].mxu0  ;;  %v5238_v1 = vadd.f32 %v5237_v15, %v5236_v3  ;;  %v5239_v2 = vpop.f32.mrb[34].mxu1 }
 0x1cc   : > { %v5134_v48 = vpop.f32.mrb[39].mxu0  ;;  %v5240_v31 = vpop.f32.mrb[35].mxu1 }
 0x1cd   : > { %v5135_v50 = vadd.f32 %v5134_v48, %v5133_v56  ;;  %v7610_v60 = vadd.f32 %v5238_v1, %v5126_v16  ;;  %v5241_v63 = vadd.f32 %v5240_v31, %v5239_v2  ;;  %v2300_v1 = vld [vmem:[#allocation3 + $0x121] sm:$0xff] }
 0x1ce   : > { %5585 = vmatmul.mubr.msk.bf16.gmra.mrb[144].mxu0 %vm7126_vm15, %v2310_v43  ;;  %vm6099_vm15 = vmmov 0  }
 0x1cf   : > { %5588 = vmatprep.mubr.msk.bf16.mxu0 %vm8929_vm5, %v2311_v6  ;;  %v7616_v13 = vadd.f32 %v5241_v63, %v5129_v52  ;;  %v2316_v63 = vpack.c.bf16 %v2300_v1, %v2299_v5  ;;  %5632 = vmatprep.mubr.msk.f32.mxu1 %vm6099_vm15, %v7555_v42 }
 0x1d1   : > { %v5136_v36 = vpop.f32.mrb[40].mxu0  ;;  %v5242_v28 = vpop.f32.mrb[36].mxu1 }
 0x1d2   : > { %v5137_v23 = vpop.f32.mrb[41].mxu0  ;;  %v5243_v38 = vpop.f32.mrb[37].mxu1 }
 0x1d3   : > { %v5138_v16 = vadd.f32 %v5137_v23, %v5136_v36  ;;  %v5139_v24 = vpop.f32.mrb[42].mxu0  ;;  %v5244_v29 = vadd.f32 %v5243_v38, %v5242_v28  ;;  %v5245_v39 = vpop.f32.mrb[38].mxu1  ;;  %v4129_v23 = vld [vmem:[%s6393_s14] sm:$0xff]  ;;  %v8949_v38 = vmov 0.0|0.0  }
 0x1d4   : > { %v5140_v62 = vpop.f32.mrb[43].mxu0  ;;  %v5246_v30 = vpop.f32.mrb[39].mxu1  ;;  %5642 = vmatprep.subr.bf16.mxu1 %v8949_v38 }
 0x1d5   : > { %v5141_v22 = vadd.f32 %v5140_v62, %v5139_v24  ;;  %v7618_v0 = vadd.f32 %v5244_v29, %v5132_v58  ;;  %v5247_v25 = vadd.f32 %v5246_v30, %v5245_v39 }
 0x1d6   : > { %5589 = vmatmul.mubr.msk.bf16.gmra.mrb[148].mxu0 %vm7258_vm3, %v2312_v37  ;;  %v4130_v37 = vld [vmem:[%s6393_s14 + $0x8] sm:$0xff] }
 0x1d7   : > { %5592 = vmatprep.mubr.msk.bf16.mxu0 %vm7316_vm4, %v2313_v18  ;;  %v7624_v52 = vadd.f32 %v5247_v25, %v5135_v50 }
 0x1d9   : > { %v5142_v12 = vpop.f32.mrb[44].mxu0  ;;  %v5248_v20 = vpop.f32.mrb[40].mxu1 }
 0x1da   : > { %v5143_v11 = vpop.f32.mrb[45].mxu0  ;;  %v5249_v55 = vpop.f32.mrb[41].mxu1 }
 0x1db   : > { %v5144_v8 = vadd.f32 %v5143_v11, %v5142_v12  ;;  %v5145_v3 = vpop.f32.mrb[46].mxu0  ;;  %v5250_v49 = vadd.f32 %v5249_v55, %v5248_v20  ;;  %v5251_v43 = vpop.f32.mrb[42].mxu1 }
 0x1dc   : > { %v5146_v15 = vpop.f32.mrb[47].mxu0  ;;  %v5252_v58 = vpop.f32.mrb[43].mxu1 }
 0x1dd   : > { %v5147_v56 = vadd.f32 %v5146_v15, %v5145_v3  ;;  %v7626_v6 = vadd.f32 %v5250_v49, %v5138_v16  ;;  %v5253_v47 = vadd.f32 %v5252_v58, %v5251_v43  ;;  %v5643_v16 = vpack.c.bf16 %v4130_v37, %v4129_v23 }
 0x1de   : > { %5593 = vmatmul.mubr.msk.bf16.gmra.mrb[152].mxu0 %vm7361_vm7, %v7417_v17 }
 0x1df   : > { %5596 = vmatprep.mubr.msk.bf16.mxu0 %vm7394_vm1, %v7541_v7  ;;  %v7634_v2 = vadd.f32 %v5253_v47, %v5141_v22  ;;  %5644 = vmatpush3.bf16.msra.mxu1 %v5643_v16 }
 0x1e0   : > { %5645 = vmatprep.subr.bf16.mxu1 %v8949_v38 }
 0x1e1   : > { %v5148_v48 = vpop.f32.mrb[48].mxu0  ;;  %v5254_v31 = vpop.f32.mrb[44].mxu1 }
 0x1e2   : > { %v5149_v50 = vpop.f32.mrb[49].mxu0  ;;  %v5255_v59 = vpop.f32.mrb[45].mxu1 }
 0x1e3   : > { %v5150_v19 = vadd.f32 %v5149_v50, %v5148_v48  ;;  %v5151_v35 = vpop.f32.mrb[50].mxu0  ;;  %v5256_v34 = vadd.f32 %v5255_v59, %v5254_v31  ;;  %v5257_v45 = vpop.f32.mrb[46].mxu1 }
 0x1e4   : > { %v5152_v17 = vpop.f32.mrb[51].mxu0  ;;  %v5258_v36 = vpop.f32.mrb[47].mxu1 }
 0x1e5   : > { %v5153_v28 = vadd.f32 %v5152_v17, %v5151_v35  ;;  %v7636_v61 = vadd.f32 %v5256_v34, %v5144_v8  ;;  %v5259_v7 = vadd.f32 %v5258_v36, %v5257_v45  ;;  %v4132_v35 = vld [vmem:[%s6393_s14 + $0x18] sm:$0xff] }
 0x1e6   : > { %5597 = vmatmul.mubr.msk.bf16.gmra.mrb[156].mxu0 %vm7419_vm9, %v2316_v63 }
 0x1e7   : > { %v7643_v24 = vadd.f32 %v5259_v7, %v5147_v56 }
 0x1e9   : > { %v5154_v18 = vpop.f32.mrb[52].mxu0  ;;  %v5260_v29 = vpop.f32.mrb[48].mxu1 }
 0x1ea   : > { %v5155_v39 = vpop.f32.mrb[53].mxu0  ;;  %v5261_v62 = vpop.f32.mrb[49].mxu1 }
 0x1eb   : > { %v5156_v30 = vadd.f32 %v5155_v39, %v5154_v18  ;;  %v5157_v22 = vpop.f32.mrb[54].mxu0  ;;  %v5262_v25 = vadd.f32 %v5261_v62, %v5260_v29  ;;  %v5263_v12 = vpop.f32.mrb[50].mxu1 }
 0x1ec   : > { %v5158_v46 = vpop.f32.mrb[55].mxu0  ;;  %v5264_v20 = vpop.f32.mrb[51].mxu1 }
 0x1ed   : > { %v5159_v11 = vadd.f32 %v5158_v46, %v5157_v22  ;;  %v7646_v55 = vadd.f32 %v5262_v25, %v5150_v19  ;;  %v5265_v8 = vadd.f32 %v5264_v20, %v5263_v12  ;;  %v4131_v19 = vld [vmem:[%s6393_s14 + $0x10] sm:$0xff] }
 0x1ee   : > { %v5646_v34 = vpack.c.bf16 %v4132_v35, %v4131_v19 }
 0x1ef   : > { %v7648_v3 = vadd.f32 %v5265_v8, %v5153_v28 }
 0x1f0   : > { %5647 = vmatpush3.bf16.msra.mxu1 %v5646_v34 }
 0x1f1   : > { %v5160_v49 = vpop.f32.mrb[56].mxu0  ;;  %v5266_v43 = vpop.f32.mrb[52].mxu1  ;;  %5648 = vmatprep.subr.bf16.mxu1 %v8949_v38 }
 0x1f2   : > { %v5161_v15 = vpop.f32.mrb[57].mxu0  ;;  %v5267_v58 = vpop.f32.mrb[53].mxu1 }
 0x1f3   : > { %v5162_v56 = vadd.f32 %v5161_v15, %v5160_v49  ;;  %v5163_v47 = vpop.f32.mrb[58].mxu0  ;;  %v5268_v5 = vadd.f32 %v5267_v58, %v5266_v43  ;;  %v5269_v1 = vpop.f32.mrb[54].mxu1 }
 0x1f4   : > { %v5164_v48 = vpop.f32.mrb[59].mxu0  ;;  %v5270_v31 = vpop.f32.mrb[55].mxu1 }
 0x1f5   : > { %v5165_v50 = vadd.f32 %v5164_v48, %v5163_v47  ;;  %v7650_v63 = vadd.f32 %v5268_v5, %v5156_v30  ;;  %v5271_v59 = vadd.f32 %v5270_v31, %v5269_v1  ;;  %v4133_v31 = vld [vmem:[%s6393_s14 + $0x20] sm:$0xff] }
 0x1f7   : > { %v7654_v45 = vadd.f32 %v5271_v59, %v5159_v11 }
 0x1f9   : > { %v5166_v17 = vpop.f32.mrb[60].mxu0  ;;  %v5272_v36 = vpop.f32.mrb[56].mxu1 }
 0x1fa   : > { %v5167_v28 = vpop.f32.mrb[61].mxu0  ;;  %v5273_v7 = vpop.f32.mrb[57].mxu1 }
 0x1fb   : > { %v5168_v23 = vadd.f32 %v5167_v28, %v5166_v17  ;;  %v5169_v37 = vpop.f32.mrb[62].mxu0  ;;  %v5274_v16 = vadd.f32 %v5273_v7, %v5272_v36  ;;  %v5275_v18 = vpop.f32.mrb[58].mxu1 }
 0x1fc   : > { %v5170_v29 = vpop.f32.mrb[63].mxu0  ;;  %v5276_v39 = vpop.f32.mrb[59].mxu1 }
 0x1fd   : > { %v5171_v62 = vadd.f32 %v5170_v29, %v5169_v37  ;;  %v7657_v30 = vadd.f32 %v5274_v16, %v5162_v56  ;;  %v5277_v22 = vadd.f32 %v5276_v39, %v5275_v18 }
 0x1ff   : > { %v7659_v25 = vadd.f32 %v5277_v22, %v5165_v50  ;;  %v4134_v50 = vld [vmem:[%s6393_s14 + $0x28] sm:$0xff] }
 0x200   : > { %v5649_v19 = vpack.c.bf16 %v4134_v50, %v4133_v31 }
 0x201   : > { %v5300_v12 = vpop.f32.mrb[64].mxu0  ;;  %v5278_v46 = vpop.f32.mrb[60].mxu1 }
 0x202   : > { %v5301_v20 = vpop.f32.mrb[65].mxu0  ;;  %v5279_v11 = vpop.f32.mrb[61].mxu1  ;;  %5650 = vmatpush3.bf16.msra.mxu1 %v5649_v19  ;;  %v4136_v19 = vld [vmem:[%s6393_s14 + $0x38] sm:$0xff] }
 0x203   : > { %v5302_v8 = vadd.f32 %v5301_v20, %v5300_v12  ;;  %v5303_v49 = vpop.f32.mrb[66].mxu0  ;;  %v5280_v43 = vadd.f32 %v5279_v11, %v5278_v46  ;;  %v5281_v15 = vpop.f32.mrb[62].mxu1  ;;  %5651 = vmatprep.subr.bf16.mxu1 %v8949_v38 }
 0x204   : > { %v5304_v58 = vpop.f32.mrb[67].mxu0  ;;  %v5282_v47 = vpop.f32.mrb[63].mxu1 }
 0x205   : > { %v3426_v5 = vadd.f32 %v5302_v8, %v7517_v26  ;;  %v5305_v1 = vadd.f32 %v5304_v58, %v5303_v49  ;;  %v7662_v56 = vadd.f32 %v5280_v43, %v5168_v23  ;;  %v5283_v48 = vadd.f32 %v5282_v47, %v5281_v15 }
 0x207   : > { %v3429_v59 = vadd.f32 %v5305_v1, %v7526_v4  ;;  %v7667_v35 = vadd.f32 %v5283_v48, %v5171_v62 }
 0x209   : > { %v5306_v34 = vpop.f32.mrb[68].mxu0  ;;  %v5412_v17 = vpop.f32.mrb[64].mxu1 }
 0x20a   : > { %v5307_v36 = vpop.f32.mrb[69].mxu0  ;;  %v5413_v28 = vpop.f32.mrb[65].mxu1 }
 0x20b   : > { %v5308_v7 = vadd.f32 %v5307_v36, %v5306_v34  ;;  %v5309_v26 = vpop.f32.mrb[70].mxu0  ;;  %v5414_v37 = vadd.f32 %v5413_v28, %v5412_v17  ;;  %v5415_v23 = vpop.f32.mrb[66].mxu1 }
 0x20c   : > { %v5310_v16 = vpop.f32.mrb[71].mxu0  ;;  %v5416_v18 = vpop.f32.mrb[67].mxu1 }
 0x20d   : > { %v3434_v29 = vadd.f32 %v5308_v7, %v7529_v44  ;;  %v5311_v39 = vadd.f32 %v5310_v16, %v5309_v26  ;;  %v5417_v4 = vadd.f32 %v5416_v18, %v5415_v23  ;;  %v7671_v22 = vadd.f32 %v5414_v37, %v3426_v5 }
 0x20f   : > { %v3437_v62 = vadd.f32 %v5311_v39, %v7538_v54  ;;  %v7674_v12 = vadd.f32 %v5417_v4, %v3429_v59  ;;  %v4135_v59 = vld [vmem:[%s6393_s14 + $0x30] sm:$0xff] }
 0x210   : > { %v5652_v17 = vpack.c.bf16 %v4136_v19, %v4135_v59 }
 0x211   : > { %v5312_v46 = vpop.f32.mrb[72].mxu0  ;;  %v5418_v20 = vpop.f32.mrb[68].mxu1 }
 0x212   : > { %v5313_v11 = vpop.f32.mrb[73].mxu0  ;;  %v5419_v8 = vpop.f32.mrb[69].mxu1  ;;  %5653 = vmatpush3.bf16.msra.mxu1 %v5652_v17  ;;  %v4138_v17 = vld [vmem:[%s6393_s14 + $0x48] sm:$0xff] }
 0x213   : > { %v5314_v49 = vadd.f32 %v5313_v11, %v5312_v46  ;;  %v5315_v43 = vpop.f32.mrb[74].mxu0  ;;  %v5420_v15 = vadd.f32 %v5419_v8, %v5418_v20  ;;  %v5421_v58 = vpop.f32.mrb[70].mxu1  ;;  %5654 = vmatprep.subr.bf16.mxu1 %v8949_v38 }
 0x214   : > { %v5316_v47 = vpop.f32.mrb[75].mxu0  ;;  %v5422_v44 = vpop.f32.mrb[71].mxu1 }
 0x215   : > { %v3442_v1 = vadd.f32 %v5314_v49, %v7543_v33  ;;  %v5317_v5 = vadd.f32 %v5316_v47, %v5315_v43  ;;  %v5423_v48 = vadd.f32 %v5422_v44, %v5421_v58  ;;  %v7677_v31 = vadd.f32 %v5420_v15, %v3434_v29 }
 0x217   : > { %v3445_v54 = vadd.f32 %v5317_v5, %v7552_v41  ;;  %v7680_v50 = vadd.f32 %v5423_v48, %v3437_v62 }
 0x219   : > { %v5318_v34 = vpop.f32.mrb[76].mxu0  ;;  %v5424_v36 = vpop.f32.mrb[72].mxu1 }
 0x21a   : > { %v5319_v28 = vpop.f32.mrb[77].mxu0  ;;  %v5425_v7 = vpop.f32.mrb[73].mxu1 }
 0x21b   : > { %v5320_v26 = vadd.f32 %v5319_v28, %v5318_v34  ;;  %v5321_v37 = vpop.f32.mrb[78].mxu0  ;;  %v5426_v23 = vadd.f32 %v5425_v7, %v5424_v36  ;;  %v5427_v33 = vpop.f32.mrb[74].mxu1  ;;  %v4137_v34 = vld [vmem:[%s6393_s14 + $0x40] sm:$0xff] }
 0x21c   : > { %v5322_v16 = vpop.f32.mrb[79].mxu0  ;;  %v5428_v18 = vpop.f32.mrb[75].mxu1  ;;  %v5655_v7 = vpack.c.bf16 %v4138_v17, %v4137_v34 }
 0x21d   : > { %v3450_v41 = vadd.f32 %v5320_v26, %v7559_v53  ;;  %v5323_v29 = vadd.f32 %v5322_v16, %v5321_v37  ;;  %v5429_v39 = vadd.f32 %v5428_v18, %v5427_v33  ;;  %v7686_v4 = vadd.f32 %v5426_v23, %v3442_v1 }
 0x21e   : > { %5656 = vmatpush3.bf16.msra.mxu1 %v5655_v7 }
 0x21f   : > { %v3453_v62 = vadd.f32 %v5323_v29, %v7568_v40  ;;  %v7689_v46 = vadd.f32 %v5429_v39, %v3445_v54  ;;  %5657 = vmatprep.subr.bf16.mxu1 %v8949_v38  ;;  %v7702_v29 = vld [vmem:[%s6388_s10 + $0x1] ss:$0 sm:$0xff] }
 0x220   : > { %v5884_v39 = vld [vmem:[#allocation2 + $0x80] sm:$0xff] }
 0x221   : > { %v5324_v20 = vpop.f32.mrb[80].mxu0  ;;  %v5430_v11 = vpop.f32.mrb[76].mxu1  ;;  %vm563_vm5 = vcmp.ge.f32.partialorder %v5884_v39, 0.0 }
 0x222   : > { %v5325_v8 = vpop.f32.mrb[81].mxu0  ;;  %v5431_v49 = vpop.f32.mrb[77].mxu1 }
 0x223   : > { %v5326_v43 = vadd.f32 %v5325_v8, %v5324_v20  ;;  %v5327_v15 = vpop.f32.mrb[82].mxu0  ;;  %v5432_v58 = vadd.f32 %v5431_v49, %v5430_v11  ;;  %v5433_v47 = vpop.f32.mrb[78].mxu1 }
 0x224   : > { %v5328_v44 = vpop.f32.mrb[83].mxu0  ;;  %v5434_v53 = vpop.f32.mrb[79].mxu1 }
 0x225   : > { %v3458_v5 = vadd.f32 %v5326_v43, %v7570_v10  ;;  %v5329_v1 = vadd.f32 %v5328_v44, %v5327_v15  ;;  %v5435_v48 = vadd.f32 %v5434_v53, %v5433_v47  ;;  %v7692_v59 = vadd.f32 %v5432_v58, %v3450_v41 }
 0x227   : > { %v3461_v40 = vadd.f32 %v5329_v1, %v7580_v51  ;;  %v7695_v54 = vadd.f32 %v5435_v48, %v3453_v62  ;;  %v599_v62 = vmul.f32 %v5884_v39, %v7702_v29 }
 0x229   : > { %v5330_v19 = vpop.f32.mrb[84].mxu0  ;;  %v5436_v36 = vpop.f32.mrb[80].mxu1  ;;  %v7710_v15 = vsel %vm563_vm5, %v5884_v39, %v599_v62 }
 0x22a   : > { %v5331_v28 = vpop.f32.mrb[85].mxu0  ;;  %v5437_v26 = vpop.f32.mrb[81].mxu1 }
 0x22b   : > { %v5332_v37 = vadd.f32 %v5331_v28, %v5330_v19  ;;  %v5333_v23 = vpop.f32.mrb[86].mxu0  ;;  %v5438_v33 = vadd.f32 %v5437_v26, %v5436_v36  ;;  %v5439_v10 = vpop.f32.mrb[82].mxu1 }
 0x22c   : > { %v5334_v16 = vpop.f32.mrb[87].mxu0  ;;  %v5440_v18 = vpop.f32.mrb[83].mxu1 }
 0x22d   : > { %v3466_v41 = vadd.f32 %v5332_v37, %v7582_v21  ;;  %v5335_v51 = vadd.f32 %v5334_v16, %v5333_v23  ;;  %v5441_v20 = vadd.f32 %v5440_v18, %v5439_v10  ;;  %v7705_v11 = vadd.f32 %v5438_v33, %v3458_v5  ;;  %v4139_v10 = vld [vmem:[%s6393_s14 + $0x50] sm:$0xff]  ;;  %v4140_v16 = vld [vmem:[%s6393_s14 + $0x58] sm:$0xff] }
 0x22e   : > { %v5658_v39 = vpack.c.bf16 %v4140_v16, %v4139_v10 }
 0x22f   : > { %v3469_v8 = vadd.f32 %v5335_v51, %v7590_v27  ;;  %v7708_v49 = vadd.f32 %v5441_v20, %v3461_v40  ;;  %v8950_v27 = vld [vmem:[#allocation45_spill] sm:$0xff] }
 0x230   : > { %v7715_v40 = vadd.f32 %v8950_v27, %v7710_v15  ;;  %5659 = vmatpush3.bf16.msra.mxu1 %v5658_v39 }
 0x231   : > { %v5336_v43 = vpop.f32.mrb[88].mxu0  ;;  %v5442_v21 = vpop.f32.mrb[84].mxu1  ;;  %5660 = vmatprep.subr.bf16.mxu1 %v8949_v38 }
 0x232   : > { %v5337_v58 = vpop.f32.mrb[89].mxu0  ;;  %v5443_v47 = vpop.f32.mrb[85].mxu1 }
 0x233   : > { %v5338_v44 = vadd.f32 %v5337_v58, %v5336_v43  ;;  %v5339_v53 = vpop.f32.mrb[90].mxu0  ;;  %v5444_v1 = vadd.f32 %v5443_v47, %v5442_v21  ;;  %v5445_v48 = vpop.f32.mrb[86].mxu1 }
 0x234   : > { %v5340_v19 = vpop.f32.mrb[91].mxu0  ;;  %v5446_v5 = vpop.f32.mrb[87].mxu1 }
 0x235   : > { %v3474_v34 = vadd.f32 %v5338_v44, %v7592_v9  ;;  %v5341_v17 = vadd.f32 %v5340_v19, %v5339_v53  ;;  %v5447_v36 = vadd.f32 %v5446_v5, %v5445_v48  ;;  %v7717_v28 = vadd.f32 %v5444_v1, %v3466_v41 }
 0x237   : > { %v3477_v7 = vadd.f32 %v5341_v17, %v7600_v57  ;;  %v7720_v26 = vadd.f32 %v5447_v36, %v3469_v8 }
 0x239   : > { %v5342_v37 = vpop.f32.mrb[92].mxu0  ;;  %v5448_v23 = vpop.f32.mrb[88].mxu1 }
 0x23a   : > { %v5343_v33 = vpop.f32.mrb[93].mxu0  ;;  %v5449_v18 = vpop.f32.mrb[89].mxu1 }
 0x23b   : > { %v5344_v51 = vadd.f32 %v5343_v33, %v5342_v37  ;;  %v5345_v9 = vpop.f32.mrb[94].mxu0  ;;  %v5450_v62 = vadd.f32 %v5449_v18, %v5448_v23  ;;  %v5451_v20 = vpop.f32.mrb[90].mxu1 }
 0x23c   : > { %v5346_v43 = vpop.f32.mrb[95].mxu0  ;;  %v5452_v21 = vpop.f32.mrb[91].mxu1 }
 0x23d   : > { %v3482_v41 = vadd.f32 %v5344_v51, %v7602_v14  ;;  %v5347_v58 = vadd.f32 %v5346_v43, %v5345_v9  ;;  %v5453_v57 = vadd.f32 %v5452_v21, %v5451_v20  ;;  %v7725_v8 = vadd.f32 %v5450_v62, %v3474_v34 }
 0x23f   : > { %v3485_v47 = vadd.f32 %v5347_v58, %v7608_v32  ;;  %v7729_v44 = vadd.f32 %v5453_v57, %v3477_v7 }
 0x241   : > { %v5348_v53 = vpop.f32.mrb[96].mxu0  ;;  %v5454_v1 = vpop.f32.mrb[92].mxu1 }
 0x242   : > { %v5349_v48 = vpop.f32.mrb[97].mxu0  ;;  %v5455_v19 = vpop.f32.mrb[93].mxu1 }
 0x243   : > { %v5350_v5 = vadd.f32 %v5349_v48, %v5348_v53  ;;  %v5351_v17 = vpop.f32.mrb[98].mxu0  ;;  %v5456_v27 = vadd.f32 %v5455_v19, %v5454_v1  ;;  %v5457_v36 = vpop.f32.mrb[94].mxu1 }
 0x244   : > { %v5352_v14 = vpop.f32.mrb[99].mxu0  ;;  %v5458_v37 = vpop.f32.mrb[95].mxu1 }
 0x245   : > { %v3490_v23 = vadd.f32 %v5350_v5, %v7610_v60  ;;  %v5353_v34 = vadd.f32 %v5352_v14, %v5351_v17  ;;  %v5459_v33 = vadd.f32 %v5458_v37, %v5457_v36  ;;  %v7732_v10 = vadd.f32 %v5456_v27, %v3482_v41  ;;  %v4141_v37 = vld [vmem:[%s6393_s14 + $0x60] sm:$0xff] }
 0x247   : > { %v3493_v32 = vadd.f32 %v5353_v34, %v7616_v13  ;;  %v7735_v7 = vadd.f32 %v5459_v33, %v3485_v47  ;;  %v4142_v34 = vld [vmem:[%s6393_s14 + $0x68] sm:$0xff]  ;;  %v4143_v33 = vld [vmem:[%s6393_s14 + $0x70] sm:$0xff] }
 0x249   : > { %v5354_v16 = vpop.f32.mrb[100].mxu0  ;;  %v5460_v18 = vpop.f32.mrb[96].mxu1 }
 0x24a   : > { %v5355_v51 = vpop.f32.mrb[101].mxu0  ;;  %v5461_v9 = vpop.f32.mrb[97].mxu1 }
 0x24b   : > { %v5356_v39 = vadd.f32 %v5355_v51, %v5354_v16  ;;  %v5357_v62 = vpop.f32.mrb[102].mxu0  ;;  %v5462_v20 = vadd.f32 %v5461_v9, %v5460_v18  ;;  %v5463_v43 = vpop.f32.mrb[98].mxu1 }
 0x24c   : > { %v5358_v21 = vpop.f32.mrb[103].mxu0  ;;  %v5464_v58 = vpop.f32.mrb[99].mxu1 }
 0x24d   : > { %v3498_v60 = vadd.f32 %v5356_v39, %v7618_v0  ;;  %v5359_v41 = vadd.f32 %v5358_v21, %v5357_v62  ;;  %v5465_v57 = vadd.f32 %v5464_v58, %v5463_v43  ;;  %v7738_v13 = vadd.f32 %v5462_v20, %v3490_v23 }
 0x24f   : > { %v3501_v47 = vadd.f32 %v5359_v41, %v7624_v52  ;;  %v7741_v53 = vadd.f32 %v5465_v57, %v3493_v32  ;;  %v5661_v52 = vpack.c.bf16 %v4142_v34, %v4141_v37  ;;  %v4144_v32 = vld [vmem:[%s6393_s14 + $0x78] sm:$0xff] }
 0x250   : > { %v5664_v62 = vpack.c.bf16 %v4144_v32, %v4143_v33 }
 0x251   : > { %v5360_v1 = vpop.f32.mrb[104].mxu0  ;;  %v5466_v48 = vpop.f32.mrb[100].mxu1  ;;  %5662 = vmatpush3.bf16.msra.mxu1 %v5661_v52 }
 0x252   : > { %v5361_v19 = vpop.f32.mrb[105].mxu0  ;;  %v5467_v5 = vpop.f32.mrb[101].mxu1  ;;  %5663 = vmatprep.subr.bf16.mxu1 %v8949_v38 }
 0x253   : > { %v5362_v17 = vadd.f32 %v5361_v19, %v5360_v1  ;;  %v5363_v27 = vpop.f32.mrb[106].mxu0  ;;  %v5468_v36 = vadd.f32 %v5467_v5, %v5466_v48  ;;  %v5469_v14 = vpop.f32.mrb[102].mxu1 }
 0x254   : > { %v5364_v0 = vpop.f32.mrb[107].mxu0  ;;  %v5470_v16 = vpop.f32.mrb[103].mxu1 }
 0x255   : > { %v3506_v23 = vadd.f32 %v5362_v17, %v7626_v6  ;;  %v5365_v18 = vadd.f32 %v5364_v0, %v5363_v27  ;;  %v5471_v51 = vadd.f32 %v5470_v16, %v5469_v14  ;;  %v7750_v9 = vadd.f32 %v5468_v36, %v3498_v60  ;;  %5665 = vmatpush3.bf16.msra.mxu1 %v5664_v62 }
 0x256   : > { %5666 = vmatprep.subr.bf16.mxu1 %v8949_v38 }
 0x257   : > { %v3509_v39 = vadd.f32 %v5365_v18, %v7634_v2  ;;  %v7753_v20 = vadd.f32 %v5471_v51, %v3501_v47  ;;  %v5885_v51 = vld [vmem:[#allocation2 + $0x88] sm:$0xff] }
 0x258   : > { %vm564_vm3 = vcmp.ge.f32.partialorder %v5885_v51, 0.0 }
 0x259   : > { %v5366_v43 = vpop.f32.mrb[108].mxu0  ;;  %v5472_v6 = vpop.f32.mrb[104].mxu1 }
 0x25a   : > { %v5367_v21 = vpop.f32.mrb[109].mxu0  ;;  %v5473_v58 = vpop.f32.mrb[105].mxu1 }
 0x25b   : > { %v5368_v41 = vadd.f32 %v5367_v21, %v5366_v43  ;;  %v5369_v57 = vpop.f32.mrb[110].mxu0  ;;  %v5474_v1 = vadd.f32 %v5473_v58, %v5472_v6  ;;  %v5475_v42 = vpop.f32.mrb[106].mxu1  ;;  %v5886_v21 = vld [vmem:[#allocation2 + $0x90] sm:$0xff] }
 0x25c   : > { %v5370_v48 = vpop.f32.mrb[111].mxu0  ;;  %v5476_v60 = vpop.f32.mrb[107].mxu1  ;;  %v601_v58 = vmul.f32 %v5886_v21, %v7702_v29  ;;  %vm565_vm7 = vcmp.ge.f32.partialorder %v5886_v21, 0.0 }
 0x25d   : > { %v3514_v2 = vadd.f32 %v5368_v41, %v7636_v61  ;;  %v5371_v19 = vadd.f32 %v5370_v48, %v5369_v57  ;;  %v5477_v47 = vadd.f32 %v5476_v60, %v5475_v42  ;;  %v7758_v5 = vadd.f32 %v5474_v1, %v3506_v23 }
 0x25e   : > { %v600_v23 = vmul.f32 %v5885_v51, %v7702_v29 }
 0x25f   : > { %v3517_v17 = vadd.f32 %v5371_v19, %v7643_v24  ;;  %v7761_v27 = vadd.f32 %v5477_v47, %v3509_v39 }
 0x260   : > { %v7771_v1 = vsel %vm564_vm3, %v5885_v51, %v600_v23  ;;  %v5888_v51 = vld [vmem:[#allocation2 + $0xa0] sm:$0xff] }
 0x261   : > { %v5372_v36 = vpop.f32.mrb[112].mxu0  ;;  %v5478_v14 = vpop.f32.mrb[108].mxu1  ;;  %vm567_vm1 = vcmp.ge.f32.partialorder %v5888_v51, 0.0 }
 0x262   : > { %v5373_v0 = vpop.f32.mrb[113].mxu0  ;;  %v5479_v37 = vpop.f32.mrb[109].mxu1 }
 0x263   : > { %v5374_v34 = vadd.f32 %v5373_v0, %v5372_v36  ;;  %v5375_v33 = vpop.f32.mrb[114].mxu0  ;;  %v5480_v16 = vadd.f32 %v5479_v37, %v5478_v14  ;;  %v5481_v18 = vpop.f32.mrb[110].mxu1  ;;  %v4065_v36 = vadd.f32 %v7715_v40, %v7771_v1  ;;  %v5887_v37 = vld [vmem:[#allocation2 + $0x98] sm:$0xff]  ;;  %v603_v40 = vmul.f32 %v5888_v51, %v7702_v29 }
 0x264   : > { %v5376_v38 = vpop.f32.mrb[115].mxu0  ;;  %v5482_v52 = vpop.f32.mrb[111].mxu1  ;;  %vm566_vm4 = vcmp.ge.f32.partialorder %v5887_v37, 0.0 }
 0x265   : > { %v3522_v61 = vadd.f32 %v5374_v34, %v7646_v55  ;;  %v5377_v32 = vadd.f32 %v5376_v38, %v5375_v33  ;;  %v5483_v62 = vadd.f32 %v5482_v52, %v5481_v18  ;;  %v7765_v24 = vadd.f32 %v5480_v16, %v3514_v2 }
 0x266   : > { %v602_v34 = vmul.f32 %v5887_v37, %v7702_v29  ;;  %v7779_v33 = vsel %vm565_vm7, %v5886_v21, %v601_v58 }
 0x267   : > { %v3525_v39 = vadd.f32 %v5377_v32, %v7648_v3  ;;  %v7768_v43 = vadd.f32 %v5483_v62, %v3517_v17 }
 0x269   : > { %v5378_v6 = vpop.f32.mrb[116].mxu0  ;;  %v5484_v41 = vpop.f32.mrb[112].mxu1 }
 0x26a   : > { %v5379_v57 = vpop.f32.mrb[117].mxu0  ;;  %v5485_v55 = vpop.f32.mrb[113].mxu1 }
 0x26b   : > { %v5380_v42 = vadd.f32 %v5379_v57, %v5378_v6  ;;  %v5381_v48 = vpop.f32.mrb[118].mxu0  ;;  %v5486_v60 = vadd.f32 %v5485_v55, %v5484_v41  ;;  %v5487_v2 = vpop.f32.mrb[114].mxu1 }
 0x26c   : > { %v5382_v19 = vpop.f32.mrb[119].mxu0  ;;  %v5488_v47 = vpop.f32.mrb[115].mxu1 }
 0x26d   : > { %v3530_v3 = vadd.f32 %v5380_v42, %v7650_v63  ;;  %v5383_v17 = vadd.f32 %v5382_v19, %v5381_v48  ;;  %v5489_v14 = vadd.f32 %v5488_v47, %v5487_v2  ;;  %v7776_v0 = vadd.f32 %v5486_v60, %v3522_v61  ;;  %v5889_v60 = vld [vmem:[#allocation2 + $0xa8] sm:$0xff] }
 0x26e   : > { %v4066_v63 = vadd.f32 %v4065_v36, %v7779_v33  ;;  %v7786_v61 = vsel %vm566_vm4, %v5887_v37, %v602_v34  ;;  %v604_v2 = vmul.f32 %v5889_v60, %v7702_v29  ;;  %v7793_v19 = vsel %vm567_vm1, %v5888_v51, %v603_v40  ;;  %v5890_v34 = vld [vmem:[#allocation2 + $0xb0] sm:$0xff] }
 0x26f   : > { %v3533_v16 = vadd.f32 %v5383_v17, %v7654_v45  ;;  %v7782_v18 = vadd.f32 %v5489_v14, %v3525_v39  ;;  %vm568_vm9 = vcmp.ge.f32.partialorder %v5889_v60, 0.0  ;;  %vm569_vm2 = vcmp.ge.f32.partialorder %v5890_v34, 0.0 }
 0x270   : > { %v4067_v55 = vadd.f32 %v4066_v63, %v7786_v61 }
 0x271   : > { %v5384_v38 = vpop.f32.mrb[120].mxu0  ;;  %v5490_v52 = vpop.f32.mrb[116].mxu1 }
 0x272   : > { %v5385_v32 = vpop.f32.mrb[121].mxu0  ;;  %v5491_v23 = vpop.f32.mrb[117].mxu1  ;;  %v4068_v14 = vadd.f32 %v4067_v55, %v7793_v19 }
 0x273   : > { %v5386_v62 = vadd.f32 %v5385_v32, %v5384_v38  ;;  %v5387_v6 = vpop.f32.mrb[122].mxu0  ;;  %v5492_v21 = vadd.f32 %v5491_v23, %v5490_v52  ;;  %v5493_v58 = vpop.f32.mrb[118].mxu1  ;;  %v605_v38 = vmul.f32 %v5890_v34, %v7702_v29 }
 0x274   : > { %v5388_v45 = vpop.f32.mrb[123].mxu0  ;;  %v5494_v41 = vpop.f32.mrb[119].mxu1 }
 0x275   : > { %v3538_v39 = vadd.f32 %v5386_v62, %v7657_v30  ;;  %v5389_v57 = vadd.f32 %v5388_v45, %v5387_v6  ;;  %v5495_v42 = vadd.f32 %v5494_v41, %v5493_v58  ;;  %v7790_v48 = vadd.f32 %v5492_v21, %v3530_v3  ;;  %v5891_v45 = vld [vmem:[#allocation2 + $0xb8] sm:$0xff] }
 0x276   : > { %v7800_v3 = vsel %vm568_vm9, %v5889_v60, %v604_v2  ;;  %v606_v41 = vmul.f32 %v5891_v45, %v7702_v29  ;;  %vm570_vm14 = vcmp.ge.f32.partialorder %v5891_v45, 0.0  ;;  %v7813_v2 = vld [vmem:[%s6388_s10 + $0x2] ss:$0 sm:$0xff] }
 0x277   : > { %v3541_v47 = vadd.f32 %v5389_v57, %v7659_v25  ;;  %v7796_v17 = vadd.f32 %v5495_v42, %v3533_v16  ;;  %v4069_v6 = vadd.f32 %v4068_v14, %v7800_v3  ;;  %v7807_v57 = vsel %vm569_vm2, %v5890_v34, %v605_v38 }
 0x278   : > { %v7818_v34 = vsel %vm570_vm14, %v5891_v45, %v606_v41  ;;  %v7833_v41 = vld [vmem:[%s6388_s10 + $0x4] ss:$0 sm:$0xff] }
 0x279   : > { %v5390_v36 = vpop.f32.mrb[124].mxu0  ;;  %v5496_v30 = vpop.f32.mrb[120].mxu1  ;;  %8951 = vst [vmem:[#allocation46_spill] sm:$0xff] %v7818_v34 }
 0x27a   : > { %v5391_v37 = vpop.f32.mrb[125].mxu0  ;;  %v5497_v63 = vpop.f32.mrb[121].mxu1 }
 0x27b   : > { %v5392_v52 = vadd.f32 %v5391_v37, %v5390_v36  ;;  %v5393_v32 = vpop.f32.mrb[126].mxu0  ;;  %v5498_v51 = vadd.f32 %v5497_v63, %v5496_v30  ;;  %v5499_v25 = vpop.f32.mrb[122].mxu1 }
 0x27c   : > { %v5394_v40 = vpop.f32.mrb[127].mxu0  ;;  %v5500_v16 = vpop.f32.mrb[123].mxu1 }
 0x27d   : > { %v3546_v23 = vadd.f32 %v5392_v52, %v7662_v56  ;;  %v5395_v62 = vadd.f32 %v5394_v40, %v5393_v32  ;;  %v5501_v21 = vadd.f32 %v5500_v16, %v5499_v25  ;;  %v7804_v58 = vadd.f32 %v5498_v51, %v3538_v39  ;;  %v5892_v56 = vld [vmem:[#allocation2 + $0xc0] sm:$0xff] }
 0x27e   : > { %v607_v36 = vmul.f32 %v5892_v56, %v7702_v29  ;;  %v4070_v39 = vadd.f32 %v4069_v6, %v7807_v57  ;;  %vm571_vm6 = vcmp.ge.f32.partialorder %v5892_v56, 0.0 }
 0x27f   : > { %v3549_v55 = vadd.f32 %v5395_v62, %v7667_v35  ;;  %v7810_v42 = vadd.f32 %v5501_v21, %v3541_v47  ;;  %v7821_v35 = vld [vmem:[%s6388_s10 + $0x3] ss:$0 sm:$0xff] }
 0x280   : > { %v7828_v6 = vsel %vm571_vm6, %v5892_v56, %v607_v36  ;;  %v4071_v21 = vadd.f32 %v4070_v39, %v7818_v34  ;;  %v5893_v56 = vld [vmem:[#allocation2 + $0xc8] sm:$0xff] }
 0x281   : > { %v5570_v60 = vpop.f32.mrb[128].mxu0  ;;  %v5502_v14 = vpop.f32.mrb[124].mxu1  ;;  %8952 = vst [vmem:[#allocation48_spill] sm:$0xff] %v7828_v6  ;;  %v608_v36 = vmul.f32 %v5893_v56, %v7702_v29  ;;  %vm572_vm13 = vcmp.ge.f32.partialorder %v5893_v56, 0.0 }
 0x282   : > { %v3756_v30 = vadd.f32 %v5570_v60, %v7677_v31  ;;  %v3747_v37 = vpop.f32.mrb[129].mxu0  ;;  %v5503_v38 = vpop.f32.mrb[125].mxu1 }
 0x283   : > { %v3748_v47 = vadd.f32 %v3747_v37, %v7671_v22  ;;  %v5571_v63 = vpop.f32.mrb[130].mxu0  ;;  %v5504_v52 = vadd.f32 %v5503_v38, %v5502_v14  ;;  %v5505_v32 = vpop.f32.mrb[126].mxu1 }
 0x284   : > { %v3881_v51 = vmul.f32 %v7813_v2, %v3756_v30  ;;  %v3759_v25 = vadd.f32 %v5571_v63, %v7680_v50  ;;  %v3750_v40 = vpop.f32.mrb[131].mxu0  ;;  %v5506_v16 = vpop.f32.mrb[127].mxu1 }
 0x285   : > { %v3879_v31 = vmul.f32 %v7813_v2, %v3748_v47  ;;  %v3751_v62 = vadd.f32 %v3750_v40, %v7674_v12  ;;  %v5507_v45 = vadd.f32 %v5506_v16, %v5505_v32  ;;  %v7836_v14 = vadd.f32 %v5504_v52, %v3546_v23  ;;  %v5894_v32 = vld [vmem:[#allocation2 + $0xd0] sm:$0xff] }
 0x286   : > { %v3918_v22 = vadd.f32 %v7821_v35, %v3881_v51  ;;  %v3882_v60 = vmul.f32 %v7813_v2, %v3759_v25  ;;  %v4072_v23 = vadd.f32 %v4071_v21, %v7828_v6  ;;  %vm573_vm11 = vcmp.ge.f32.partialorder %v5894_v32, 0.0 }
 0x287   : > { %v3916_v50 = vadd.f32 %v7821_v35, %v3879_v31  ;;  %v3880_v30 = vmul.f32 %v7813_v2, %v3751_v62  ;;  %v7841_v12 = vadd.f32 %v5507_v45, %v3549_v55  ;;  %v609_v55 = vmul.f32 %v5894_v32, %v7702_v29 }
 0x288   : > { %v3919_v37 = vadd.f32 %v7821_v35, %v3882_v60  ;;  %vm3951_vm8 = vcmp.ge.f32.partialorder %v3918_v22, 0.0  ;;  %v3987_v51 = vmul.f32 %v7833_v41, %v3918_v22 }
 0x289   : > { %v3985_v39 = vmul.f32 %v7833_v41, %v3916_v50  ;;  %v3917_v38 = vadd.f32 %v7821_v35, %v3880_v30  ;;  %v5574_v47 = vpop.f32.mrb[132].mxu0  ;;  %vm3949_vm10 = vcmp.ge.f32.partialorder %v3916_v50, 0.0 }
 0x28a   : > { %v3772_v63 = vadd.f32 %v5574_v47, %v7692_v59  ;;  %v3763_v52 = vpop.f32.mrb[133].mxu0  ;;  %vm3952_vm0 = vcmp.ge.f32.partialorder %v3919_v37, 0.0  ;;  %v3988_v31 = vmul.f32 %v7833_v41, %v3919_v37 }
 0x28b   : > { %vm3950_vm12 = vcmp.ge.f32.partialorder %v3917_v38, 0.0  ;;  %v3986_v25 = vmul.f32 %v7833_v41, %v3917_v38  ;;  %v3764_v40 = vadd.f32 %v3763_v52, %v7686_v4  ;;  %v5575_v16 = vpop.f32.mrb[134].mxu0  ;;  %v7855_v45 = vsel %vm3949_vm10, %v3916_v50, %v3985_v39 }
 0x28c   : > { %v3885_v62 = vmul.f32 %v7813_v2, %v3772_v63  ;;  %v3775_v21 = vadd.f32 %v5575_v16, %v7695_v54  ;;  %v3766_v59 = vpop.f32.mrb[135].mxu0  ;;  %v7866_v63 = vsel %vm572_vm13, %v5893_v56, %v608_v36  ;;  %v7869_v54 = vsel %vm3951_vm8, %v3918_v22, %v3987_v51 }
 0x28d   : > { %v7857_v60 = vsel %vm3950_vm12, %v3917_v38, %v3986_v25  ;;  %v3883_v30 = vmul.f32 %v7813_v2, %v3764_v40  ;;  %v3767_v47 = vadd.f32 %v3766_v59, %v7689_v46  ;;  %8953 = vst [vmem:[#allocation47_spill] sm:$0xff] %v7866_v63  ;;  %v7874_v46 = vsel %vm3952_vm0, %v3919_v37, %v3988_v31 }
 0x28e   : > { %v4086_v4 = vadd.f32 %v7857_v60, %v7855_v45  ;;  %v3922_v52 = vadd.f32 %v7821_v35, %v3885_v62  ;;  %v3886_v6 = vmul.f32 %v7813_v2, %v3775_v21  ;;  %v7882_v62 = vsel %vm573_vm11, %v5894_v32, %v609_v55 }
 0x28f   : > { %v3920_v50 = vadd.f32 %v7821_v35, %v3883_v30  ;;  %v3884_v39 = vmul.f32 %v7813_v2, %v3767_v47  ;;  %8954 = vst [vmem:[#allocation51_spill] sm:$0xff] %v7882_v62  ;;  %v4073_v37 = vadd.f32 %v4072_v23, %v7866_v63 }
 0x290   : > { %v4087_v38 = vadd.f32 %v4086_v4, %v7869_v54  ;;  %v3923_v40 = vadd.f32 %v7821_v35, %v3886_v6  ;;  %v3991_v22 = vmul.f32 %v7833_v41, %v3922_v52  ;;  %vm3955_vm7 = vcmp.ge.f32.partialorder %v3922_v52, 0.0 }
 0x291   : > { %vm3953_vm5 = vcmp.ge.f32.partialorder %v3920_v50, 0.0  ;;  %v3989_v25 = vmul.f32 %v7833_v41, %v3920_v50  ;;  %v3921_v56 = vadd.f32 %v7821_v35, %v3884_v39  ;;  %v5578_v36 = vpop.f32.mrb[136].mxu0 }
 0x292   : > { %v4088_v51 = vadd.f32 %v4087_v38, %v7874_v46  ;;  %v3779_v16 = vpop.f32.mrb[137].mxu0  ;;  %v3788_v59 = vadd.f32 %v5578_v36, %v7717_v28  ;;  %v3992_v32 = vmul.f32 %v7833_v41, %v3923_v40  ;;  %vm3956_vm4 = vcmp.ge.f32.partialorder %v3923_v40, 0.0 }
 0x293   : > { %v7885_v31 = vsel %vm3953_vm5, %v3920_v50, %v3989_v25  ;;  %vm3954_vm3 = vcmp.ge.f32.partialorder %v3921_v56, 0.0  ;;  %v3990_v21 = vmul.f32 %v7833_v41, %v3921_v56  ;;  %v5579_v6 = vpop.f32.mrb[138].mxu0  ;;  %v3780_v47 = vadd.f32 %v3779_v16, %v7705_v11 }
 0x294   : > { %v4089_v30 = vadd.f32 %v4088_v51, %v7885_v31  ;;  %v3791_v4 = vadd.f32 %v5579_v6, %v7720_v26  ;;  %v3782_v39 = vpop.f32.mrb[139].mxu0  ;;  %v3889_v23 = vmul.f32 %v7813_v2, %v3788_v59  ;;  %v7900_v36 = vsel %vm3955_vm7, %v3922_v52, %v3991_v22  ;;  %v5895_v51 = vld [vmem:[#allocation2 + $0xd8] sm:$0xff] }
 0x295   : > { %v7893_v55 = vsel %vm3954_vm3, %v3921_v56, %v3990_v21  ;;  %v3783_v50 = vadd.f32 %v3782_v39, %v7708_v49  ;;  %v3887_v38 = vmul.f32 %v7813_v2, %v3780_v47  ;;  %v610_v56 = vmul.f32 %v5895_v51, %v7702_v29 }
 0x296   : > { %v4090_v28 = vadd.f32 %v4089_v30, %v7893_v55  ;;  %v3890_v25 = vmul.f32 %v7813_v2, %v3791_v4  ;;  %v3926_v11 = vadd.f32 %v7821_v35, %v3889_v23  ;;  %vm574_vm1 = vcmp.ge.f32.partialorder %v5895_v51, 0.0 }
 0x297   : > { %v3888_v26 = vmul.f32 %v7813_v2, %v3783_v50  ;;  %v3924_v49 = vadd.f32 %v7821_v35, %v3887_v38  ;;  %v7907_v21 = vsel %vm3956_vm4, %v3923_v40, %v3992_v32  ;;  %v4074_v52 = vadd.f32 %v4073_v37, %v7882_v62 }
 0x298   : > { %v4091_v16 = vadd.f32 %v4090_v28, %v7900_v36  ;;  %v3927_v47 = vadd.f32 %v7821_v35, %v3890_v25  ;;  %v3995_v39 = vmul.f32 %v7833_v41, %v3926_v11  ;;  %v7916_v32 = vsel %vm574_vm1, %v5895_v51, %v610_v56 }
 0x299   : > { %v3925_v59 = vadd.f32 %v7821_v35, %v3888_v26  ;;  %v5582_v6 = vpop.f32.mrb[140].mxu0  ;;  %vm3957_vm9 = vcmp.ge.f32.partialorder %v3924_v49, 0.0  ;;  %v3993_v22 = vmul.f32 %v7833_v41, %v3924_v49  ;;  %8955 = vst [vmem:[#allocation49_spill] sm:$0xff] %v7916_v32  ;;  %vm3959_vm14 = vcmp.ge.f32.partialorder %v3926_v11, 0.0 }
 0x29a   : > { %v4092_v30 = vadd.f32 %v4091_v16, %v7907_v21  ;;  %v3795_v4 = vpop.f32.mrb[141].mxu0  ;;  %v3804_v37 = vadd.f32 %v5582_v6, %v7732_v10  ;;  %v3996_v63 = vmul.f32 %v7833_v41, %v3927_v47  ;;  %vm3960_vm6 = vcmp.ge.f32.partialorder %v3927_v47, 0.0 }
 0x29b   : > { %vm3958_vm2 = vcmp.ge.f32.partialorder %v3925_v59, 0.0  ;;  %v3994_v23 = vmul.f32 %v7833_v41, %v3925_v59  ;;  %v5583_v40 = vpop.f32.mrb[142].mxu0  ;;  %v7918_v50 = vsel %vm3957_vm9, %v3924_v49, %v3993_v22  ;;  %v3796_v28 = vadd.f32 %v3795_v4, %v7725_v8  ;;  %v5896_v49 = vld [vmem:[#allocation2 + $0xe0] sm:$0xff] }
 0x29c   : > { %v3807_v38 = vadd.f32 %v5583_v40, %v7735_v7  ;;  %v3798_v26 = vpop.f32.mrb[143].mxu0  ;;  %v4093_v25 = vadd.f32 %v4092_v30, %v7918_v50  ;;  %v3893_v51 = vmul.f32 %v7813_v2, %v3804_v37  ;;  %v611_v6 = vmul.f32 %v5896_v49, %v7702_v29  ;;  %v5897_v40 = vld [vmem:[#allocation2 + $0xe8] sm:$0xff] }
 0x29d   : > { %v7924_v16 = vsel %vm3958_vm2, %v3925_v59, %v3994_v23  ;;  %v3799_v62 = vadd.f32 %v3798_v26, %v7729_v44  ;;  %v3891_v56 = vmul.f32 %v7813_v2, %v3796_v28  ;;  %v7934_v59 = vsel %vm3959_vm14, %v3926_v11, %v3995_v39 }
 0x29e   : > { %v3894_v10 = vmul.f32 %v7813_v2, %v3807_v38  ;;  %v4094_v8 = vadd.f32 %v4093_v25, %v7924_v16  ;;  %v3930_v44 = vadd.f32 %v7821_v35, %v3893_v51  ;;  %vm575_vm13 = vcmp.ge.f32.partialorder %v5896_v49, 0.0 }
 0x29f   : > { %v3892_v7 = vmul.f32 %v7813_v2, %v3799_v62  ;;  %v3928_v22 = vadd.f32 %v7821_v35, %v3891_v56  ;;  %v612_v37 = vmul.f32 %v5897_v40, %v7702_v29  ;;  %v4075_v62 = vadd.f32 %v4074_v52, %v7916_v32 }
 0x2a0   : > { %v4095_v30 = vadd.f32 %v4094_v8, %v7934_v59  ;;  %v7942_v28 = vsel %vm3960_vm6, %v3927_v47, %v3996_v63  ;;  %v3931_v39 = vadd.f32 %v7821_v35, %v3894_v10  ;;  %vm576_vm12 = vcmp.ge.f32.partialorder %v5897_v40, 0.0 }
 0x2a1   : > { %v3929_v4 = vadd.f32 %v7821_v35, %v3892_v7  ;;  %v5586_v23 = vpop.f32.mrb[144].mxu0  ;;  %vm3961_vm8 = vcmp.ge.f32.partialorder %v3928_v22, 0.0  ;;  %v3997_v11 = vmul.f32 %v7833_v41, %v3928_v22  ;;  %v7948_v51 = vsel %vm575_vm13, %v5896_v49, %v611_v6 }
 0x2a2   : > { %v3811_v38 = vpop.f32.mrb[145].mxu0  ;;  %v4096_v26 = vadd.f32 %v4095_v30, %v7942_v28  ;;  %8956 = vst [vmem:[#allocation52_spill] sm:$0xff] %v7948_v51  ;;  %v3999_v56 = vmul.f32 %v7833_v41, %v3930_v44  ;;  %v3820_v52 = vadd.f32 %v5586_v23, %v7750_v9  ;;  %vm3963_vm0 = vcmp.ge.f32.partialorder %v3930_v44, 0.0 }
 0x2a3   : > { %vm3962_vm10 = vcmp.ge.f32.partialorder %v3929_v4, 0.0  ;;  %v5587_v25 = vpop.f32.mrb[146].mxu0  ;;  %v7951_v8 = vsel %vm3961_vm8, %v3928_v22, %v3997_v11  ;;  %v3998_v63 = vmul.f32 %v7833_v41, %v3929_v4  ;;  %v3812_v7 = vadd.f32 %v3811_v38, %v7738_v13 }
 0x2a4   : > { %v3814_v47 = vpop.f32.mrb[147].mxu0  ;;  %v4097_v10 = vadd.f32 %v4096_v26, %v7951_v8  ;;  %v3823_v30 = vadd.f32 %v5587_v25, %v7753_v20  ;;  %v4000_v32 = vmul.f32 %v7833_v41, %v3931_v39  ;;  %v3897_v6 = vmul.f32 %v7813_v2, %v3820_v52 }
 0x2a5   : > { %v7959_v49 = vsel %vm3962_vm10, %v3929_v4, %v3998_v63  ;;  %v3815_v22 = vadd.f32 %v3814_v47, %v7741_v53  ;;  %vm3964_vm11 = vcmp.ge.f32.partialorder %v3931_v39, 0.0  ;;  %v3895_v9 = vmul.f32 %v7813_v2, %v3812_v7  ;;  %v5898_v63 = vld [vmem:[#allocation2 + $0xf0] sm:$0xff] }
 0x2a6   : > { %v4098_v11 = vadd.f32 %v4097_v10, %v7959_v49  ;;  %v3898_v23 = vmul.f32 %v7813_v2, %v3823_v30  ;;  %v7966_v26 = vsel %vm3963_vm0, %v3930_v44, %v3999_v56  ;;  %v3934_v13 = vadd.f32 %v7821_v35, %v3897_v6 }
 0x2a7   : > { %v3896_v20 = vmul.f32 %v7813_v2, %v3815_v22  ;;  %v4076_v4 = vadd.f32 %v4075_v62, %v7948_v51  ;;  %v3932_v25 = vadd.f32 %v7821_v35, %v3895_v9  ;;  %v613_v52 = vmul.f32 %v5898_v63, %v7702_v29 }
 0x2a8   : > { %v4099_v38 = vadd.f32 %v4098_v11, %v7966_v26  ;;  %v7975_v47 = vsel %vm576_vm12, %v5897_v40, %v612_v37  ;;  %v7977_v10 = vsel %vm3964_vm11, %v3931_v39, %v4000_v32  ;;  %vm577_vm5 = vcmp.ge.f32.partialorder %v5898_v63, 0.0 }
 0x2a9   : > { %v5590_v53 = vpop.f32.mrb[148].mxu0  ;;  %v3933_v44 = vadd.f32 %v7821_v35, %v3896_v20  ;;  %vm3965_vm3 = vcmp.ge.f32.partialorder %v3932_v25, 0.0  ;;  %v4001_v62 = vmul.f32 %v7833_v41, %v3932_v25  ;;  %v3935_v6 = vadd.f32 %v7821_v35, %v3898_v23 }
 0x2aa   : > { %v3836_v56 = vadd.f32 %v5590_v53, %v7765_v24  ;;  %v3827_v7 = vpop.f32.mrb[149].mxu0  ;;  %v4100_v30 = vadd.f32 %v4099_v38, %v7977_v10  ;;  %v4003_v11 = vmul.f32 %v7833_v41, %v3934_v13  ;;  %v4077_v37 = vadd.f32 %v4076_v4, %v7975_v47 }
 0x2ab   : > { %v5591_v22 = vpop.f32.mrb[150].mxu0  ;;  %vm3966_vm7 = vcmp.ge.f32.partialorder %v3933_v44, 0.0  ;;  %v4002_v32 = vmul.f32 %v7833_v41, %v3933_v44  ;;  %v7987_v39 = vsel %vm3965_vm3, %v3932_v25, %v4001_v62  ;;  %v3828_v9 = vadd.f32 %v3827_v7, %v7758_v5  ;;  %v5899_v62 = vld [vmem:[#allocation2 + $0xf8] sm:$0xff] }
 0x2ac   : > { %v3830_v40 = vpop.f32.mrb[151].mxu0  ;;  %v3901_v24 = vmul.f32 %v7813_v2, %v3836_v56  ;;  %v3839_v20 = vadd.f32 %v5591_v22, %v7768_v43  ;;  %vm3967_vm4 = vcmp.ge.f32.partialorder %v3934_v13, 0.0  ;;  %v4101_v23 = vadd.f32 %v4100_v30, %v7987_v39 }
 0x2ad   : > { %v7993_v38 = vsel %vm3966_vm7, %v3933_v44, %v4002_v32  ;;  %v3831_v53 = vadd.f32 %v3830_v40, %v7761_v27  ;;  %v4004_v51 = vmul.f32 %v7833_v41, %v3935_v6  ;;  %v3899_v34 = vmul.f32 %v7813_v2, %v3828_v9 }
 0x2ae   : > { %v3902_v4 = vmul.f32 %v7813_v2, %v3839_v20  ;;  %v8000_v25 = vsel %vm577_vm5, %v5898_v63, %v613_v52  ;;  %vm3968_vm1 = vcmp.ge.f32.partialorder %v3935_v6, 0.0  ;;  %v4102_v5 = vadd.f32 %v4101_v23, %v7993_v38 }
 0x2af   : > { %v3938_v43 = vadd.f32 %v7821_v35, %v3901_v24  ;;  %v3900_v56 = vmul.f32 %v7813_v2, %v3831_v53  ;;  %v8005_v44 = vsel %vm3967_vm4, %v3934_v13, %v4003_v11  ;;  %v3936_v27 = vadd.f32 %v7821_v35, %v3899_v34 }
 0x2b0   : > { %vm578_vm9 = vcmp.ge.f32.partialorder %v5899_v62, 0.0  ;;  %v614_v30 = vmul.f32 %v5899_v62, %v7702_v29  ;;  %v4103_v22 = vadd.f32 %v4102_v5, %v8005_v44  ;;  %v4078_v40 = vadd.f32 %v4077_v37, %v8000_v25 }
 0x2b1   : > { %v5594_v7 = vpop.f32.mrb[152].mxu0  ;;  %v3937_v63 = vadd.f32 %v7821_v35, %v3900_v56  ;;  %v8013_v24 = vsel %vm3968_vm1, %v3935_v6, %v4004_v51  ;;  %vm3969_vm2 = vcmp.ge.f32.partialorder %v3936_v27, 0.0  ;;  %v4005_v13 = vmul.f32 %v7833_v41, %v3936_v27 }
 0x2b2   : > { %v3852_v52 = vadd.f32 %v5594_v7, %v7790_v48  ;;  %v3843_v32 = vpop.f32.mrb[153].mxu0  ;;  %v3939_v34 = vadd.f32 %v7821_v35, %v3902_v4  ;;  %v4007_v9 = vmul.f32 %v7833_v41, %v3938_v43  ;;  %v4104_v29 = vadd.f32 %v4103_v22, %v8013_v24 }
 0x2b3   : > { %v5595_v11 = vpop.f32.mrb[154].mxu0  ;;  %vm3970_vm14 = vcmp.ge.f32.partialorder %v3937_v63, 0.0  ;;  %v4006_v20 = vmul.f32 %v7833_v41, %v3937_v63  ;;  %v8020_v48 = vsel %vm3969_vm2, %v3936_v27, %v4005_v13  ;;  %v3844_v51 = vadd.f32 %v3843_v32, %v7776_v0 }
 0x2b4   : > { %v3846_v23 = vpop.f32.mrb[155].mxu0  ;;  %v3905_v37 = vmul.f32 %v7813_v2, %v3852_v52  ;;  %v3855_v6 = vadd.f32 %v5595_v11, %v7796_v17  ;;  %vm3971_vm6 = vcmp.ge.f32.partialorder %v3938_v43, 0.0  ;;  %v4105_v53 = vadd.f32 %v4104_v29, %v8020_v48 }
 0x2b5   : > { %v8026_v4 = vsel %vm3970_vm14, %v3937_v63, %v4006_v20  ;;  %v3847_v5 = vadd.f32 %v3846_v23, %v7782_v18  ;;  %v4008_v56 = vmul.f32 %v7833_v41, %v3939_v34  ;;  %v3903_v7 = vmul.f32 %v7813_v2, %v3844_v51 }
 0x2b6   : > { %v3906_v27 = vmul.f32 %v7813_v2, %v3855_v6  ;;  %v8033_v22 = vsel %vm578_vm9, %v5899_v62, %v614_v30  ;;  %vm3972_vm13 = vcmp.ge.f32.partialorder %v3939_v34, 0.0  ;;  %v4106_v0 = vadd.f32 %v4105_v53, %v8026_v4 }
 0x2b7   : > { %v3942_v17 = vadd.f32 %v7821_v35, %v3905_v37  ;;  %v3904_v52 = vmul.f32 %v7813_v2, %v3847_v5  ;;  %v8038_v63 = vsel %vm3971_vm6, %v3938_v43, %v4007_v9  ;;  %v3940_v18 = vadd.f32 %v7821_v35, %v3903_v7 }
 0x2b8   : > { %v4107_v13 = vadd.f32 %v4106_v0, %v8038_v63  ;;  %v4079_v30 = vadd.f32 %v4078_v40, %v8033_v22  ;;  %v8045_v20 = vsel %vm3972_vm13, %v3939_v34, %v4008_v56  ;;  %v3943_v43 = vadd.f32 %v7821_v35, %v3906_v27 }
 0x2b9   : > { %v5598_v32 = vpop.f32.mrb[156].mxu0  ;;  %v3941_v11 = vadd.f32 %v7821_v35, %v3904_v52  ;;  %vm3973_vm8 = vcmp.ge.f32.partialorder %v3940_v18, 0.0  ;;  %v4009_v23 = vmul.f32 %v7833_v41, %v3940_v18  ;;  %v4011_v37 = vmul.f32 %v7833_v41, %v3942_v17 }
 0x2ba   : > { %v3868_v29 = vadd.f32 %v5598_v32, %v7836_v14  ;;  %v3859_v62 = vpop.f32.mrb[157].mxu0  ;;  %v4108_v51 = vadd.f32 %v4107_v13, %v8045_v20  ;;  %vm3975_vm12 = vcmp.ge.f32.partialorder %v3942_v17, 0.0  ;;  %v4012_v0 = vmul.f32 %v7833_v41, %v3943_v43 }
 0x2bb   : > { %v5599_v9 = vpop.f32.mrb[158].mxu0  ;;  %vm3974_vm10 = vcmp.ge.f32.partialorder %v3941_v11, 0.0  ;;  %v4010_v6 = vmul.f32 %v7833_v41, %v3941_v11  ;;  %v8052_v14 = vsel %vm3973_vm8, %v3940_v18, %v4009_v23  ;;  %v3860_v34 = vadd.f32 %v3859_v62, %v7804_v58 }
 0x2bc   : > { %v3862_v53 = vpop.f32.mrb[159].mxu0  ;;  %v3909_v40 = vmul.f32 %v7813_v2, %v3868_v29  ;;  %v3871_v5 = vadd.f32 %v5599_v9, %v7841_v12  ;;  %v4109_v56 = vadd.f32 %v4108_v51, %v8052_v14  ;;  %vm3976_vm0 = vcmp.ge.f32.partialorder %v3943_v43, 0.0 }
 0x2bd   : > { %v8058_v7 = vsel %vm3974_vm10, %v3941_v11, %v4010_v6  ;;  %v3863_v27 = vadd.f32 %v3862_v53, %v7810_v42  ;;  %v3907_v52 = vmul.f32 %v7813_v2, %v3860_v34  ;;  %v4080_v13 = vrot.slane %v4079_v30, 4 }
 0x2be   : > { %v3910_v18 = vmul.f32 %v7813_v2, %v3871_v5  ;;  %v4110_v32 = vadd.f32 %v4109_v56, %v8058_v7  ;;  %v8066_v12 = vsel %vm3975_vm12, %v3942_v17, %v4011_v37  ;;  %v3946_v29 = vadd.f32 %v7821_v35, %v3909_v40 }
 0x2bf   : > { %v3908_v58 = vmul.f32 %v7813_v2, %v3863_v27  ;;  %v3944_v11 = vadd.f32 %v7821_v35, %v3907_v52  ;;  %v8072_v23 = vsel %vm3976_vm0, %v3943_v43, %v4012_v0  ;;  %v4081_v37 = vadd.f32 %v4080_v13, %v4079_v30 }
 0x2c0   : > { %v4111_v42 = vadd.f32 %v4110_v32, %v8066_v12  ;;  %v3947_v51 = vadd.f32 %v7821_v35, %v3910_v18  ;;  %v4015_v6 = vmul.f32 %v7833_v41, %v3946_v29  ;;  %vm3979_vm3 = vcmp.ge.f32.partialorder %v3946_v29, 0.0 }
 0x2c1   : > { %v3945_v62 = vadd.f32 %v7821_v35, %v3908_v58  ;;  %vm3977_vm11 = vcmp.ge.f32.partialorder %v3944_v11, 0.0  ;;  %v4013_v9 = vmul.f32 %v7833_v41, %v3944_v11  ;;  %v4082_v5 = vrot.slane %v4081_v37, 2 }
 0x2c2   : > { %v4112_v2 = vadd.f32 %v4111_v42, %v8072_v23  ;;  %v4016_v34 = vmul.f32 %v7833_v41, %v3947_v51  ;;  %vm3980_vm7 = vcmp.ge.f32.partialorder %v3947_v51, 0.0  ;;  %v8086_v56 = vsel %vm3979_vm3, %v3946_v29, %v4015_v6  ;;  %v4123_v42 = vld [vmem:[%s6388_s10 + $0x5] sm:$0x1]  ;;  %v4125_v29 = vld [vmem:[%s6388_s10 + $0x6] sm:$0x1] }
 0x2c3   : > { %vm3978_vm5 = vcmp.ge.f32.partialorder %v3945_v62, 0.0  ;;  %v4014_v17 = vmul.f32 %v7833_v41, %v3945_v62  ;;  %v8079_v53 = vsel %vm3977_vm11, %v3944_v11, %v4013_v9  ;;  %v4083_v52 = vadd.f32 %v4082_v5, %v4081_v37  ;;  %v5900_v37 = vld [vmem:[#allocation3 + $0x8] sm:$0xff]  ;;  %v4145_v5 = vld [vmem:[%s428_s7] sm:$0x1] }
 0x2c4   : > { %v4113_v40 = vadd.f32 %v4112_v2, %v8079_v53  ;;  %v8089_v27 = vsel %vm3980_vm7, %v3947_v51, %v4016_v34  ;;  %v4218_v34 = vld [vmem:[%s6402_s29 + $0x8] sm:$0xff]  ;;  %vm4220_vm4 = vcmask 130048  }
 0x2c5   : > { %v8082_v43 = vsel %vm3978_vm5, %v3945_v62, %v4014_v17  ;;  %v4084_v58 = vrot.slane %v4083_v52, 1 }
 0x2c6   : > { %v4114_v35 = vadd.f32 %v4113_v40, %v8082_v43  ;;  %v4217_v40 = vld [vmem:[%s6402_s29] sm:$0xff] }
 0x2c7   : > { %v4085_v11 = vadd.f32 %v4084_v58, %v4083_v52  ;;  %v8106_v58 = vld [vmem:[%s6388_s10 + $0x8] sm:$0x1] }
 0x2c8   : > { %v4115_v30 = vadd.f32 %v4114_v35, %v8086_v56  ;;  %v5667_v35 = vpack.c.bf16 %v4218_v34, %v4217_v40  ;;  %8957 = vst [vmem:[#allocation28_spill] sm:$0xff] %v8106_v58 }
 0x2c9   : > { %v4124_v2 = vmul.f32 %v4123_v42, %v4085_v11 }
 0x2ca   : > { %v4116_v0 = vadd.f32 %v4115_v30, %v8089_v27 }
 0x2cc   : > { %v4117_v18 = vrot.slane %v4116_v0, 4 }
 0x2ce   : > { %v4118_v32 = vadd.f32 %v4117_v18, %v4116_v0 }
 0x2d0   : > { %v4119_v41 = vrot.slane %v4118_v32, 2 }
 0x2d2   : > { %v4120_v13 = vadd.f32 %v4119_v41, %v4118_v32  ;;  %v8103_v32 = vld [vmem:[%s6388_s10 + $0x7] sm:$0x1]  ;;  %v4219_v41 = vld [vmem:[%s436_s17] sm:$0x1] }
 0x2d4   : > { %v4121_v62 = vrot.slane %v4120_v13, 1 }
 0x2d6   : > { %v4122_v9 = vadd.f32 %v4121_v62, %v4120_v13 }
 0x2d8   : > { %v4126_v17 = vmul.f32 %v4125_v29, %v4122_v9 }
 0x2da   : > { %v4127_v51 = vadd.f32 %v4126_v17, %v4124_v2  ;;  %v8958_v17 = vld [vmem:[#allocation25_spill] sm:$0xff] }
 0x2dc   : > { %v4128_v6 = vmul.f32 0.00390625, %v4127_v51  ;;  %v8114_v51 = vsub.s32 0, %v8958_v17  ;;  %v8973_v17 = vld [vmem:[#allocation34_spill] sm:$0xff] (!%p4841_p6) }
 0x2de   : > { %5633 = vmatmul.mubr.f32.vlgmr.msra.gmra.mrb[128].mxu1 %v4128_v6 }
 0x2df   : > { %5639 = vmatprep.mubr.msk.f32.mxu1 %vm6099_vm15, %v5900_v37  ;;  %5668 = vmatpush3.bf16.msra.mxu1 %v5667_v35 }
 0x3b1   : > { %v4212_v30 = vpop.f32.mrb[128].mxu1 }
 0x3b2   : > { %v4213_v0 = vadd.f32 %v4212_v30, %v4145_v5  ;;  %v5634_v52 = vpop.f32.mrb[129].mxu1 }
 0x3b4   : > { %v4216_v18 = vmax.f32 %v4213_v0, 0.0 }
 0x3b6   : > { %5640 = vmatmul.mubr.msk.f32.vlgmr.msra.gmra.mrb[130].mxu1 %vm4220_vm4, %v4216_v18  ;;  %v8969_v18 = vld [vmem:[#allocation29_spill] sm:$0xff] (!%p4841_p6) }
 0x489   : > { %v4290_v13 = vpop.f32.mrb[130].mxu1 }
 0x48a   : > { %v4291_v11 = vadd.f32 %v4290_v13, %v4219_v41  ;;  %v5641_v42 = vpop.f32.mrb[131].mxu1  ;;  %v8970_v41 = vld [vmem:[#allocation30_spill] sm:$0xff] (!%p4841_p6) }
 0x48c   : > { %v4294_v62 = vsub.f32 0.0, %v4291_v11  ;;  %v8971_v11 = vld [vmem:[#allocation31_spill] sm:$0xff] (!%p4841_p6) }
 0x48e   : > { %v4295_v29 = vmul.f32 1.442695, %v4294_v62  ;;  %v8972_v62 = vld [vmem:[#allocation32_spill] sm:$0xff] (!%p4841_p6) }
 0x490   : > { %5862 = vpow2.f32 %v4295_v29 }
 0x49a   : > { %v5863_v9 = vpop.eup %5862 }
 0x49b   : > { %v4297_v2 = vadd.f32 1.0, %v5863_v9 }
 0x49d   : > { %5864 = vrcp.f32 %v4297_v2 }
 0x4a7   : > { %v5865_v6 = vpop.eup %5864 }
 0x4a8   : > { %v4303_v37 = vrot.slane %v5865_v6, %v8114_v51 }
 0x4aa   : > { %v8118_v40 = vmul.f32 %v4303_v37, %v7855_v45  ;;  %v8121_v34 = vmul.f32 %v4303_v37, %v7857_v60  ;;  %v8124_v35 = vmul.f32 %v4303_v37, %v7869_v54  ;;  %v8127_v5 = vmul.f32 %v4303_v37, %v7874_v46 }
 0x4ab   : > { %v8130_v30 = vmul.f32 %v4303_v37, %v7885_v31  ;;  %v8133_v0 = vmul.f32 %v4303_v37, %v7893_v55  ;;  %v8136_v52 = vmul.f32 %v4303_v37, %v7900_v36  ;;  %v8139_v45 = vmul.f32 %v4303_v37, %v7907_v21 }
 0x4ac   : > { %8959 = vst [vmem:[#allocation33_spill] sm:$0xff] %v8118_v40  ;;  %8960 = vst [vmem:[#allocation50_spill] sm:$0xff] %v8121_v34  ;;  %v8142_v60 = vmul.f32 %v4303_v37, %v7918_v50  ;;  %v8145_v54 = vmul.f32 %v4303_v37, %v7924_v16  ;;  %v8148_v46 = vmul.f32 %v4303_v37, %v7934_v59  ;;  %4340 = sbr.rel (%p4841_p6) target bundleno = 1242 (0x4da), region = 64 }
 0x4ad   : > { %8961 = vst [vmem:[#allocation38_spill] sm:$0xff] %v8124_v35  ;;  %8962 = vst [vmem:[#allocation45_spill] sm:$0xff] %v8127_v5  ;;  %v8151_v31 = vmul.f32 %v4303_v37, %v7942_v28  ;;  %v8154_v55 = vmul.f32 %v4303_v37, %v7951_v8  ;;  %v8157_v36 = vmul.f32 %v4303_v37, %v7959_v49 }
 0x4ae   : > { %8963 = vst [vmem:[#allocation25_spill] sm:$0xff] %v8130_v30  ;;  %8964 = vst [vmem:[#allocation53_spill] sm:$0xff] %v8133_v0  ;;  %v8160_v21 = vmul.f32 %v4303_v37, %v7966_v26  ;;  %v8163_v50 = vmul.f32 %v4303_v37, %v7977_v10  ;;  %v8166_v16 = vmul.f32 %v4303_v37, %v7987_v39 }
 0x4af   : > { %8965 = vst [vmem:[#allocation54_spill] sm:$0xff] %v8136_v52  ;;  %8966 = vst [vmem:[#allocation55_spill] sm:$0xff] %v8139_v45  ;;  %v8169_v59 = vmul.f32 %v4303_v37, %v7993_v38  ;;  %v8172_v28 = vmul.f32 %v4303_v37, %v8005_v44  ;;  %v8175_v8 = vmul.f32 %v4303_v37, %v8013_v24 }
 0x4b0   : > { %v8178_v49 = vmul.f32 %v4303_v37, %v8020_v48  ;;  %v8181_v26 = vmul.f32 %v4303_v37, %v8026_v4  ;;  %v8184_v10 = vmul.f32 %v4303_v37, %v8038_v63  ;;  %v8187_v39 = vmul.f32 %v4303_v37, %v8045_v20 }
 0x4b1   : > { %v8190_v38 = vmul.f32 %v4303_v37, %v8052_v14  ;;  %v8193_v44 = vmul.f32 %v4303_v37, %v8058_v7  ;;  %v8196_v24 = vmul.f32 %v4303_v37, %v8066_v12  ;;  %v8199_v48 = vmul.f32 %v4303_v37, %v8072_v23  ;;  %v8967_v7 = vld [vmem:[#allocation26_spill] sm:$0xff] (!%p4841_p6) }
 0x4b2   : > { %v8202_v4 = vmul.f32 %v4303_v37, %v8079_v53  ;;  %v8205_v63 = vmul.f32 %v4303_v37, %v8082_v43  ;;  %v8208_v20 = vmul.f32 %v4303_v37, %v8086_v56  ;;  %v8211_v14 = vmul.f32 %v4303_v37, %v8089_v27  ;;  %v8968_v43 = vld [vmem:[#allocation27_spill] sm:$0xff] (!%p4841_p6) }
 0x4b3   : > { %v4341_v12 = vmul.f32 %v8118_v40, %v8967_v7  ;;  %v8219_v23 = vrot.slane %v8103_v32, %v8114_v51  ;;  %v8223_v53 = vrot.slane %v8106_v58, %v8114_v51  ;;  %v4342_v56 = vmul.f32 %v8121_v34, %v8968_v43  ;;  %v8974_v37 = vld [vmem:[#allocation35_spill] sm:$0xff] }
 0x4b4   : > { %v4343_v27 = vmul.f32 %v8124_v35, %v8969_v18  ;;  %v4344_v13 = vmul.f32 %v8127_v5, %v8970_v41  ;;  %v4345_v42 = vmul.f32 %v8130_v30, %v8971_v11  ;;  %v4346_v29 = vmul.f32 %v8133_v0, %v8972_v62 }
 0x4b5   : > { %v4377_v9 = vmul.f32 %v8219_v23, %v4341_v12  ;;  %v4378_v2 = vmul.f32 %v8219_v23, %v4342_v56  ;;  %v4347_v6 = vmul.f32 %v8136_v52, %v8973_v17  ;;  %v4348_v34 = vmul.f32 %v8139_v45, %v8974_v37 }
 0x4b6   : > { %v4379_v35 = vmul.f32 %v8219_v23, %v4343_v27  ;;  %v4380_v5 = vmul.f32 %v8219_v23, %v4344_v13  ;;  %v4381_v40 = vmul.f32 %v8219_v23, %v4345_v42  ;;  %v4382_v30 = vmul.f32 %v8219_v23, %v4346_v29 }
 0x4b7   : > { %v4413_v0 = vadd.f32 %v8223_v53, %v4377_v9  ;;  %v4414_v12 = vadd.f32 %v8223_v53, %v4378_v2  ;;  %v4383_v56 = vmul.f32 %v8219_v23, %v4347_v6  ;;  %v4384_v58 = vmul.f32 %v8219_v23, %v4348_v34 }
 0x4b8   : > { %v4415_v52 = vadd.f32 %v8223_v53, %v4379_v35  ;;  %v4416_v45 = vadd.f32 %v8223_v53, %v4380_v5  ;;  %v4417_v27 = vadd.f32 %v8223_v53, %v4381_v40  ;;  %v4418_v13 = vadd.f32 %v8223_v53, %v4382_v30 }
 0x4b9   : > { %v4445_v42 = vadd.f32 %v4413_v0, %v8967_v7  ;;  %v4446_v29 = vadd.f32 %v4414_v12, %v8968_v43  ;;  %v4419_v9 = vadd.f32 %v8223_v53, %v4383_v56  ;;  %v4420_v2 = vadd.f32 %v8223_v53, %v4384_v58  ;;  %v8975_v0 = vld [vmem:[#allocation36_spill] sm:$0xff]  ;;  %v8976_v43 = vld [vmem:[#allocation37_spill] sm:$0xff] }
 0x4ba   : > { %v4447_v6 = vadd.f32 %v4415_v52, %v8969_v18  ;;  %v4448_v34 = vadd.f32 %v4416_v45, %v8970_v41  ;;  %v4449_v35 = vadd.f32 %v4417_v27, %v8971_v11  ;;  %v4450_v5 = vadd.f32 %v4418_v13, %v8972_v62  ;;  %v8977_v52 = vld [vmem:[#allocation39_spill] sm:$0xff]  ;;  %v8978_v18 = vld [vmem:[#allocation40_spill] sm:$0xff]  ;;  %v8979_v11 = vld [vmem:[#allocation41_spill] sm:$0xff] }
 0x4bb   : > { %4477 = vst [vmem:[#allocation2] sm:$0xff] %v4445_v42  ;;  %4478 = vst [vmem:[#allocation2 + $0x8] sm:$0xff] %v4446_v29  ;;  %v4451_v40 = vadd.f32 %v4419_v9, %v8973_v17  ;;  %v4452_v30 = vadd.f32 %v4420_v2, %v8974_v37  ;;  %v4349_v7 = vmul.f32 %v8142_v60, %v8975_v0  ;;  %v8980_v17 = vld [vmem:[#allocation42_spill] sm:$0xff]  ;;  %v8981_v27 = vld [vmem:[#allocation43_spill] sm:$0xff] }
 0x4bc   : > { %v4350_v58 = vmul.f32 %v8145_v54, %v8976_v43  ;;  %4479 = vst [vmem:[#allocation2 + $0x10] sm:$0xff] %v4447_v6  ;;  %4480 = vst [vmem:[#allocation2 + $0x18] sm:$0xff] %v4448_v34  ;;  %v4351_v45 = vmul.f32 %v8148_v46, %v8977_v52  ;;  %v4352_v41 = vmul.f32 %v8151_v31, %v8978_v18  ;;  %v8982_v42 = vld [vmem:[#allocation44_spill] sm:$0xff] }
 0x4bd   : > { %4481 = vst [vmem:[#allocation2 + $0x20] sm:$0xff] %v4449_v35  ;;  %4482 = vst [vmem:[#allocation2 + $0x28] sm:$0xff] %v4450_v5  ;;  %v4353_v62 = vmul.f32 %v8154_v55, %v8979_v11  ;;  %v4354_v37 = vmul.f32 %v8157_v36, %v8980_v17  ;;  %v4385_v12 = vmul.f32 %v8219_v23, %v4349_v7 }
 0x4be   : > { %4483 = vst [vmem:[#allocation2 + $0x30] sm:$0xff] %v4451_v40  ;;  %4484 = vst [vmem:[#allocation2 + $0x38] sm:$0xff] %v4452_v30  ;;  %v4386_v56 = vmul.f32 %v8219_v23, %v4350_v58  ;;  %v4355_v13 = vmul.f32 %v8160_v21, %v8981_v27  ;;  %v4356_v29 = vmul.f32 %v8163_v50, %v8982_v42 }
 0x4bf   : > { %v4387_v9 = vmul.f32 %v8219_v23, %v4351_v45  ;;  %v4388_v2 = vmul.f32 %v8219_v23, %v4352_v41  ;;  %v4389_v6 = vmul.f32 %v8219_v23, %v4353_v62  ;;  %v4390_v34 = vmul.f32 %v8219_v23, %v4354_v37 }
 0x4c0   : > { %v4421_v35 = vadd.f32 %v8223_v53, %v4385_v12  ;;  %v4422_v5 = vadd.f32 %v8223_v53, %v4386_v56  ;;  %v4391_v40 = vmul.f32 %v8219_v23, %v4355_v13  ;;  %v4392_v30 = vmul.f32 %v8219_v23, %v4356_v29 }
 0x4c1   : > { %v4423_v7 = vadd.f32 %v8223_v53, %v4387_v9  ;;  %v4424_v58 = vadd.f32 %v8223_v53, %v4388_v2  ;;  %v4425_v45 = vadd.f32 %v8223_v53, %v4389_v6  ;;  %v4426_v41 = vadd.f32 %v8223_v53, %v4390_v34 }
 0x4c2   : > { %v4453_v62 = vadd.f32 %v4421_v35, %v8975_v0  ;;  %v4454_v37 = vadd.f32 %v4422_v5, %v8976_v43  ;;  %v4427_v12 = vadd.f32 %v8223_v53, %v4391_v40  ;;  %v4428_v56 = vadd.f32 %v8223_v53, %v4392_v30  ;;  %v8983_v5 = vld [vmem:[#allocation46_spill] sm:$0xff] }
 0x4c3   : > { %v4455_v13 = vadd.f32 %v4423_v7, %v8977_v52  ;;  %v4456_v29 = vadd.f32 %v4424_v58, %v8978_v18  ;;  %v4457_v9 = vadd.f32 %v4425_v45, %v8979_v11  ;;  %v4458_v2 = vadd.f32 %v4426_v41, %v8980_v17 }
 0x4c4   : > { %4485 = vst [vmem:[#allocation2 + $0x40] sm:$0xff] %v4453_v62  ;;  %4486 = vst [vmem:[#allocation2 + $0x48] sm:$0xff] %v4454_v37  ;;  %v4459_v6 = vadd.f32 %v4427_v12, %v8981_v27  ;;  %v4460_v0 = vadd.f32 %v4428_v56, %v8982_v42  ;;  %v4357_v43 = vmul.f32 %v8166_v16, %v7710_v15 }
 0x4c5   : > { %v4358_v34 = vmul.f32 %v8169_v59, %v7771_v1  ;;  %4487 = vst [vmem:[#allocation2 + $0x50] sm:$0xff] %v4455_v13  ;;  %4488 = vst [vmem:[#allocation2 + $0x58] sm:$0xff] %v4456_v29  ;;  %v4359_v52 = vmul.f32 %v8172_v28, %v7779_v33  ;;  %v4360_v18 = vmul.f32 %v8175_v8, %v7786_v61 }
 0x4c6   : > { %4489 = vst [vmem:[#allocation2 + $0x60] sm:$0xff] %v4457_v9  ;;  %4490 = vst [vmem:[#allocation2 + $0x68] sm:$0xff] %v4458_v2  ;;  %v4361_v11 = vmul.f32 %v8178_v49, %v7793_v19  ;;  %v4362_v17 = vmul.f32 %v8181_v26, %v7800_v3  ;;  %v4393_v27 = vmul.f32 %v8219_v23, %v4357_v43 }
 0x4c7   : > { %4491 = vst [vmem:[#allocation2 + $0x70] sm:$0xff] %v4459_v6  ;;  %4492 = vst [vmem:[#allocation2 + $0x78] sm:$0xff] %v4460_v0  ;;  %v4394_v42 = vmul.f32 %v8219_v23, %v4358_v34  ;;  %v4363_v35 = vmul.f32 %v8184_v10, %v7807_v57  ;;  %v4364_v40 = vmul.f32 %v8187_v39, %v8983_v5 }
 0x4c8   : > { %v4395_v30 = vmul.f32 %v8219_v23, %v4359_v52  ;;  %v4396_v7 = vmul.f32 %v8219_v23, %v4360_v18  ;;  %v4397_v58 = vmul.f32 %v8219_v23, %v4361_v11  ;;  %v4398_v45 = vmul.f32 %v8219_v23, %v4362_v17 }
 0x4c9   : > { %v4429_v41 = vadd.f32 %v8223_v53, %v4393_v27  ;;  %v4430_v62 = vadd.f32 %v8223_v53, %v4394_v42  ;;  %v4399_v37 = vmul.f32 %v8219_v23, %v4363_v35  ;;  %v4400_v12 = vmul.f32 %v8219_v23, %v4364_v40  ;;  %v8984_v42 = vld [vmem:[#allocation48_spill] sm:$0xff]  ;;  %v8985_v40 = vld [vmem:[#allocation47_spill] sm:$0xff] }
 0x4ca   : > { %v4431_v56 = vadd.f32 %v8223_v53, %v4395_v30  ;;  %v4432_v13 = vadd.f32 %v8223_v53, %v4396_v7  ;;  %v4433_v29 = vadd.f32 %v8223_v53, %v4397_v58  ;;  %v4434_v9 = vadd.f32 %v8223_v53, %v4398_v45  ;;  %v8986_v7 = vld [vmem:[#allocation51_spill] sm:$0xff]  ;;  %v8987_v45 = vld [vmem:[#allocation49_spill] sm:$0xff] }
 0x4cb   : > { %v4461_v2 = vadd.f32 %v4429_v41, %v7710_v15  ;;  %v4462_v6 = vadd.f32 %v4430_v62, %v7771_v1  ;;  %v4435_v0 = vadd.f32 %v8223_v53, %v4399_v37  ;;  %v4436_v43 = vadd.f32 %v8223_v53, %v4400_v12  ;;  %v8988_v62 = vld [vmem:[#allocation52_spill] sm:$0xff] }
 0x4cc   : > { %v4463_v34 = vadd.f32 %v4431_v56, %v7779_v33  ;;  %v4464_v52 = vadd.f32 %v4432_v13, %v7786_v61  ;;  %v4465_v18 = vadd.f32 %v4433_v29, %v7793_v19  ;;  %v4466_v11 = vadd.f32 %v4434_v9, %v7800_v3 }
 0x4cd   : > { %4493 = vst [vmem:[#allocation2 + $0x80] sm:$0xff] %v4461_v2  ;;  %4494 = vst [vmem:[#allocation2 + $0x88] sm:$0xff] %v4462_v6  ;;  %v4467_v17 = vadd.f32 %v4435_v0, %v7807_v57  ;;  %v4468_v27 = vadd.f32 %v4436_v43, %v8983_v5  ;;  %v4365_v35 = vmul.f32 %v8190_v38, %v8984_v42 }
 0x4ce   : > { %v4366_v30 = vmul.f32 %v8193_v44, %v8985_v40  ;;  %4495 = vst [vmem:[#allocation2 + $0x90] sm:$0xff] %v4463_v34  ;;  %4496 = vst [vmem:[#allocation2 + $0x98] sm:$0xff] %v4464_v52  ;;  %v4367_v58 = vmul.f32 %v8196_v24, %v8986_v7  ;;  %v4368_v41 = vmul.f32 %v8199_v48, %v8987_v45 }
 0x4cf   : > { %4497 = vst [vmem:[#allocation2 + $0xa0] sm:$0xff] %v4465_v18  ;;  %4498 = vst [vmem:[#allocation2 + $0xa8] sm:$0xff] %v4466_v11  ;;  %v4369_v37 = vmul.f32 %v8202_v4, %v8988_v62  ;;  %v4370_v5 = vmul.f32 %v8205_v63, %v7975_v47  ;;  %v4401_v12 = vmul.f32 %v8219_v23, %v4365_v35 }
 0x4d0   : > { %4499 = vst [vmem:[#allocation2 + $0xb0] sm:$0xff] %v4467_v17  ;;  %4500 = vst [vmem:[#allocation2 + $0xb8] sm:$0xff] %v4468_v27  ;;  %v4402_v56 = vmul.f32 %v8219_v23, %v4366_v30  ;;  %v4371_v13 = vmul.f32 %v8208_v20, %v8000_v25  ;;  %v4372_v29 = vmul.f32 %v8211_v14, %v8033_v22 }
 0x4d1   : > { %v4403_v9 = vmul.f32 %v8219_v23, %v4367_v58  ;;  %v4404_v2 = vmul.f32 %v8219_v23, %v4368_v41  ;;  %v4405_v6 = vmul.f32 %v8219_v23, %v4369_v37  ;;  %v4406_v0 = vmul.f32 %v8219_v23, %v4370_v5 }
 0x4d2   : > { %v4437_v43 = vadd.f32 %v8223_v53, %v4401_v12  ;;  %v4438_v34 = vadd.f32 %v8223_v53, %v4402_v56  ;;  %v4407_v52 = vmul.f32 %v8219_v23, %v4371_v13  ;;  %v4408_v18 = vmul.f32 %v8219_v23, %v4372_v29 }
 0x4d3   : > { %v4439_v11 = vadd.f32 %v8223_v53, %v4403_v9  ;;  %v4440_v17 = vadd.f32 %v8223_v53, %v4404_v2  ;;  %v4441_v27 = vadd.f32 %v8223_v53, %v4405_v6  ;;  %v4442_v35 = vadd.f32 %v8223_v53, %v4406_v0 }
 0x4d4   : > { %v4469_v30 = vadd.f32 %v4437_v43, %v8984_v42  ;;  %v4470_v58 = vadd.f32 %v4438_v34, %v8985_v40  ;;  %v4443_v41 = vadd.f32 %v8223_v53, %v4407_v52  ;;  %v4444_v37 = vadd.f32 %v8223_v53, %v4408_v18 }
 0x4d5   : > { %v4471_v5 = vadd.f32 %v4439_v11, %v8986_v7  ;;  %v4472_v23 = vadd.f32 %v4440_v17, %v8987_v45  ;;  %v4473_v12 = vadd.f32 %v4441_v27, %v8988_v62  ;;  %v4474_v56 = vadd.f32 %v4442_v35, %v7975_v47 }
 0x4d6   : > { %4501 = vst [vmem:[#allocation2 + $0xc0] sm:$0xff] %v4469_v30  ;;  %4502 = vst [vmem:[#allocation2 + $0xc8] sm:$0xff] %v4470_v58  ;;  %v4475_v13 = vadd.f32 %v4443_v41, %v8000_v25  ;;  %v4476_v42 = vadd.f32 %v4444_v37, %v8033_v22 }
 0x4d7   : > { %4503 = vst [vmem:[#allocation2 + $0xd0] sm:$0xff] %v4471_v5  ;;  %4504 = vst [vmem:[#allocation2 + $0xd8] sm:$0xff] %v4472_v23 }
 0x4d8   : > { %4505 = vst [vmem:[#allocation2 + $0xe0] sm:$0xff] %v4473_v12  ;;  %4506 = vst [vmem:[#allocation2 + $0xe8] sm:$0xff] %v4474_v56 }
 0x4d9   : > { %4507 = vst [vmem:[#allocation2 + $0xf0] sm:$0xff] %v4475_v13  ;;  %4508 = vst [vmem:[#allocation2 + $0xf8] sm:$0xff] %v4476_v42 }
 0x4da PF: > { %p4953_p13 = scmp.ne.s32.totalorder %s6071_s30, 1 }
 0x4db   : > { %v8386_v53 = vrot.slane (!%p4953_p13), %v8103_v32, %v8114_v51  ;;  %v8989_v40 = vld [vmem:[#allocation28_spill] sm:$0xff] (!%p4953_p13)  ;;  %v8990_v45 = vld [vmem:[#allocation33_spill] sm:$0xff] (!%p4953_p13)  ;;  %v8991_v29 = vld [vmem:[#allocation50_spill] sm:$0xff] (!%p4953_p13) }
 0x4dc   : > { %4512 = sbr.rel (%p4953_p13) target bundleno = 1276 (0x4fc), region = 68  ;;  %v8390_v7 = vrot.slane (!%p4953_p13), %v8989_v40, %v8114_v51  ;;  %v8992_v2 = vld [vmem:[#allocation38_spill] sm:$0xff] (!%p4953_p13)  ;;  %v8993_v0 = vld [vmem:[#allocation45_spill] sm:$0xff] (!%p4953_p13)  ;;  %v8999_v42 = vld [vmem:[#allocation27_spill] sm:$0xff] (!%p4953_p13) }
 0x4dd   : > { %v4517_v62 = vmul.f32 (!%p4953_p13), %v8386_v53, %v8990_v45  ;;  %v4518_v9 = vmul.f32 (!%p4953_p13), %v8386_v53, %v8991_v29  ;;  %v4519_v6 = vmul.f32 (!%p4953_p13), %v8386_v53, %v8992_v2  ;;  %v4520_v43 = vmul.f32 (!%p4953_p13), %v8386_v53, %v8993_v0  ;;  %v8994_v34 = vld [vmem:[#allocation25_spill] sm:$0xff] (!%p4953_p13)  ;;  %v8996_v51 = vld [vmem:[#allocation54_spill] sm:$0xff] (!%p4953_p13)  ;;  %v8997_v17 = vld [vmem:[#allocation55_spill] sm:$0xff] (!%p4953_p13) }
 0x4de   : > { %v4521_v32 = vmul.f32 (!%p4953_p13), %v8386_v53, %v8994_v34  ;;  %v8995_v52 = vld [vmem:[#allocation53_spill] sm:$0xff] (!%p4953_p13)  ;;  %v4523_v11 = vmul.f32 (!%p4953_p13), %v8386_v53, %v8996_v51  ;;  %v4524_v27 = vmul.f32 (!%p4953_p13), %v8386_v53, %v8997_v17  ;;  %v8998_v56 = vld [vmem:[#allocation26_spill] sm:$0xff] (!%p4953_p13)  ;;  %v9002_v2 = vld [vmem:[#allocation31_spill] sm:$0xff] (!%p4953_p13)  ;;  %v4525_v51 = vmul.f32 (!%p4953_p13), %v8386_v53, %v8142_v60 }
 0x4df   : > { %v4522_v18 = vmul.f32 (!%p4953_p13), %v8386_v53, %v8995_v52  ;;  %v4553_v35 = vadd.f32 (!%p4953_p13), %v8390_v7, %v4517_v62  ;;  %v4554_v30 = vadd.f32 (!%p4953_p13), %v8390_v7, %v4518_v9  ;;  %v4555_v58 = vadd.f32 (!%p4953_p13), %v8390_v7, %v4519_v6  ;;  %v9000_v45 = vld [vmem:[#allocation29_spill] sm:$0xff] (!%p4953_p13)  ;;  %v9001_v29 = vld [vmem:[#allocation30_spill] sm:$0xff] (!%p4953_p13)  ;;  %v9003_v0 = vld [vmem:[#allocation32_spill] sm:$0xff] (!%p4953_p13) }
 0x4e0   : > { %v4556_v41 = vadd.f32 (!%p4953_p13), %v8390_v7, %v4520_v43  ;;  %v4557_v37 = vadd.f32 (!%p4953_p13), %v8390_v7, %v4521_v32  ;;  %v4559_v23 = vadd.f32 (!%p4953_p13), %v8390_v7, %v4523_v11  ;;  %v4560_v12 = vadd.f32 (!%p4953_p13), %v8390_v7, %v4524_v27  ;;  %v9004_v34 = vld [vmem:[#allocation34_spill] sm:$0xff] (!%p4953_p13)  ;;  %v9005_v52 = vld [vmem:[#allocation35_spill] sm:$0xff] (!%p4953_p13) }
 0x4e1   : > { %v4558_v5 = vadd.f32 (!%p4953_p13), %v8390_v7, %v4522_v18  ;;  %v4585_v13 = vadd.f32 (!%p4953_p13), %v4553_v35, %v8998_v56  ;;  %v4586_v40 = vadd.f32 (!%p4953_p13), %v4554_v30, %v8999_v42  ;;  %v4587_v62 = vadd.f32 (!%p4953_p13), %v4555_v58, %v9000_v45  ;;  %v9008_v56 = vld [vmem:[#allocation39_spill] sm:$0xff] (!%p4953_p13)  ;;  %v9009_v42 = vld [vmem:[#allocation40_spill] sm:$0xff] (!%p4953_p13)  ;;  %v9010_v45 = vld [vmem:[#allocation41_spill] sm:$0xff] (!%p4953_p13) }
 0x4e2   : > { %v4588_v9 = vadd.f32 (!%p4953_p13), %v4556_v41, %v9001_v29  ;;  %v4589_v6 = vadd.f32 (!%p4953_p13), %v4557_v37, %v9002_v2  ;;  %v4591_v32 = vadd.f32 (!%p4953_p13), %v4559_v23, %v9004_v34  ;;  %v4592_v18 = vadd.f32 (!%p4953_p13), %v4560_v12, %v9005_v52  ;;  %v9006_v37 = vld [vmem:[#allocation36_spill] sm:$0xff] (!%p4953_p13)  ;;  %v9007_v23 = vld [vmem:[#allocation37_spill] sm:$0xff] (!%p4953_p13)  ;;  %v9011_v29 = vld [vmem:[#allocation42_spill] sm:$0xff] (!%p4953_p13) }
 0x4e3   : > { %v4590_v43 = vadd.f32 %v4558_v5, %v9003_v0  ;;  %4617 = vst [vmem:[%s6408_s9] sm:$0xff] %v4585_v13  ;;  %4618 = vst [vmem:[%s6408_s9 + $0x8] sm:$0xff] %v4586_v40  ;;  %v4526_v11 = vmul.f32 %v8386_v53, %v8145_v54  ;;  %v4527_v17 = vmul.f32 %v8386_v53, %v8148_v46  ;;  %v9012_v2 = vld [vmem:[#allocation43_spill] sm:$0xff]  ;;  %v9013_v0 = vld [vmem:[#allocation44_spill] sm:$0xff] }
 0x4e4   : > { %4619 = vst [vmem:[%s6408_s9 + $0x10] sm:$0xff] %v4587_v62  ;;  %4620 = vst [vmem:[%s6408_s9 + $0x18] sm:$0xff] %v4588_v9  ;;  %v4528_v27 = vmul.f32 %v8386_v53, %v8151_v31  ;;  %v4529_v35 = vmul.f32 %v8386_v53, %v8154_v55  ;;  %v4530_v30 = vmul.f32 %v8386_v53, %v8157_v36 }
 0x4e5   : > { %4621 = vst [vmem:[%s6408_s9 + $0x20] sm:$0xff] %v4589_v6  ;;  %4622 = vst [vmem:[%s6408_s9 + $0x28] sm:$0xff] %v4590_v43  ;;  %v4531_v60 = vmul.f32 %v8386_v53, %v8160_v21  ;;  %v4532_v54 = vmul.f32 %v8386_v53, %v8163_v50  ;;  %v4561_v46 = vadd.f32 %v8390_v7, %v4525_v51 }
 0x4e6   : > { %4623 = vst [vmem:[%s6408_s9 + $0x30] sm:$0xff] %v4591_v32  ;;  %4624 = vst [vmem:[%s6408_s9 + $0x38] sm:$0xff] %v4592_v18  ;;  %v4562_v31 = vadd.f32 %v8390_v7, %v4526_v11  ;;  %v4563_v58 = vadd.f32 %v8390_v7, %v4527_v17  ;;  %v4564_v55 = vadd.f32 %v8390_v7, %v4528_v27 }
 0x4e7   : > { %v4565_v36 = vadd.f32 %v8390_v7, %v4529_v35  ;;  %v4566_v41 = vadd.f32 %v8390_v7, %v4530_v30  ;;  %v4567_v21 = vadd.f32 %v8390_v7, %v4531_v60  ;;  %v4568_v50 = vadd.f32 %v8390_v7, %v4532_v54 }
 0x4e8   : > { %v4593_v5 = vadd.f32 %v4561_v46, %v9006_v37  ;;  %v4594_v12 = vadd.f32 %v4562_v31, %v9007_v23  ;;  %v4595_v13 = vadd.f32 %v4563_v58, %v9008_v56  ;;  %v4596_v40 = vadd.f32 %v4564_v55, %v9009_v42  ;;  %v9014_v55 = vld [vmem:[#allocation46_spill] sm:$0xff] }
 0x4e9   : > { %v4597_v62 = vadd.f32 %v4565_v36, %v9010_v45  ;;  %v4598_v9 = vadd.f32 %v4566_v41, %v9011_v29  ;;  %v4599_v6 = vadd.f32 %v4567_v21, %v9012_v2  ;;  %v4600_v43 = vadd.f32 %v4568_v50, %v9013_v0  ;;  %v9015_v41 = vld [vmem:[#allocation48_spill] sm:$0xff]  ;;  %v9016_v50 = vld [vmem:[#allocation47_spill] sm:$0xff] }
 0x4ea   : > { %4625 = vst [vmem:[%s6408_s9 + $0x40] sm:$0xff] %v4593_v5  ;;  %4626 = vst [vmem:[%s6408_s9 + $0x48] sm:$0xff] %v4594_v12  ;;  %v4533_v34 = vmul.f32 %v8386_v53, %v8166_v16  ;;  %v4534_v32 = vmul.f32 %v8386_v53, %v8169_v59  ;;  %v4535_v52 = vmul.f32 %v8386_v53, %v8172_v28  ;;  %v9017_v5 = vld [vmem:[#allocation51_spill] sm:$0xff]  ;;  %v9018_v12 = vld [vmem:[#allocation49_spill] sm:$0xff] }
 0x4eb   : > { %4627 = vst [vmem:[%s6408_s9 + $0x50] sm:$0xff] %v4595_v13  ;;  %4628 = vst [vmem:[%s6408_s9 + $0x58] sm:$0xff] %v4596_v40  ;;  %v4536_v18 = vmul.f32 %v8386_v53, %v8175_v8  ;;  %v4537_v51 = vmul.f32 %v8386_v53, %v8178_v49  ;;  %v4538_v11 = vmul.f32 %v8386_v53, %v8181_v26  ;;  %v9019_v13 = vld [vmem:[#allocation52_spill] sm:$0xff] }
 0x4ec   : > { %4629 = vst [vmem:[%s6408_s9 + $0x60] sm:$0xff] %v4597_v62  ;;  %4630 = vst [vmem:[%s6408_s9 + $0x68] sm:$0xff] %v4598_v9  ;;  %v4539_v16 = vmul.f32 %v8386_v53, %v8184_v10  ;;  %v4540_v59 = vmul.f32 %v8386_v53, %v8187_v39  ;;  %v4569_v28 = vadd.f32 %v8390_v7, %v4533_v34 }
 0x4ed   : > { %4631 = vst [vmem:[%s6408_s9 + $0x70] sm:$0xff] %v4599_v6  ;;  %4632 = vst [vmem:[%s6408_s9 + $0x78] sm:$0xff] %v4600_v43  ;;  %v4570_v8 = vadd.f32 %v8390_v7, %v4534_v32  ;;  %v4571_v17 = vadd.f32 %v8390_v7, %v4535_v52  ;;  %v4572_v49 = vadd.f32 %v8390_v7, %v4536_v18 }
 0x4ee   : > { %v4573_v26 = vadd.f32 %v8390_v7, %v4537_v51  ;;  %v4574_v27 = vadd.f32 %v8390_v7, %v4538_v11  ;;  %v4575_v10 = vadd.f32 %v8390_v7, %v4539_v16  ;;  %v4576_v39 = vadd.f32 %v8390_v7, %v4540_v59 }
 0x4ef   : > { %v4601_v35 = vadd.f32 %v4569_v28, %v7710_v15  ;;  %v4602_v30 = vadd.f32 %v4570_v8, %v7771_v1  ;;  %v4603_v60 = vadd.f32 %v4571_v17, %v7779_v33  ;;  %v4604_v54 = vadd.f32 %v4572_v49, %v7786_v61 }
 0x4f0   : > { %v4605_v46 = vadd.f32 %v4573_v26, %v7793_v19  ;;  %v4606_v31 = vadd.f32 %v4574_v27, %v7800_v3  ;;  %v4607_v58 = vadd.f32 %v4575_v10, %v7807_v57  ;;  %v4608_v36 = vadd.f32 %v4576_v39, %v9014_v55 }
 0x4f1   : > { %4633 = vst [vmem:[%s6408_s9 + $0x80] sm:$0xff] %v4601_v35  ;;  %4634 = vst [vmem:[%s6408_s9 + $0x88] sm:$0xff] %v4602_v30  ;;  %v4541_v15 = vmul.f32 %v8386_v53, %v8190_v38  ;;  %v4542_v1 = vmul.f32 %v8386_v53, %v8193_v44  ;;  %v4543_v33 = vmul.f32 %v8386_v53, %v8196_v24 }
 0x4f2   : > { %4635 = vst [vmem:[%s6408_s9 + $0x90] sm:$0xff] %v4603_v60  ;;  %4636 = vst [vmem:[%s6408_s9 + $0x98] sm:$0xff] %v4604_v54  ;;  %v4544_v61 = vmul.f32 %v8386_v53, %v8199_v48  ;;  %v4545_v19 = vmul.f32 %v8386_v53, %v8202_v4  ;;  %v4546_v3 = vmul.f32 %v8386_v53, %v8205_v63 }
 0x4f3   : > { %4637 = vst [vmem:[%s6408_s9 + $0xa0] sm:$0xff] %v4605_v46  ;;  %4638 = vst [vmem:[%s6408_s9 + $0xa8] sm:$0xff] %v4606_v31  ;;  %v4547_v57 = vmul.f32 %v8386_v53, %v8208_v20  ;;  %v4548_v38 = vmul.f32 %v8386_v53, %v8211_v14  ;;  %v4577_v44 = vadd.f32 %v8390_v7, %v4541_v15 }
 0x4f4   : > { %4639 = vst [vmem:[%s6408_s9 + $0xb0] sm:$0xff] %v4607_v58  ;;  %4640 = vst [vmem:[%s6408_s9 + $0xb8] sm:$0xff] %v4608_v36  ;;  %v4578_v24 = vadd.f32 %v8390_v7, %v4542_v1  ;;  %v4579_v48 = vadd.f32 %v8390_v7, %v4543_v33  ;;  %v4580_v4 = vadd.f32 %v8390_v7, %v4544_v61 }
 0x4f5   : > { %v4581_v63 = vadd.f32 %v8390_v7, %v4545_v19  ;;  %v4582_v20 = vadd.f32 %v8390_v7, %v4546_v3  ;;  %v4583_v14 = vadd.f32 %v8390_v7, %v4547_v57  ;;  %v4584_v53 = vadd.f32 %v8390_v7, %v4548_v38 }
 0x4f6   : > { %v4609_v21 = vadd.f32 %v4577_v44, %v9015_v41  ;;  %v4610_v37 = vadd.f32 %v4578_v24, %v9016_v50  ;;  %v4611_v23 = vadd.f32 %v4579_v48, %v9017_v5  ;;  %v4612_v56 = vadd.f32 %v4580_v4, %v9018_v12 }
 0x4f7   : > { %v4613_v42 = vadd.f32 %v4581_v63, %v9019_v13  ;;  %v4614_v40 = vadd.f32 %v4582_v20, %v7975_v47  ;;  %v4615_v45 = vadd.f32 %v4583_v14, %v8000_v25  ;;  %v4616_v62 = vadd.f32 %v4584_v53, %v8033_v22 }
 0x4f8   : > { %4641 = vst [vmem:[%s6408_s9 + $0xc0] sm:$0xff] %v4609_v21  ;;  %4642 = vst [vmem:[%s6408_s9 + $0xc8] sm:$0xff] %v4610_v37 }
 0x4f9   : > { %4643 = vst [vmem:[%s6408_s9 + $0xd0] sm:$0xff] %v4611_v23  ;;  %4644 = vst [vmem:[%s6408_s9 + $0xd8] sm:$0xff] %v4612_v56 }
 0x4fa   : > { %4645 = vst [vmem:[%s6408_s9 + $0xe0] sm:$0xff] %v4613_v42  ;;  %4646 = vst [vmem:[%s6408_s9 + $0xe8] sm:$0xff] %v4614_v40 }
 0x4fb   : > { %4647 = vst [vmem:[%s6408_s9 + $0xf0] sm:$0xff] %v4615_v45  ;;  %4648 = vst [vmem:[%s6408_s9 + $0xf8] sm:$0xff] %v4616_v62 }
 0x4fc PF: > { %s9020_s29 = sld [smem:[#allocation19_spill]]  ;;  %s4963_s30 = sshll.u32 %s6075_s8, 12 }
 0x4fd   : > { %s9021_s23 = sld [smem:[#allocation58_spill]]  ;;  %s4663_s18 = sshll.u32 %s6408_s9, 4  ;;  %s8559_s18 = int_to_ptr.vmem [resolvable:$true] %s4663_s18 }
 0x4fe   : > { %s4650_s12 = scalar_lea.sflag [#allocation7], %s6362_s21  ;;  %s5961_s10 = scalar_lea.vmem %s8559_s18, 4096 }
 0x4ff   : > { %p5962_p12 = scmp.ne.s32.totalorder %s8559_s18, %s5961_s10  ;;  %s6100_s0 = smov [#allocation10]  }
 0x500   : > { %s5965_s16 = sshll.u32 %s6100_s0, 4  ;;  %s5966_s16 = int_to_ptr.vmem [resolvable:$false] %s5965_s16 }
 0x501   : > { %s5967_s8 = scalar_lea.vmem %s5966_s16, 8192  ;;  %p5968_p3 = scmp.lt.s32.totalorder %s8559_s18, %s5966_s16 }
 0x502   : > { %p9022_p0 = scmp.ne.s32.totalorder %s9020_s29, 0  ;;  %p5969_p9 = scmp.lt.s32.totalorder %s5967_s8, %s5961_s10 }
 0x503   : > { %s8556_s22 = scalar_lea.hbm %s9021_s23, %s4963_s30 }
 0x504   : > { %p5963_p5 = pnand %p5962_p12, %p9022_p0  ;;  %p5970_p2 = por %p5969_p9, %p5968_p3 }
 0x506   : > { %p5964_p10 = pneg %p5963_p5 }
 0x508   : > { %p5971_p11 = pnand %p5970_p2, %p5964_p10 }
 0x50a   : > { %5974 = shalt.err (!%p5971_p11)
}
 0x50b   : > { %s5975_s14 = scalar_lea.hbm %s8556_s22, 4096  ;;  %s5979_s7 = scalar_lea.hbm %s9021_s23, 8192 }
 0x50c   : > { %p5976_p7 = scmp.ne.s32.totalorder %s8556_s22, %s5975_s14  ;;  %p5980_p1 = scmp.lt.u32.totalorder %s8556_s22, %s9021_s23 }
 0x50d   : > { %p5981_p6 = scmp.lt.u32.totalorder %s5979_s7, %s5975_s14  ;;  %p5983_p12 = scmp.lt.u32.totalorder %s5975_s14, %s8556_s22 }
 0x50e   : > { %p5977_p4 = pnand %p5976_p7, %p9022_p0 }
 0x50f   : > { %p5982_p13 = por %p5981_p6, %p5980_p1 }
 0x510   : > { %p5978_p8 = pneg %p5977_p4 }
 0x511   : > { %p5984_p5 = por %p5983_p12, %p5982_p13 }
 0x513   : > { %p5985_p10 = pnand %p5984_p5, %p5978_p8 }
 0x515   : > { %5988 = shalt.err (!%p5985_p10)
}
 0x516   : > { %s6101_s1 = smov 128   ;;  %s6102_s28 = smov 8  }
 0x517   : > { %5676 = dma.vmem_to_hbm [thread:$0]  (%p9022_p0), %s8559_s18, 4096, %s8556_s22, %s4650_s12, %s6101_s1, %s6101_s1, %s6102_s28  }
 0x518 PF: > { %s9023_s24 = sld [smem:[#allocation14_spill]]  ;;  %s9024_s27 = sld [smem:[#allocation20_spill]] }
 0x519   : > { %p5690_p3 = scmp.ge.s32.totalorder %s6087_s11, 2 }
 0x51e   : > { %s4678_s30 = sand.u32 1, %s9023_s24   ;;  %p9025_p9 = scmp.ne.s32.totalorder %s9024_s27, 0 }
 0x51f   : > { %s4679_s15 = scalar_lea.sflag [#allocation7], %s4678_s30 }
 0x520   : > { %p5686_p2 = pnand %p5690_p3, %p9025_p9 }
 0x522   : > { %6042 = dma.done.wait (!%p5686_p2), %s4679_s15, 4096  }
 0x523   : > { %6044 = vsyncadd (!%p5686_p2), %s4679_s15, 4294963200  ;;  %s26_s11 = sadd.s32 1, %s6087_s11   ;;  %s9026_s20 = sld [smem:[#allocation23_spill]] }
 0x524   : > { %p23_p11 = scmp.ge.s32.totalorder %s26_s11, 6   ;;  %s9027_s27 = sld [smem:[#allocation15_spill]] }
 0x525   : > { %s9028_s28 = sld [smem:[#allocation16_spill]]  ;;  %s9029_s29 = sld [smem:[#allocation24_spill]] }
 0x526   : > { %s9030_s30 = sld [smem:[#allocation17_spill]]  ;;  %s9031_s8 = sld [smem:[#allocation18_spill]] }
 0x527   : > { %s9032_s9 = sld [smem:[#allocation21_spill]]  ;;  %s9033_s10 = sld [smem:[#allocation22_spill]] }
 0x528   : > { %s9034_s24 = smov %s6051_s25  ;;  %s9035_s25 = smov %s6055_s26 }
 0x529   : > { %s9036_s26 = smov %s9026_s20  ;;  %25 = sbr.rel (!%p23_p11) target bundleno = 15 (0xf), region = 133 }
 0x530   :  { %4684 = vsyncpa [#allocation6], 1 }
 0x531   :  { %4686 = vsyncpa [#allocation6 + $0x1], 1 }
 0x532   :  { %4687 = vsyncpa [#allocation9], 1 }
 0x533   :  { %4689 = vsyncpa [#allocation9 + $0x1], 1 }
 0x534   :  { %4690 = vsyncpa [#allocation7], 1 }
 0x535   :  { %4692 = vsyncpa [#allocation7 + $0x1], 1 }

</bundles_post_ra>
